<compile_context>
chip_gen: v5e
topology: v5e:2x2
jax: 0.10.0
libtpu: 0.0.40
codegen_flags: <defaults>
</compile_context>

<pallas_src>
import math

import numpy as np
import jax
import jax.numpy as jnp
from jax.experimental import pallas as pl
from jax.experimental.pallas import tpu as pltpu

# ----------------------------- configuration (small, synthetic) -------------
BATCH = 2
N_OBS_STEPS = 2
N_CAMERAS = 1
IMG_C, IMG_H, IMG_W = 3, 32, 32
PATCH = 8                      # conv stem kernel/stride
CONV_OUT = 32                  # feature-map channels
GN_GROUPS = 2                  # 32 // 16 as in use_group_norm
NUM_KP = 16                    # spatial_softmax_num_keypoints
HORIZON = 8
ACTION_DIM = 4
N_LAYERS = 2
N_HEADS = 2
N_EMB = 32
NUM_TRAIN_STEPS = 100
T_COND = 1 + N_OBS_STEPS       # time token + obs tokens
COND_DIM = NUM_KP * 2 * N_CAMERAS

HF, WF = IMG_H // PATCH, IMG_W // PATCH
HW_FEAT = HF * WF
CK2 = IMG_C * PATCH * PATCH
K2 = NUM_KP * 2
HEAD_DIM = N_EMB // N_HEADS
N_IMG = N_OBS_STEPS * N_CAMERAS        # images per batch element
ROWS_IMG = N_IMG * HW_FEAT             # conv-stem matmul rows per batch element


def _const_index_map(ndim):
    return lambda b: (0,) * ndim


def _resident_spec(arr):
    """Full-array VMEM-resident block (same block index for every grid step)."""
    return pl.BlockSpec(arr.shape, _const_index_map(arr.ndim))


# ----------------------------- in-kernel math helpers ------------------------
def _ln(x, g, b, eps=1e-5):
    mu = jnp.mean(x, axis=-1, keepdims=True)
    xc = x - mu
    var = jnp.mean(xc * xc, axis=-1, keepdims=True)
    return xc * jax.lax.rsqrt(var + eps) * g + b


def _gelu(x):
    # tanh-approximate GELU (see TODO at top).  Stays f32 (v5e has no bf16 VPU/EUP).
    c = jnp.float32(math.sqrt(2.0 / math.pi))
    return 0.5 * x * (1.0 + jnp.tanh(c * (x + 0.044715 * x * x * x)))


def _mish(x):
    # numerically-stable softplus (no exp overflow for large positive x).
    sp = jnp.maximum(x, 0.0) + jnp.log(1.0 + jnp.exp(-jnp.abs(x)))
    return x * jnp.tanh(sp)


def _attention(xq, xkv, l, wq, wk, wv, bq, bk, bv, wo, mask, scale):
    """Multi-head attention with per-head pre-split weights.

    Every per-head Q/K/V projection lands at lane offset 0 (no lane slicing),
    and the output projection is applied per head and summed (mathematically
    identical to concat-heads + single projection, but with no lane concat).
    """
    out = None
    for h in range(N_HEADS):
        qh = jnp.dot(xq, wq[l, h], preferred_element_type=jnp.float32) + bq[l, h]
        kh = jnp.dot(xkv, wk[l, h], preferred_element_type=jnp.float32) + bk[l, h]
        vh = jnp.dot(xkv, wv[l, h], preferred_element_type=jnp.float32) + bv[l, h]
        s = jax.lax.dot_general(qh, kh, (((1,), (1,)), ((), ())),
                                preferred_element_type=jnp.float32) * scale + mask
        s = s - jnp.max(s, axis=-1, keepdims=True)
        p = jnp.exp(s)
        p = p * pl.reciprocal(jnp.sum(p, axis=-1, keepdims=True), approx=True)
        oh = jnp.dot(p, vh, preferred_element_type=jnp.float32)
        ph = jnp.dot(oh, wo[l, h], preferred_element_type=jnp.float32)
        out = ph if out is None else out + ph
    return out


# ----------------------------- the single fused kernel -----------------------
_WEIGHT_NAMES = (
    # RGB encoder
    "mean_cols", "inv_std_cols", "conv_w", "conv_b",
    "gn_ind", "gn_ind_t", "gn_g", "gn_b", "row_expand",
    "kp_w", "kp_b", "pos_x_blk", "pos_y_blk",
    "out_wx", "out_wy", "out_b",
    # diffusion transformer
    "act_mean", "act_istd", "temb_table",
    "input_w", "input_b", "pos_emb",
    "cond_obs_w", "cond_obs_b", "cond_pos_emb",
    "enc_w1", "enc_b1", "enc_w2", "enc_b2",
    "ln1_g", "ln1_b", "ln2_g", "ln2_b", "ln3_g", "ln3_b",
    "wsq", "wsk", "wsv", "bsq", "bsk", "bsv", "wso", "bso",
    "wcq", "wck", "wcv", "bcq", "bck", "bcv", "wco", "bco",
    "ff_w1", "ff_b1", "ff_w2", "ff_b2",
    "lnf_g", "lnf_b", "head_w", "head_b",
    "tgt_mask", "mem_mask",
)


def _policy_loss_kernel(*refs):
    patches_ref, act_ref, noise_ref, ts_ref, sa_ref, sb_ref = refs[:6]
    o_ref = refs[-1]
    w = dict(zip(_WEIGHT_NAMES, refs[6:-1]))

    b = pl.program_id(0)
    scale = 1.0 / math.sqrt(HEAD_DIM)

    # ------------- RGB encoder: all N_IMG images batched into the rows -------
    # fused input normalization ((x - mean) / (std + 1e-8) folded per column)
    x = (patches_ref[0] - w["mean_cols"][...]) * w["inv_std_cols"][...]      # (R, CK2)
    feat = (jnp.dot(x, w["conv_w"][...], preferred_element_type=jnp.float32)
            + w["conv_b"][...])                                              # (R, Cf)

    # GroupNorm statistics: ONE fused matmul over [feat; feat*feat] rows.
    stacked = jnp.concatenate([feat, feat * feat], axis=0)                   # (2R, Cf)
    g_all = jnp.dot(stacked, w["gn_ind"][...],
                    preferred_element_type=jnp.float32)                      # (2R, G)
    inv_cnt = jnp.float32(1.0 / (HW_FEAT * (CONV_OUT // GN_GROUPS)))
    scales, shifts = [], []
    for i in range(N_IMG):                                                   # 16-row slabs
        s1 = jnp.sum(g_all[i * HW_FEAT:(i + 1) * HW_FEAT], axis=0, keepdims=True)
        s2 = jnp.sum(g_all[ROWS_IMG + i * HW_FEAT: ROWS_IMG + (i + 1) * HW_FEAT],
                     axis=0, keepdims=True)
        mean_g = s1 * inv_cnt
        # NOTE: E[x^2]-E[x]^2 in f32; activations stay O(1) after the normalized
        # conv stem — switch to a centered two-pass if they ever grow large.
        var_g = s2 * inv_cnt - mean_g * mean_g
        rstd_g = jax.lax.rsqrt(var_g + 1e-5)
        mean_c = jnp.dot(mean_g, w["gn_ind_t"][...], preferred_element_type=jnp.float32)
        rstd_c = jnp.dot(rstd_g, w["gn_ind_t"][...], preferred_element_type=jnp.float32)
        scales.append(rstd_c * w["gn_g"][...])
        shifts.append(w["gn_b"][...] - mean_c * rstd_c * w["gn_g"][...])
    scale_rows = jnp.dot(w["row_expand"][...], jnp.concatenate(scales, axis=0),
                         preferred_element_type=jnp.float32)                 # (R, Cf)
    shift_rows = jnp.dot(w["row_expand"][...], jnp.concatenate(shifts, axis=0),
                         preferred_element_type=jnp.float32)
    feat = jnp.maximum(feat * scale_rows + shift_rows, 0.0)                  # GN + ReLU

    # SpatialSoftmax: 1x1 keypoint conv (batched), per-image softmax over HW.
    kp = (jnp.dot(feat, w["kp_w"][...], preferred_element_type=jnp.float32)
          + w["kp_b"][...])                                                  # (R, K)
    a_list = []
    for i in range(N_IMG):
        ki = kp[i * HW_FEAT:(i + 1) * HW_FEAT]
        ki = ki - jnp.max(ki, axis=0, keepdims=True)
        e = jnp.exp(ki)
        a_list.append(e * pl.reciprocal(jnp.sum(e, axis=0, keepdims=True), approx=True))
    a_all = jnp.concatenate(a_list, axis=0)                                  # (R, K)
    # block-diagonal position matrices -> expected x / y per image, per keypoint
    exy_x = jnp.dot(w["pos_x_blk"][...], a_all, preferred_element_type=jnp.float32)
    exy_y = jnp.dot(w["pos_y_blk"][...], a_all, preferred_element_type=jnp.float32)
    # final Linear(2K,2K)+ReLU on the interleaved (x0,y0,...) keypoint vector,
    # expressed with parity-split weights to avoid any interleave relayout.
    img_feat = jnp.maximum(
        jnp.dot(exy_x, w["out_wx"][...], preferred_element_type=jnp.float32)
        + jnp.dot(exy_y, w["out_wy"][...], preferred_element_type=jnp.float32)
        + w["out_b"][...], 0.0)                                              # (N_IMG, 2K)
    # n_cameras == 1, so rows are exactly the per-obs-step condition features.
    cond_obs_feat = img_feat                                                 # (To, cond_dim)

    # ------------- DDPM add_noise + conditioning (SMEM tables) ---------------
    t = ts_ref[b]                              # int32 timestep for this sample
    ca = sa_ref[t]                             # sqrt(alphas_cumprod[t])
    cb = sb_ref[t]                             # sqrt(1 - alphas_cumprod[t])
    traj = (act_ref[0] - w["act_mean"][...]) * w["act_istd"][...]            # normalize_targets
    eps = noise_ref[0]
    noisy = ca * traj + cb * eps

    temb = w["temb_table"][t]                                                # (1, E) sinusoidal emb
    cond_obs = (jnp.dot(cond_obs_feat, w["cond_obs_w"][...],
                        preferred_element_type=jnp.float32) + w["cond_obs_b"][...])
    c = jnp.concatenate([temb, cond_obs], axis=0) + w["cond_pos_emb"][...]   # (Tc, E)
    h = _mish(jnp.dot(c, w["enc_w1"][...], preferred_element_type=jnp.float32)
              + w["enc_b1"][...])
    memory = (jnp.dot(h, w["enc_w2"][...], preferred_element_type=jnp.float32)
              + w["enc_b2"][...])

    # ------------- decoder trunk ---------------------------------------------
    xt = (jnp.dot(noisy, w["input_w"][...], preferred_element_type=jnp.float32)
          + w["input_b"][...] + w["pos_emb"][...])                           # (T, E)
    tm = w["tgt_mask"][...]
    mm = w["mem_mask"][...]
    for l in range(N_LAYERS):
        # self-attention (pre-LN)
        hh = _ln(xt, w["ln1_g"][l], w["ln1_b"][l])
        xt = xt + _attention(hh, hh, l, w["wsq"], w["wsk"], w["wsv"],
                             w["bsq"], w["bsk"], w["bsv"], w["wso"],
                             tm, scale) + w["bso"][l]
        # cross-attention on the conditioning memory
        hh = _ln(xt, w["ln2_g"][l], w["ln2_b"][l])
        xt = xt + _attention(hh, memory, l, w["wcq"], w["wck"], w["wcv"],
                             w["bcq"], w["bck"], w["bcv"], w["wco"],
                             mm, scale) + w["bco"][l]
        # feed-forward
        hh = _ln(xt, w["ln3_g"][l], w["ln3_b"][l])
        f = _gelu(jnp.dot(hh, w["ff_w1"][l], preferred_element_type=jnp.float32)
                  + w["ff_b1"][l])
        xt = xt + jnp.dot(f, w["ff_w2"][l], preferred_element_type=jnp.float32) + w["ff_b2"][l]

    xt = _ln(xt, w["lnf_g"][...], w["lnf_b"][...])
    pred = (jnp.dot(xt, w["head_w"][...], preferred_element_type=jnp.float32)
            + w["head_b"][...])

    # prediction_type == 'epsilon' -> target is the noise; emit per-sample SSE.
    d = pred - eps
    o_ref[0] = jnp.sum(jnp.sum(d * d, axis=1, keepdims=True), axis=0, keepdims=True)


def _policy_loss_call(params, patches, action, noise, timesteps):
    B = action.shape[0]
    weights = [params[name] for name in _WEIGHT_NAMES]
    in_specs = [
        pl.BlockSpec((1, ROWS_IMG, CK2), lambda b: (b, 0, 0)),          # im2col patches
        pl.BlockSpec((1, HORIZON, ACTION_DIM), lambda b: (b, 0, 0)),    # action
        pl.BlockSpec((1, HORIZON, ACTION_DIM), lambda b: (b, 0, 0)),    # noise
        pl.BlockSpec(memory_space=pltpu.MemorySpace.SMEM),              # timesteps (B,)
        pl.BlockSpec(memory_space=pltpu.MemorySpace.SMEM),              # sqrt(acp) table
        pl.BlockSpec(memory_space=pltpu.MemorySpace.SMEM),              # sqrt(1-acp) table
    ]
    # Resident weight blocks (constant index_map -> DMA'd once).  At KB scale
    # default double buffering is fine; use pipeline_mode=pl.Buffered(1) when
    # scaling the backbone up (esp. on v7x's 64 MiB VMEM).
    in_specs += [_resident_spec(wt) for wt in weights]
    return pl.pallas_call(
        _policy_loss_kernel,
        grid=(B,),
        in_specs=in_specs,
        out_specs=pl.BlockSpec((1, 1, 1), lambda b: (b, 0, 0)),
        out_shape=jax.ShapeDtypeStruct((B, 1, 1), jnp.float32),
        compiler_params=pltpu.CompilerParams(dimension_semantics=("parallel",)),
    )(patches, action, noise, timesteps, params["sqrt_acp"], params["sqrt_om_acp"],
      *weights)


# ----------------------------- model glue (thin JAX wrapper) -----------------
def policy_forward(params, images, action, rng):
    """TransformerDiffusionPolicy.forward (training path) -> scalar MSE loss."""
    B, S = images.shape[:2]
    # stack cameras at dim -4 and im2col (one reshape/transpose; pixel norm,
    # target norm, DDPM coefs and the time embedding are all fused in-kernel).
    imgs = images[:, :, None]                                    # (B,S,n_cam,C,H,W)
    patches = (imgs.reshape(B, N_IMG, IMG_C, HF, PATCH, WF, PATCH)
                   .transpose(0, 1, 3, 5, 2, 4, 6)
                   .reshape(B, ROWS_IMG, CK2))

    k_noise, k_t = jax.random.split(rng)
    noise = jax.random.normal(k_noise, action.shape, jnp.float32)
    timesteps = jax.random.randint(k_t, (B,), 0, NUM_TRAIN_STEPS, dtype=jnp.int32)

    sse = _policy_loss_call(params, patches, action, noise, timesteps)
    return jnp.sum(sse) / (B * HORIZON * ACTION_DIM)


# ----------------------------- parameter init --------------------------------
def _make_alphas_cumprod(num_steps):
    def alpha_bar(t):
        return math.cos((t + 0.008) / 1.008 * math.pi / 2) ** 2
    betas = [min(1.0 - alpha_bar((i + 1) / num_steps) / alpha_bar(i / num_steps), 0.999)
             for i in range(num_steps)]
    return jnp.cumprod(1.0 - jnp.asarray(betas, jnp.float32))


def _make_masks():
    tgt = np.where(np.tril(np.ones((HORIZON, HORIZON))) == 1, 0.0, -np.inf).astype(np.float32)
    t = np.arange(HORIZON)[:, None]
    s = np.arange(T_COND)[None, :]
    mem = np.where(t >= (s - 1), 0.0, -np.inf).astype(np.float32)
    return jnp.asarray(tgt), jnp.asarray(mem)


def init_params(key):
    ks = iter(jax.random.split(key, 64))

    def xav(shape):
        bound = math.sqrt(6.0 / (shape[-2] + shape[-1]))
        return jax.random.uniform(next(ks), shape, jnp.float32, -bound, bound)

    zeros = lambda s: jnp.zeros(s, jnp.float32)
    ones = lambda s: jnp.ones(s, jnp.float32)
    E, L, H, D = N_EMB, N_LAYERS, N_HEADS, HEAD_DIM

    # ---- RGB encoder ----
    img_mean = jnp.full((IMG_C,), 0.5, jnp.float32)
    img_std = jnp.full((IMG_C,), 0.25, jnp.float32)
    mean_cols = jnp.repeat(img_mean, PATCH * PATCH).reshape(1, CK2)
    inv_std_cols = jnp.repeat(1.0 / (img_std + 1e-8), PATCH * PATCH).reshape(1, CK2)

    ch = np.arange(CONV_OUT) // (CONV_OUT // GN_GROUPS)
    gn_ind_np = (ch[:, None] == np.arange(GN_GROUPS)[None, :]).astype(np.float32)
    row_expand_np = (np.arange(ROWS_IMG)[:, None] // HW_FEAT
                     == np.arange(N_IMG)[None, :]).astype(np.float32)

    px, py = np.meshgrid(np.linspace(-1.0, 1.0, WF), np.linspace(-1.0, 1.0, HF))
    pos_x = px.reshape(-1).astype(np.float32)
    pos_y = py.reshape(-1).astype(np.float32)
    pos_x_blk = np.zeros((N_IMG, ROWS_IMG), np.float32)
    pos_y_blk = np.zeros((N_IMG, ROWS_IMG), np.float32)
    for i in range(N_IMG):
        pos_x_blk[i, i * HW_FEAT:(i + 1) * HW_FEAT] = pos_x
        pos_y_blk[i, i * HW_FEAT:(i + 1) * HW_FEAT] = pos_y

    out_w = xav((K2, K2))

    # ---- DDPM / time-embedding tables (computed once at init) ----
    acp = _make_alphas_cumprod(NUM_TRAIN_STEPS)
    sqrt_acp = jnp.sqrt(acp)
    sqrt_om_acp = jnp.sqrt(1.0 - acp)
    half = E // 2
    freqs = np.exp(np.arange(half) * (-math.log(10000.0) / (half - 1)))
    t_all = np.arange(NUM_TRAIN_STEPS)[:, None] * freqs[None, :]
    temb_table = np.concatenate([np.sin(t_all), np.cos(t_all)], axis=-1).astype(np.float32)
    temb_table = jnp.asarray(temb_table.reshape(NUM_TRAIN_STEPS, 1, E))

    # per-head weight splits: (E,E) -> (H,E,D) in-proj, (E,E) -> (H,D,E) out-proj
    def per_head_in(full):
        return full.reshape(E, H, D).transpose(1, 0, 2)

    def per_head_out(full):
        return full.reshape(H, D, E)

    def stack_in():
        return jnp.stack([per_head_in(xav((E, E))) for _ in range(L)], axis=0)

    def stack_out():
        return jnp.stack([per_head_out(xav((E, E))) for _ in range(L)], axis=0)

    def stack(fn):
        return jnp.stack([fn() for _ in range(L)], axis=0)

    tgt_mask, mem_mask = _make_masks()

    params = dict(
        # RGB encoder
        mean_cols=mean_cols, inv_std_cols=inv_std_cols,
        conv_w=xav((CK2, CONV_OUT)), conv_b=zeros((1, CONV_OUT)),
        gn_ind=jnp.asarray(gn_ind_np), gn_ind_t=jnp.asarray(gn_ind_np.T),
        gn_g=ones((1, CONV_OUT)), gn_b=zeros((1, CONV_OUT)),
        row_expand=jnp.asarray(row_expand_np),
        kp_w=xav((CONV_OUT, NUM_KP)), kp_b=zeros((1, NUM_KP)),
        pos_x_blk=jnp.asarray(pos_x_blk), pos_y_blk=jnp.asarray(pos_y_blk),
        out_wx=out_w[0::2, :], out_wy=out_w[1::2, :], out_b=zeros((1, K2)),
        # diffusion transformer
        act_mean=zeros((1, ACTION_DIM)), act_istd=ones((1, ACTION_DIM)),
        temb_table=temb_table,
        input_w=xav((ACTION_DIM, E)), input_b=zeros((1, E)),
        pos_emb=0.02 * jax.random.normal(next(ks), (HORIZON, E), jnp.float32),
        cond_obs_w=xav((COND_DIM, E)), cond_obs_b=zeros((1, E)),
        cond_pos_emb=0.02 * jax.random.normal(next(ks), (T_COND, E), jnp.float32),
        enc_w1=xav((E, 4 * E)), enc_b1=zeros((1, 4 * E)),
        enc_w2=xav((4 * E, E)), enc_b2=zeros((1, E)),
        ln1_g=ones((L, 1, E)), ln1_b=zeros((L, 1, E)),
        ln2_g=ones((L, 1, E)), ln2_b=zeros((L, 1, E)),
        ln3_g=ones((L, 1, E)), ln3_b=zeros((L, 1, E)),
        wsq=stack_in(), wsk=stack_in(), wsv=stack_in(),
        bsq=zeros((L, H, 1, D)), bsk=zeros((L, H, 1, D)), bsv=zeros((L, H, 1, D)),
        wso=stack_out(), bso=zeros((L, 1, E)),
        wcq=stack_in(), wck=stack_in(), wcv=stack_in(),
        bcq=zeros((L, H, 1, D)), bck=zeros((L, H, 1, D)), bcv=zeros((L, H, 1, D)),
        wco=stack_out(), bco=zeros((L, 1, E)),
        ff_w1=stack(lambda: xav((E, 4 * E))), ff_b1=zeros((L, 1, 4 * E)),
        ff_w2=stack(lambda: xav((4 * E, E))), ff_b2=zeros((L, 1, E)),
        lnf_g=ones((1, E)), lnf_b=zeros((1, E)),
        head_w=xav((E, ACTION_DIM)), head_b=zeros((1, ACTION_DIM)),
        tgt_mask=tgt_mask, mem_mask=mem_mask,
        # SMEM scalar tables (not part of _WEIGHT_NAMES; passed separately)
        sqrt_acp=sqrt_acp, sqrt_om_acp=sqrt_om_acp,
    )
    return params


# ----------------------------- main ------------------------------------------
if __name__ == "__main__":
    key = jax.random.PRNGKey(0)
    k_param, k_img, k_act, k_fwd = jax.random.split(key, 4)
    params = init_params(k_param)
    images = jax.random.uniform(k_img, (BATCH, N_OBS_STEPS, IMG_C, IMG_H, IMG_W), jnp.float32)
    action = jax.random.normal(k_act, (BATCH, HORIZON, ACTION_DIM), jnp.float32)

    loss = jax.jit(policy_forward)(params, images, action, k_fwd)
    loss = jax.block_until_ready(loss)
    assert bool(jnp.isfinite(loss)), "loss is not finite"
    print("KERNEL_OK")
</pallas_src>

<mosaic_0001>
module attributes {stable_mosaic.version = 11 : i64} {
  func.func @_policy_loss_kernel(%arg0: i32, %arg1: memref<1x32x192xf32, #tpu.memory_space<vmem>>, %arg2: memref<1x8x4xf32, #tpu.memory_space<vmem>>, %arg3: memref<1x8x4xf32, #tpu.memory_space<vmem>>, %arg4: memref<2xi32, #tpu.memory_space<smem>>, %arg5: memref<100xf32, #tpu.memory_space<smem>>, %arg6: memref<100xf32, #tpu.memory_space<smem>>, %arg7: memref<1x192xf32, #tpu.memory_space<vmem>>, %arg8: memref<1x192xf32, #tpu.memory_space<vmem>>, %arg9: memref<192x32xf32, #tpu.memory_space<vmem>>, %arg10: memref<1x32xf32, #tpu.memory_space<vmem>>, %arg11: memref<32x2xf32, #tpu.memory_space<vmem>>, %arg12: memref<2x32xf32, #tpu.memory_space<vmem>>, %arg13: memref<1x32xf32, #tpu.memory_space<vmem>>, %arg14: memref<1x32xf32, #tpu.memory_space<vmem>>, %arg15: memref<32x2xf32, #tpu.memory_space<vmem>>, %arg16: memref<32x16xf32, #tpu.memory_space<vmem>>, %arg17: memref<1x16xf32, #tpu.memory_space<vmem>>, %arg18: memref<2x32xf32, #tpu.memory_space<vmem>>, %arg19: memref<2x32xf32, #tpu.memory_space<vmem>>, %arg20: memref<16x32xf32, #tpu.memory_space<vmem>>, %arg21: memref<16x32xf32, #tpu.memory_space<vmem>>, %arg22: memref<1x32xf32, #tpu.memory_space<vmem>>, %arg23: memref<1x4xf32, #tpu.memory_space<vmem>>, %arg24: memref<1x4xf32, #tpu.memory_space<vmem>>, %arg25: memref<100x1x32xf32, #tpu.memory_space<vmem>>, %arg26: memref<4x32xf32, #tpu.memory_space<vmem>>, %arg27: memref<1x32xf32, #tpu.memory_space<vmem>>, %arg28: memref<8x32xf32, #tpu.memory_space<vmem>>, %arg29: memref<32x32xf32, #tpu.memory_space<vmem>>, %arg30: memref<1x32xf32, #tpu.memory_space<vmem>>, %arg31: memref<3x32xf32, #tpu.memory_space<vmem>>, %arg32: memref<32x128xf32, #tpu.memory_space<vmem>>, %arg33: memref<1x128xf32, #tpu.memory_space<vmem>>, %arg34: memref<128x32xf32, #tpu.memory_space<vmem>>, %arg35: memref<1x32xf32, #tpu.memory_space<vmem>>, %arg36: memref<2x1x32xf32, #tpu.memory_space<vmem>>, %arg37: memref<2x1x32xf32, #tpu.memory_space<vmem>>, %arg38: memref<2x1x32xf32, #tpu.memory_space<vmem>>, %arg39: memref<2x1x32xf32, #tpu.memory_space<vmem>>, %arg40: memref<2x1x32xf32, #tpu.memory_space<vmem>>, %arg41: memref<2x1x32xf32, #tpu.memory_space<vmem>>, %arg42: memref<2x2x32x16xf32, #tpu.memory_space<vmem>>, %arg43: memref<2x2x32x16xf32, #tpu.memory_space<vmem>>, %arg44: memref<2x2x32x16xf32, #tpu.memory_space<vmem>>, %arg45: memref<2x2x1x16xf32, #tpu.memory_space<vmem>>, %arg46: memref<2x2x1x16xf32, #tpu.memory_space<vmem>>, %arg47: memref<2x2x1x16xf32, #tpu.memory_space<vmem>>, %arg48: memref<2x2x16x32xf32, #tpu.memory_space<vmem>>, %arg49: memref<2x1x32xf32, #tpu.memory_space<vmem>>, %arg50: memref<2x2x32x16xf32, #tpu.memory_space<vmem>>, %arg51: memref<2x2x32x16xf32, #tpu.memory_space<vmem>>, %arg52: memref<2x2x32x16xf32, #tpu.memory_space<vmem>>, %arg53: memref<2x2x1x16xf32, #tpu.memory_space<vmem>>, %arg54: memref<2x2x1x16xf32, #tpu.memory_space<vmem>>, %arg55: memref<2x2x1x16xf32, #tpu.memory_space<vmem>>, %arg56: memref<2x2x16x32xf32, #tpu.memory_space<vmem>>, %arg57: memref<2x1x32xf32, #tpu.memory_space<vmem>>, %arg58: memref<2x32x128xf32, #tpu.memory_space<vmem>>, %arg59: memref<2x1x128xf32, #tpu.memory_space<vmem>>, %arg60: memref<2x128x32xf32, #tpu.memory_space<vmem>>, %arg61: memref<2x1x32xf32, #tpu.memory_space<vmem>>, %arg62: memref<1x32xf32, #tpu.memory_space<vmem>>, %arg63: memref<1x32xf32, #tpu.memory_space<vmem>>, %arg64: memref<32x4xf32, #tpu.memory_space<vmem>>, %arg65: memref<1x4xf32, #tpu.memory_space<vmem>>, %arg66: memref<8x8xf32, #tpu.memory_space<vmem>>, %arg67: memref<8x3xf32, #tpu.memory_space<vmem>>, %arg68: memref<1x1x1xf32, #tpu.memory_space<vmem>>) attributes {dimension_semantics = [#tpu.dimension_semantics<parallel>], iteration_bounds = array<i64: 2>, scalar_prefetch = 0 : i64, scratch_operands = 0 : i64, tpu.core_type = #tpu.core_type<tc>, window_params = [{transform_indices = @transform_0, window_bounds = array<i64: 1, 32, 192>}, {transform_indices = @transform_1, window_bounds = array<i64: 1, 8, 4>}, {transform_indices = @transform_2, window_bounds = array<i64: 1, 8, 4>}, {transform_indices = @transform_3, window_bounds = array<i64: 2>}, {transform_indices = @transform_4, window_bounds = array<i64: 100>}, {transform_indices = @transform_5, window_bounds = array<i64: 100>}, {pipeline_mode = #tpu.pipeline_mode<synchronous>, transform_indices = @transform_6, window_bounds = array<i64: 1, 192>}, {pipeline_mode = #tpu.pipeline_mode<synchronous>, transform_indices = @transform_7, window_bounds = array<i64: 1, 192>}, {pipeline_mode = #tpu.pipeline_mode<synchronous>, transform_indices = @transform_8, window_bounds = array<i64: 192, 32>}, {pipeline_mode = #tpu.pipeline_mode<synchronous>, transform_indices = @transform_9, window_bounds = array<i64: 1, 32>}, {pipeline_mode = #tpu.pipeline_mode<synchronous>, transform_indices = @transform_10, window_bounds = array<i64: 32, 2>}, {pipeline_mode = #tpu.pipeline_mode<synchronous>, transform_indices = @transform_11, window_bounds = array<i64: 2, 32>}, {pipeline_mode = #tpu.pipeline_mode<synchronous>, transform_indices = @transform_12, window_bounds = array<i64: 1, 32>}, {pipeline_mode = #tpu.pipeline_mode<synchronous>, transform_indices = @transform_13, window_bounds = array<i64: 1, 32>}, {pipeline_mode = #tpu.pipeline_mode<synchronous>, transform_indices = @transform_14, window_bounds = array<i64: 32, 2>}, {pipeline_mode = #tpu.pipeline_mode<synchronous>, transform_indices = @transform_15, window_bounds = array<i64: 32, 16>}, {pipeline_mode = #tpu.pipeline_mode<synchronous>, transform_indices = @transform_16, window_bounds = array<i64: 1, 16>}, {pipeline_mode = #tpu.pipeline_mode<synchronous>, transform_indices = @transform_17, window_bounds = array<i64: 2, 32>}, {pipeline_mode = #tpu.pipeline_mode<synchronous>, transform_indices = @transform_18, window_bounds = array<i64: 2, 32>}, {pipeline_mode = #tpu.pipeline_mode<synchronous>, transform_indices = @transform_19, window_bounds = array<i64: 16, 32>}, {pipeline_mode = #tpu.pipeline_mode<synchronous>, transform_indices = @transform_20, window_bounds = array<i64: 16, 32>}, {pipeline_mode = #tpu.pipeline_mode<synchronous>, transform_indices = @transform_21, window_bounds = array<i64: 1, 32>}, {pipeline_mode = #tpu.pipeline_mode<synchronous>, transform_indices = @transform_22, window_bounds = array<i64: 1, 4>}, {pipeline_mode = #tpu.pipeline_mode<synchronous>, transform_indices = @transform_23, window_bounds = array<i64: 1, 4>}, {pipeline_mode = #tpu.pipeline_mode<synchronous>, transform_indices = @transform_24, window_bounds = array<i64: 100, 1, 32>}, {pipeline_mode = #tpu.pipeline_mode<synchronous>, transform_indices = @transform_25, window_bounds = array<i64: 4, 32>}, {pipeline_mode = #tpu.pipeline_mode<synchronous>, transform_indices = @transform_26, window_bounds = array<i64: 1, 32>}, {pipeline_mode = #tpu.pipeline_mode<synchronous>, transform_indices = @transform_27, window_bounds = array<i64: 8, 32>}, {pipeline_mode = #tpu.pipeline_mode<synchronous>, transform_indices = @transform_28, window_bounds = array<i64: 32, 32>}, {pipeline_mode = #tpu.pipeline_mode<synchronous>, transform_indices = @transform_29, window_bounds = array<i64: 1, 32>}, {pipeline_mode = #tpu.pipeline_mode<synchronous>, transform_indices = @transform_30, window_bounds = array<i64: 3, 32>}, {pipeline_mode = #tpu.pipeline_mode<synchronous>, transform_indices = @transform_31, window_bounds = array<i64: 32, 128>}, {pipeline_mode = #tpu.pipeline_mode<synchronous>, transform_indices = @transform_32, window_bounds = array<i64: 1, 128>}, {pipeline_mode = #tpu.pipeline_mode<synchronous>, transform_indices = @transform_33, window_bounds = array<i64: 128, 32>}, {pipeline_mode = #tpu.pipeline_mode<synchronous>, transform_indices = @transform_34, window_bounds = array<i64: 1, 32>}, {pipeline_mode = #tpu.pipeline_mode<synchronous>, transform_indices = @transform_35, window_bounds = array<i64: 2, 1, 32>}, {pipeline_mode = #tpu.pipeline_mode<synchronous>, transform_indices = @transform_36, window_bounds = array<i64: 2, 1, 32>}, {pipeline_mode = #tpu.pipeline_mode<synchronous>, transform_indices = @transform_37, window_bounds = array<i64: 2, 1, 32>}, {pipeline_mode = #tpu.pipeline_mode<synchronous>, transform_indices = @transform_38, window_bounds = array<i64: 2, 1, 32>}, {pipeline_mode = #tpu.pipeline_mode<synchronous>, transform_indices = @transform_39, window_bounds = array<i64: 2, 1, 32>}, {pipeline_mode = #tpu.pipeline_mode<synchronous>, transform_indices = @transform_40, window_bounds = array<i64: 2, 1, 32>}, {pipeline_mode = #tpu.pipeline_mode<synchronous>, transform_indices = @transform_41, window_bounds = array<i64: 2, 2, 32, 16>}, {pipeline_mode = #tpu.pipeline_mode<synchronous>, transform_indices = @transform_42, window_bounds = array<i64: 2, 2, 32, 16>}, {pipeline_mode = #tpu.pipeline_mode<synchronous>, transform_indices = @transform_43, window_bounds = array<i64: 2, 2, 32, 16>}, {pipeline_mode = #tpu.pipeline_mode<synchronous>, transform_indices = @transform_44, window_bounds = array<i64: 2, 2, 1, 16>}, {pipeline_mode = #tpu.pipeline_mode<synchronous>, transform_indices = @transform_45, window_bounds = array<i64: 2, 2, 1, 16>}, {pipeline_mode = #tpu.pipeline_mode<synchronous>, transform_indices = @transform_46, window_bounds = array<i64: 2, 2, 1, 16>}, {pipeline_mode = #tpu.pipeline_mode<synchronous>, transform_indices = @transform_47, window_bounds = array<i64: 2, 2, 16, 32>}, {pipeline_mode = #tpu.pipeline_mode<synchronous>, transform_indices = @transform_48, window_bounds = array<i64: 2, 1, 32>}, {pipeline_mode = #tpu.pipeline_mode<synchronous>, transform_indices = @transform_49, window_bounds = array<i64: 2, 2, 32, 16>}, {pipeline_mode = #tpu.pipeline_mode<synchronous>, transform_indices = @transform_50, window_bounds = array<i64: 2, 2, 32, 16>}, {pipeline_mode = #tpu.pipeline_mode<synchronous>, transform_indices = @transform_51, window_bounds = array<i64: 2, 2, 32, 16>}, {pipeline_mode = #tpu.pipeline_mode<synchronous>, transform_indices = @transform_52, window_bounds = array<i64: 2, 2, 1, 16>}, {pipeline_mode = #tpu.pipeline_mode<synchronous>, transform_indices = @transform_53, window_bounds = array<i64: 2, 2, 1, 16>}, {pipeline_mode = #tpu.pipeline_mode<synchronous>, transform_indices = @transform_54, window_bounds = array<i64: 2, 2, 1, 16>}, {pipeline_mode = #tpu.pipeline_mode<synchronous>, transform_indices = @transform_55, window_bounds = array<i64: 2, 2, 16, 32>}, {pipeline_mode = #tpu.pipeline_mode<synchronous>, transform_indices = @transform_56, window_bounds = array<i64: 2, 1, 32>}, {pipeline_mode = #tpu.pipeline_mode<synchronous>, transform_indices = @transform_57, window_bounds = array<i64: 2, 32, 128>}, {pipeline_mode = #tpu.pipeline_mode<synchronous>, transform_indices = @transform_58, window_bounds = array<i64: 2, 1, 128>}, {pipeline_mode = #tpu.pipeline_mode<synchronous>, transform_indices = @transform_59, window_bounds = array<i64: 2, 128, 32>}, {pipeline_mode = #tpu.pipeline_mode<synchronous>, transform_indices = @transform_60, window_bounds = array<i64: 2, 1, 32>}, {pipeline_mode = #tpu.pipeline_mode<synchronous>, transform_indices = @transform_61, window_bounds = array<i64: 1, 32>}, {pipeline_mode = #tpu.pipeline_mode<synchronous>, transform_indices = @transform_62, window_bounds = array<i64: 1, 32>}, {pipeline_mode = #tpu.pipeline_mode<synchronous>, transform_indices = @transform_63, window_bounds = array<i64: 32, 4>}, {pipeline_mode = #tpu.pipeline_mode<synchronous>, transform_indices = @transform_64, window_bounds = array<i64: 1, 4>}, {pipeline_mode = #tpu.pipeline_mode<synchronous>, transform_indices = @transform_65, window_bounds = array<i64: 8, 8>}, {pipeline_mode = #tpu.pipeline_mode<synchronous>, transform_indices = @transform_66, window_bounds = array<i64: 8, 3>}, {transform_indices = @transform_67, window_bounds = array<i64: 1, 1, 1>}]} {
    %c0 = arith.constant 0 : index
    %c0_0 = arith.constant 0 : index
    %c0_1 = arith.constant 0 : index
    %0 = vector.load %arg1[%c0, %c0_0, %c0_1] : memref<1x32x192xf32, #tpu.memory_space<vmem>>, vector<1x32x192xf32>
    %1 = vector.shape_cast %0 : vector<1x32x192xf32> to vector<32x192xf32>
    %c0_2 = arith.constant 0 : index
    %c0_3 = arith.constant 0 : index
    %2 = vector.load %arg7[%c0_2, %c0_3] : memref<1x192xf32, #tpu.memory_space<vmem>>, vector<1x192xf32>
    %3 = vector.broadcast %2 : vector<1x192xf32> to vector<32x192xf32>
    %4 = arith.subf %1, %3 : vector<32x192xf32>
    %c0_4 = arith.constant 0 : index
    %c0_5 = arith.constant 0 : index
    %5 = vector.load %arg8[%c0_4, %c0_5] : memref<1x192xf32, #tpu.memory_space<vmem>>, vector<1x192xf32>
    %6 = vector.broadcast %5 : vector<1x192xf32> to vector<32x192xf32>
    %7 = arith.mulf %4, %6 : vector<32x192xf32>
    %c0_6 = arith.constant 0 : index
    %c0_7 = arith.constant 0 : index
    %8 = vector.load %arg9[%c0_6, %c0_7] : memref<192x32xf32, #tpu.memory_space<vmem>>, vector<192x32xf32>
    %cst = arith.constant dense<0.000000e+00> : vector<32x32xf32>
    %9 = tpu.matmul %7, %8, %cst {dimension_numbers = #tpu.dot_dimension_numbers<[1], [0], [0], [1], [0, 0, 1, 1], [], []>} : vector<32x192xf32>, vector<192x32xf32>, vector<32x32xf32> -> vector<32x32xf32>
    %c0_8 = arith.constant 0 : index
    %c0_9 = arith.constant 0 : index
    %10 = vector.load %arg10[%c0_8, %c0_9] : memref<1x32xf32, #tpu.memory_space<vmem>>, vector<1x32xf32>
    %11 = vector.broadcast %10 : vector<1x32xf32> to vector<32x32xf32>
    %12 = arith.addf %9, %11 : vector<32x32xf32>
    %13 = arith.mulf %12, %12 : vector<32x32xf32>
    %14 = tpu.concatenate %12, %13 in 0 : vector<32x32xf32>, vector<32x32xf32> -> vector<64x32xf32>
    %c0_10 = arith.constant 0 : index
    %c0_11 = arith.constant 0 : index
    %15 = vector.load %arg11[%c0_10, %c0_11] : memref<32x2xf32, #tpu.memory_space<vmem>>, vector<32x2xf32>
    %cst_12 = arith.constant dense<0.000000e+00> : vector<64x2xf32>
    %16 = tpu.matmul %14, %15, %cst_12 {dimension_numbers = #tpu.dot_dimension_numbers<[1], [0], [0], [1], [0, 0, 1, 1], [], []>} : vector<64x32xf32>, vector<32x2xf32>, vector<64x2xf32> -> vector<64x2xf32>
    %17 = vector.extract_strided_slice %16 {offsets = [0, 0], sizes = [16, 2], strides = [1, 1]} : vector<64x2xf32> to vector<16x2xf32>
    %cst_13 = arith.constant dense<0.000000e+00> : vector<2xf32>
    %18 = vector.multi_reduction <add>, %17, %cst_13 [0] : vector<16x2xf32> to vector<2xf32>
    %19 = vector.shape_cast %18 : vector<2xf32> to vector<1x2xf32>
    %20 = vector.extract_strided_slice %16 {offsets = [32, 0], sizes = [16, 2], strides = [1, 1]} : vector<64x2xf32> to vector<16x2xf32>
    %cst_14 = arith.constant dense<0.000000e+00> : vector<2xf32>
    %21 = vector.multi_reduction <add>, %20, %cst_14 [0] : vector<16x2xf32> to vector<2xf32>
    %22 = vector.shape_cast %21 : vector<2xf32> to vector<1x2xf32>
    %cst_15 = arith.constant 3.906250e-03 : f32
    %23 = vector.broadcast %cst_15 : f32 to vector<1x2xf32>
    %24 = arith.mulf %19, %23 : vector<1x2xf32>
    %cst_16 = arith.constant 3.906250e-03 : f32
    %25 = vector.broadcast %cst_16 : f32 to vector<1x2xf32>
    %26 = arith.mulf %22, %25 : vector<1x2xf32>
    %27 = arith.mulf %24, %24 : vector<1x2xf32>
    %28 = arith.subf %26, %27 : vector<1x2xf32>
    %cst_17 = arith.constant 9.99999974E-6 : f32
    %29 = vector.broadcast %cst_17 : f32 to vector<1x2xf32>
    %30 = arith.addf %28, %29 : vector<1x2xf32>
    %31 = math.rsqrt %30 : vector<1x2xf32>
    %c0_18 = arith.constant 0 : index
    %c0_19 = arith.constant 0 : index
    %32 = vector.load %arg12[%c0_18, %c0_19] : memref<2x32xf32, #tpu.memory_space<vmem>>, vector<2x32xf32>
    %cst_20 = arith.constant dense<0.000000e+00> : vector<1x32xf32>
    %33 = tpu.matmul %24, %32, %cst_20 {dimension_numbers = #tpu.dot_dimension_numbers<[1], [0], [0], [1], [0, 0, 1, 1], [], []>} : vector<1x2xf32>, vector<2x32xf32>, vector<1x32xf32> -> vector<1x32xf32>
    %c0_21 = arith.constant 0 : index
    %c0_22 = arith.constant 0 : index
    %34 = vector.load %arg12[%c0_21, %c0_22] : memref<2x32xf32, #tpu.memory_space<vmem>>, vector<2x32xf32>
    %cst_23 = arith.constant dense<0.000000e+00> : vector<1x32xf32>
    %35 = tpu.matmul %31, %34, %cst_23 {dimension_numbers = #tpu.dot_dimension_numbers<[1], [0], [0], [1], [0, 0, 1, 1], [], []>} : vector<1x2xf32>, vector<2x32xf32>, vector<1x32xf32> -> vector<1x32xf32>
    %c0_24 = arith.constant 0 : index
    %c0_25 = arith.constant 0 : index
    %36 = vector.load %arg13[%c0_24, %c0_25] : memref<1x32xf32, #tpu.memory_space<vmem>>, vector<1x32xf32>
    %37 = arith.mulf %35, %36 : vector<1x32xf32>
    %c0_26 = arith.constant 0 : index
    %c0_27 = arith.constant 0 : index
    %38 = vector.load %arg14[%c0_26, %c0_27] : memref<1x32xf32, #tpu.memory_space<vmem>>, vector<1x32xf32>
    %39 = arith.mulf %33, %35 : vector<1x32xf32>
    %c0_28 = arith.constant 0 : index
    %c0_29 = arith.constant 0 : index
    %40 = vector.load %arg13[%c0_28, %c0_29] : memref<1x32xf32, #tpu.memory_space<vmem>>, vector<1x32xf32>
    %41 = arith.mulf %39, %40 : vector<1x32xf32>
    %42 = arith.subf %38, %41 : vector<1x32xf32>
    %43 = vector.extract_strided_slice %16 {offsets = [16, 0], sizes = [16, 2], strides = [1, 1]} : vector<64x2xf32> to vector<16x2xf32>
    %cst_30 = arith.constant dense<0.000000e+00> : vector<2xf32>
    %44 = vector.multi_reduction <add>, %43, %cst_30 [0] : vector<16x2xf32> to vector<2xf32>
    %45 = vector.shape_cast %44 : vector<2xf32> to vector<1x2xf32>
    %46 = vector.extract_strided_slice %16 {offsets = [48, 0], sizes = [16, 2], strides = [1, 1]} : vector<64x2xf32> to vector<16x2xf32>
    %cst_31 = arith.constant dense<0.000000e+00> : vector<2xf32>
    %47 = vector.multi_reduction <add>, %46, %cst_31 [0] : vector<16x2xf32> to vector<2xf32>
    %48 = vector.shape_cast %47 : vector<2xf32> to vector<1x2xf32>
    %cst_32 = arith.constant 3.906250e-03 : f32
    %49 = vector.broadcast %cst_32 : f32 to vector<1x2xf32>
    %50 = arith.mulf %45, %49 : vector<1x2xf32>
    %cst_33 = arith.constant 3.906250e-03 : f32
    %51 = vector.broadcast %cst_33 : f32 to vector<1x2xf32>
    %52 = arith.mulf %48, %51 : vector<1x2xf32>
    %53 = arith.mulf %50, %50 : vector<1x2xf32>
    %54 = arith.subf %52, %53 : vector<1x2xf32>
    %cst_34 = arith.constant 9.99999974E-6 : f32
    %55 = vector.broadcast %cst_34 : f32 to vector<1x2xf32>
    %56 = arith.addf %54, %55 : vector<1x2xf32>
    %57 = math.rsqrt %56 : vector<1x2xf32>
    %c0_35 = arith.constant 0 : index
    %c0_36 = arith.constant 0 : index
    %58 = vector.load %arg12[%c0_35, %c0_36] : memref<2x32xf32, #tpu.memory_space<vmem>>, vector<2x32xf32>
    %cst_37 = arith.constant dense<0.000000e+00> : vector<1x32xf32>
    %59 = tpu.matmul %50, %58, %cst_37 {dimension_numbers = #tpu.dot_dimension_numbers<[1], [0], [0], [1], [0, 0, 1, 1], [], []>} : vector<1x2xf32>, vector<2x32xf32>, vector<1x32xf32> -> vector<1x32xf32>
    %c0_38 = arith.constant 0 : index
    %c0_39 = arith.constant 0 : index
    %60 = vector.load %arg12[%c0_38, %c0_39] : memref<2x32xf32, #tpu.memory_space<vmem>>, vector<2x32xf32>
    %cst_40 = arith.constant dense<0.000000e+00> : vector<1x32xf32>
    %61 = tpu.matmul %57, %60, %cst_40 {dimension_numbers = #tpu.dot_dimension_numbers<[1], [0], [0], [1], [0, 0, 1, 1], [], []>} : vector<1x2xf32>, vector<2x32xf32>, vector<1x32xf32> -> vector<1x32xf32>
    %c0_41 = arith.constant 0 : index
    %c0_42 = arith.constant 0 : index
    %62 = vector.load %arg13[%c0_41, %c0_42] : memref<1x32xf32, #tpu.memory_space<vmem>>, vector<1x32xf32>
    %63 = arith.mulf %61, %62 : vector<1x32xf32>
    %c0_43 = arith.constant 0 : index
    %c0_44 = arith.constant 0 : index
    %64 = vector.load %arg14[%c0_43, %c0_44] : memref<1x32xf32, #tpu.memory_space<vmem>>, vector<1x32xf32>
    %65 = arith.mulf %59, %61 : vector<1x32xf32>
    %c0_45 = arith.constant 0 : index
    %c0_46 = arith.constant 0 : index
    %66 = vector.load %arg13[%c0_45, %c0_46] : memref<1x32xf32, #tpu.memory_space<vmem>>, vector<1x32xf32>
    %67 = arith.mulf %65, %66 : vector<1x32xf32>
    %68 = arith.subf %64, %67 : vector<1x32xf32>
    %c0_47 = arith.constant 0 : index
    %c0_48 = arith.constant 0 : index
    %69 = vector.load %arg15[%c0_47, %c0_48] : memref<32x2xf32, #tpu.memory_space<vmem>>, vector<32x2xf32>
    %70 = tpu.concatenate %37, %63 in 0 : vector<1x32xf32>, vector<1x32xf32> -> vector<2x32xf32>
    %cst_49 = arith.constant dense<0.000000e+00> : vector<32x32xf32>
    %71 = tpu.matmul %69, %70, %cst_49 {dimension_numbers = #tpu.dot_dimension_numbers<[1], [0], [0], [1], [0, 0, 1, 1], [], []>} : vector<32x2xf32>, vector<2x32xf32>, vector<32x32xf32> -> vector<32x32xf32>
    %c0_50 = arith.constant 0 : index
    %c0_51 = arith.constant 0 : index
    %72 = vector.load %arg15[%c0_50, %c0_51] : memref<32x2xf32, #tpu.memory_space<vmem>>, vector<32x2xf32>
    %73 = tpu.concatenate %42, %68 in 0 : vector<1x32xf32>, vector<1x32xf32> -> vector<2x32xf32>
    %cst_52 = arith.constant dense<0.000000e+00> : vector<32x32xf32>
    %74 = tpu.matmul %72, %73, %cst_52 {dimension_numbers = #tpu.dot_dimension_numbers<[1], [0], [0], [1], [0, 0, 1, 1], [], []>} : vector<32x2xf32>, vector<2x32xf32>, vector<32x32xf32> -> vector<32x32xf32>
    %75 = arith.mulf %12, %71 : vector<32x32xf32>
    %76 = arith.addf %75, %74 : vector<32x32xf32>
    %cst_53 = arith.constant 0.000000e+00 : f32
    %77 = vector.broadcast %cst_53 : f32 to vector<32x32xf32>
    %78 = arith.maximumf %76, %77 : vector<32x32xf32>
    %c0_54 = arith.constant 0 : index
    %c0_55 = arith.constant 0 : index
    %79 = vector.load %arg16[%c0_54, %c0_55] : memref<32x16xf32, #tpu.memory_space<vmem>>, vector<32x16xf32>
    %cst_56 = arith.constant dense<0.000000e+00> : vector<32x16xf32>
    %80 = tpu.matmul %78, %79, %cst_56 {dimension_numbers = #tpu.dot_dimension_numbers<[1], [0], [0], [1], [0, 0, 1, 1], [], []>} : vector<32x32xf32>, vector<32x16xf32>, vector<32x16xf32> -> vector<32x16xf32>
    %c0_57 = arith.constant 0 : index
    %c0_58 = arith.constant 0 : index
    %81 = vector.load %arg17[%c0_57, %c0_58] : memref<1x16xf32, #tpu.memory_space<vmem>>, vector<1x16xf32>
    %82 = vector.broadcast %81 : vector<1x16xf32> to vector<32x16xf32>
    %83 = arith.addf %80, %82 : vector<32x16xf32>
    %84 = vector.extract_strided_slice %83 {offsets = [0, 0], sizes = [16, 16], strides = [1, 1]} : vector<32x16xf32> to vector<16x16xf32>
    %cst_59 = arith.constant dense<0xFF800000> : vector<16xf32>
    %85 = vector.multi_reduction <maximumf>, %84, %cst_59 [0] : vector<16x16xf32> to vector<16xf32>
    %86 = vector.shape_cast %85 : vector<16xf32> to vector<1x16xf32>
    %87 = vector.broadcast %86 : vector<1x16xf32> to vector<16x16xf32>
    %88 = arith.subf %84, %87 : vector<16x16xf32>
    %89 = math.exp %88 : vector<16x16xf32>
    %cst_60 = arith.constant dense<0.000000e+00> : vector<16xf32>
    %90 = vector.multi_reduction <add>, %89, %cst_60 [0] : vector<16x16xf32> to vector<16xf32>
    %91 = vector.shape_cast %90 : vector<16xf32> to vector<1x16xf32>
    %92 = tpu.reciprocal %91 {approx = true} : vector<1x16xf32> -> vector<1x16xf32>
    %93 = vector.broadcast %92 : vector<1x16xf32> to vector<16x16xf32>
    %94 = arith.mulf %89, %93 : vector<16x16xf32>
    %95 = vector.extract_strided_slice %83 {offsets = [16, 0], sizes = [16, 16], strides = [1, 1]} : vector<32x16xf32> to vector<16x16xf32>
    %cst_61 = arith.constant dense<0xFF800000> : vector<16xf32>
    %96 = vector.multi_reduction <maximumf>, %95, %cst_61 [0] : vector<16x16xf32> to vector<16xf32>
    %97 = vector.shape_cast %96 : vector<16xf32> to vector<1x16xf32>
    %98 = vector.broadcast %97 : vector<1x16xf32> to vector<16x16xf32>
    %99 = arith.subf %95, %98 : vector<16x16xf32>
    %100 = math.exp %99 : vector<16x16xf32>
    %cst_62 = arith.constant dense<0.000000e+00> : vector<16xf32>
    %101 = vector.multi_reduction <add>, %100, %cst_62 [0] : vector<16x16xf32> to vector<16xf32>
    %102 = vector.shape_cast %101 : vector<16xf32> to vector<1x16xf32>
    %103 = tpu.reciprocal %102 {approx = true} : vector<1x16xf32> -> vector<1x16xf32>
    %104 = vector.broadcast %103 : vector<1x16xf32> to vector<16x16xf32>
    %105 = arith.mulf %100, %104 : vector<16x16xf32>
    %106 = tpu.concatenate %94, %105 in 0 : vector<16x16xf32>, vector<16x16xf32> -> vector<32x16xf32>
    %c0_63 = arith.constant 0 : index
    %c0_64 = arith.constant 0 : index
    %107 = vector.load %arg18[%c0_63, %c0_64] : memref<2x32xf32, #tpu.memory_space<vmem>>, vector<2x32xf32>
    %cst_65 = arith.constant dense<0.000000e+00> : vector<2x16xf32>
    %108 = tpu.matmul %107, %106, %cst_65 {dimension_numbers = #tpu.dot_dimension_numbers<[1], [0], [0], [1], [0, 0, 1, 1], [], []>} : vector<2x32xf32>, vector<32x16xf32>, vector<2x16xf32> -> vector<2x16xf32>
    %c0_66 = arith.constant 0 : index
    %c0_67 = arith.constant 0 : index
    %109 = vector.load %arg19[%c0_66, %c0_67] : memref<2x32xf32, #tpu.memory_space<vmem>>, vector<2x32xf32>
    %cst_68 = arith.constant dense<0.000000e+00> : vector<2x16xf32>
    %110 = tpu.matmul %109, %106, %cst_68 {dimension_numbers = #tpu.dot_dimension_numbers<[1], [0], [0], [1], [0, 0, 1, 1], [], []>} : vector<2x32xf32>, vector<32x16xf32>, vector<2x16xf32> -> vector<2x16xf32>
    %c0_69 = arith.constant 0 : index
    %c0_70 = arith.constant 0 : index
    %111 = vector.load %arg20[%c0_69, %c0_70] : memref<16x32xf32, #tpu.memory_space<vmem>>, vector<16x32xf32>
    %cst_71 = arith.constant dense<0.000000e+00> : vector<2x32xf32>
    %112 = tpu.matmul %108, %111, %cst_71 {dimension_numbers = #tpu.dot_dimension_numbers<[1], [0], [0], [1], [0, 0, 1, 1], [], []>} : vector<2x16xf32>, vector<16x32xf32>, vector<2x32xf32> -> vector<2x32xf32>
    %c0_72 = arith.constant 0 : index
    %c0_73 = arith.constant 0 : index
    %113 = vector.load %arg21[%c0_72, %c0_73] : memref<16x32xf32, #tpu.memory_space<vmem>>, vector<16x32xf32>
    %cst_74 = arith.constant dense<0.000000e+00> : vector<2x32xf32>
    %114 = tpu.matmul %110, %113, %cst_74 {dimension_numbers = #tpu.dot_dimension_numbers<[1], [0], [0], [1], [0, 0, 1, 1], [], []>} : vector<2x16xf32>, vector<16x32xf32>, vector<2x32xf32> -> vector<2x32xf32>
    %115 = arith.addf %112, %114 : vector<2x32xf32>
    %c0_75 = arith.constant 0 : index
    %c0_76 = arith.constant 0 : index
    %116 = vector.load %arg22[%c0_75, %c0_76] : memref<1x32xf32, #tpu.memory_space<vmem>>, vector<1x32xf32>
    %117 = vector.broadcast %116 : vector<1x32xf32> to vector<2x32xf32>
    %118 = arith.addf %115, %117 : vector<2x32xf32>
    %cst_77 = arith.constant 0.000000e+00 : f32
    %119 = vector.broadcast %cst_77 : f32 to vector<2x32xf32>
    %120 = arith.maximumf %118, %119 : vector<2x32xf32>
    %121 = arith.index_cast %arg0 : i32 to index
    %122 = memref.load %arg4[%121] : memref<2xi32, #tpu.memory_space<smem>>
    %123 = arith.index_cast %122 : i32 to index
    %124 = memref.load %arg5[%123] : memref<100xf32, #tpu.memory_space<smem>>
    %125 = arith.index_cast %122 : i32 to index
    %126 = memref.load %arg6[%125] : memref<100xf32, #tpu.memory_space<smem>>
    %c0_78 = arith.constant 0 : index
    %c0_79 = arith.constant 0 : index
    %c0_80 = arith.constant 0 : index
    %127 = vector.load %arg2[%c0_78, %c0_79, %c0_80] : memref<1x8x4xf32, #tpu.memory_space<vmem>>, vector<1x8x4xf32>
    %128 = vector.shape_cast %127 : vector<1x8x4xf32> to vector<8x4xf32>
    %c0_81 = arith.constant 0 : index
    %c0_82 = arith.constant 0 : index
    %129 = vector.load %arg23[%c0_81, %c0_82] : memref<1x4xf32, #tpu.memory_space<vmem>>, vector<1x4xf32>
    %130 = vector.broadcast %129 : vector<1x4xf32> to vector<8x4xf32>
    %131 = arith.subf %128, %130 : vector<8x4xf32>
    %c0_83 = arith.constant 0 : index
    %c0_84 = arith.constant 0 : index
    %132 = vector.load %arg24[%c0_83, %c0_84] : memref<1x4xf32, #tpu.memory_space<vmem>>, vector<1x4xf32>
    %133 = vector.broadcast %132 : vector<1x4xf32> to vector<8x4xf32>
    %134 = arith.mulf %131, %133 : vector<8x4xf32>
    %c0_85 = arith.constant 0 : index
    %c0_86 = arith.constant 0 : index
    %c0_87 = arith.constant 0 : index
    %135 = vector.load %arg3[%c0_85, %c0_86, %c0_87] : memref<1x8x4xf32, #tpu.memory_space<vmem>>, vector<1x8x4xf32>
    %136 = vector.shape_cast %135 : vector<1x8x4xf32> to vector<8x4xf32>
    %137 = vector.broadcast %124 : f32 to vector<8x4xf32>
    %138 = arith.mulf %137, %134 : vector<8x4xf32>
    %139 = vector.broadcast %126 : f32 to vector<8x4xf32>
    %140 = arith.mulf %139, %136 : vector<8x4xf32>
    %141 = arith.addf %138, %140 : vector<8x4xf32>
    %142 = arith.index_cast %122 : i32 to index
    %c0_88 = arith.constant 0 : index
    %c0_89 = arith.constant 0 : index
    %143 = vector.load %arg25[%142, %c0_88, %c0_89] : memref<100x1x32xf32, #tpu.memory_space<vmem>>, vector<1x1x32xf32>
    %144 = vector.shape_cast %143 : vector<1x1x32xf32> to vector<1x32xf32>
    %c0_90 = arith.constant 0 : index
    %c0_91 = arith.constant 0 : index
    %145 = vector.load %arg29[%c0_90, %c0_91] : memref<32x32xf32, #tpu.memory_space<vmem>>, vector<32x32xf32>
    %cst_92 = arith.constant dense<0.000000e+00> : vector<2x32xf32>
    %146 = tpu.matmul %120, %145, %cst_92 {dimension_numbers = #tpu.dot_dimension_numbers<[1], [0], [0], [1], [0, 0, 1, 1], [], []>} : vector<2x32xf32>, vector<32x32xf32>, vector<2x32xf32> -> vector<2x32xf32>
    %c0_93 = arith.constant 0 : index
    %c0_94 = arith.constant 0 : index
    %147 = vector.load %arg30[%c0_93, %c0_94] : memref<1x32xf32, #tpu.memory_space<vmem>>, vector<1x32xf32>
    %148 = vector.broadcast %147 : vector<1x32xf32> to vector<2x32xf32>
    %149 = arith.addf %146, %148 : vector<2x32xf32>
    %150 = tpu.concatenate %144, %149 in 0 : vector<1x32xf32>, vector<2x32xf32> -> vector<3x32xf32>
    %c0_95 = arith.constant 0 : index
    %c0_96 = arith.constant 0 : index
    %151 = vector.load %arg31[%c0_95, %c0_96] : memref<3x32xf32, #tpu.memory_space<vmem>>, vector<3x32xf32>
    %152 = arith.addf %150, %151 : vector<3x32xf32>
    %c0_97 = arith.constant 0 : index
    %c0_98 = arith.constant 0 : index
    %153 = vector.load %arg32[%c0_97, %c0_98] : memref<32x128xf32, #tpu.memory_space<vmem>>, vector<32x128xf32>
    %cst_99 = arith.constant dense<0.000000e+00> : vector<3x128xf32>
    %154 = tpu.matmul %152, %153, %cst_99 {dimension_numbers = #tpu.dot_dimension_numbers<[1], [0], [0], [1], [0, 0, 1, 1], [], []>} : vector<3x32xf32>, vector<32x128xf32>, vector<3x128xf32> -> vector<3x128xf32>
    %c0_100 = arith.constant 0 : index
    %c0_101 = arith.constant 0 : index
    %155 = vector.load %arg33[%c0_100, %c0_101] : memref<1x128xf32, #tpu.memory_space<vmem>>, vector<1x128xf32>
    %156 = vector.broadcast %155 : vector<1x128xf32> to vector<3x128xf32>
    %157 = arith.addf %154, %156 : vector<3x128xf32>
    %cst_102 = arith.constant 0.000000e+00 : f32
    %158 = vector.broadcast %cst_102 : f32 to vector<3x128xf32>
    %159 = arith.maximumf %157, %158 : vector<3x128xf32>
    %160 = math.absf %157 : vector<3x128xf32>
    %cst_103 = arith.constant 0.000000e+00 : f32
    %161 = vector.broadcast %cst_103 : f32 to vector<3x128xf32>
    %162 = arith.subf %161, %160 : vector<3x128xf32>
    %163 = math.exp %162 : vector<3x128xf32>
    %cst_104 = arith.constant 1.000000e+00 : f32
    %164 = vector.broadcast %cst_104 : f32 to vector<3x128xf32>
    %165 = arith.addf %164, %163 : vector<3x128xf32>
    %166 = math.log %165 : vector<3x128xf32>
    %167 = arith.addf %159, %166 : vector<3x128xf32>
    %168 = math.tanh %167 : vector<3x128xf32>
    %169 = arith.mulf %157, %168 : vector<3x128xf32>
    %c0_105 = arith.constant 0 : index
    %c0_106 = arith.constant 0 : index
    %170 = vector.load %arg34[%c0_105, %c0_106] : memref<128x32xf32, #tpu.memory_space<vmem>>, vector<128x32xf32>
    %cst_107 = arith.constant dense<0.000000e+00> : vector<3x32xf32>
    %171 = tpu.matmul %169, %170, %cst_107 {dimension_numbers = #tpu.dot_dimension_numbers<[1], [0], [0], [1], [0, 0, 1, 1], [], []>} : vector<3x128xf32>, vector<128x32xf32>, vector<3x32xf32> -> vector<3x32xf32>
    %c0_108 = arith.constant 0 : index
    %c0_109 = arith.constant 0 : index
    %172 = vector.load %arg35[%c0_108, %c0_109] : memref<1x32xf32, #tpu.memory_space<vmem>>, vector<1x32xf32>
    %173 = vector.broadcast %172 : vector<1x32xf32> to vector<3x32xf32>
    %174 = arith.addf %171, %173 : vector<3x32xf32>
    %c0_110 = arith.constant 0 : index
    %c0_111 = arith.constant 0 : index
    %175 = vector.load %arg26[%c0_110, %c0_111] : memref<4x32xf32, #tpu.memory_space<vmem>>, vector<4x32xf32>
    %cst_112 = arith.constant dense<0.000000e+00> : vector<8x32xf32>
    %176 = tpu.matmul %141, %175, %cst_112 {dimension_numbers = #tpu.dot_dimension_numbers<[1], [0], [0], [1], [0, 0, 1, 1], [], []>} : vector<8x4xf32>, vector<4x32xf32>, vector<8x32xf32> -> vector<8x32xf32>
    %c0_113 = arith.constant 0 : index
    %c0_114 = arith.constant 0 : index
    %177 = vector.load %arg27[%c0_113, %c0_114] : memref<1x32xf32, #tpu.memory_space<vmem>>, vector<1x32xf32>
    %178 = vector.broadcast %177 : vector<1x32xf32> to vector<8x32xf32>
    %179 = arith.addf %176, %178 : vector<8x32xf32>
    %c0_115 = arith.constant 0 : index
    %c0_116 = arith.constant 0 : index
    %180 = vector.load %arg28[%c0_115, %c0_116] : memref<8x32xf32, #tpu.memory_space<vmem>>, vector<8x32xf32>
    %181 = arith.addf %179, %180 : vector<8x32xf32>
    %c0_117 = arith.constant 0 : index
    %c0_118 = arith.constant 0 : index
    %182 = vector.load %arg66[%c0_117, %c0_118] : memref<8x8xf32, #tpu.memory_space<vmem>>, vector<8x8xf32>
    %c0_119 = arith.constant 0 : index
    %c0_120 = arith.constant 0 : index
    %183 = vector.load %arg67[%c0_119, %c0_120] : memref<8x3xf32, #tpu.memory_space<vmem>>, vector<8x3xf32>
    %c0_121 = arith.constant 0 : index
    %c0_122 = arith.constant 0 : index
    %c0_123 = arith.constant 0 : index
    %184 = vector.load %arg36[%c0_121, %c0_122, %c0_123] : memref<2x1x32xf32, #tpu.memory_space<vmem>>, vector<1x1x32xf32>
    %185 = vector.shape_cast %184 : vector<1x1x32xf32> to vector<1x32xf32>
    %c0_124 = arith.constant 0 : index
    %c0_125 = arith.constant 0 : index
    %c0_126 = arith.constant 0 : index
    %186 = vector.load %arg37[%c0_124, %c0_125, %c0_126] : memref<2x1x32xf32, #tpu.memory_space<vmem>>, vector<1x1x32xf32>
    %187 = vector.shape_cast %186 : vector<1x1x32xf32> to vector<1x32xf32>
    %cst_127 = arith.constant dense<0.000000e+00> : vector<8xf32>
    %188 = vector.multi_reduction <add>, %181, %cst_127 [1] : vector<8x32xf32> to vector<8xf32>
    %189 = vector.shape_cast %188 : vector<8xf32> to vector<8x1xf32>
    %cst_128 = arith.constant 3.200000e+01 : f32
    %190 = vector.broadcast %cst_128 : f32 to vector<8x1xf32>
    %191 = arith.divf %189, %190 : vector<8x1xf32>
    %192 = vector.broadcast %191 : vector<8x1xf32> to vector<8x32xf32>
    %193 = arith.subf %181, %192 : vector<8x32xf32>
    %194 = arith.mulf %193, %193 : vector<8x32xf32>
    %cst_129 = arith.constant dense<0.000000e+00> : vector<8xf32>
    %195 = vector.multi_reduction <add>, %194, %cst_129 [1] : vector<8x32xf32> to vector<8xf32>
    %196 = vector.shape_cast %195 : vector<8xf32> to vector<8x1xf32>
    %cst_130 = arith.constant 3.200000e+01 : f32
    %197 = vector.broadcast %cst_130 : f32 to vector<8x1xf32>
    %198 = arith.divf %196, %197 : vector<8x1xf32>
    %cst_131 = arith.constant 9.99999974E-6 : f32
    %199 = vector.broadcast %cst_131 : f32 to vector<8x1xf32>
    %200 = arith.addf %198, %199 : vector<8x1xf32>
    %201 = math.rsqrt %200 : vector<8x1xf32>
    %202 = vector.broadcast %201 : vector<8x1xf32> to vector<8x32xf32>
    %203 = arith.mulf %193, %202 : vector<8x32xf32>
    %204 = vector.broadcast %185 : vector<1x32xf32> to vector<8x32xf32>
    %205 = arith.mulf %203, %204 : vector<8x32xf32>
    %206 = vector.broadcast %187 : vector<1x32xf32> to vector<8x32xf32>
    %207 = arith.addf %205, %206 : vector<8x32xf32>
    %c0_132 = arith.constant 0 : index
    %c0_133 = arith.constant 0 : index
    %c0_134 = arith.constant 0 : index
    %c0_135 = arith.constant 0 : index
    %208 = vector.load %arg42[%c0_132, %c0_133, %c0_134, %c0_135] : memref<2x2x32x16xf32, #tpu.memory_space<vmem>>, vector<1x1x32x16xf32>
    %209 = vector.shape_cast %208 : vector<1x1x32x16xf32> to vector<32x16xf32>
    %cst_136 = arith.constant dense<0.000000e+00> : vector<8x16xf32>
    %210 = tpu.matmul %207, %209, %cst_136 {dimension_numbers = #tpu.dot_dimension_numbers<[1], [0], [0], [1], [0, 0, 1, 1], [], []>} : vector<8x32xf32>, vector<32x16xf32>, vector<8x16xf32> -> vector<8x16xf32>
    %c0_137 = arith.constant 0 : index
    %c0_138 = arith.constant 0 : index
    %c0_139 = arith.constant 0 : index
    %c0_140 = arith.constant 0 : index
    %211 = vector.load %arg45[%c0_137, %c0_138, %c0_139, %c0_140] : memref<2x2x1x16xf32, #tpu.memory_space<vmem>>, vector<1x1x1x16xf32>
    %212 = vector.shape_cast %211 : vector<1x1x1x16xf32> to vector<1x16xf32>
    %213 = vector.broadcast %212 : vector<1x16xf32> to vector<8x16xf32>
    %214 = arith.addf %210, %213 : vector<8x16xf32>
    %c0_141 = arith.constant 0 : index
    %c0_142 = arith.constant 0 : index
    %c0_143 = arith.constant 0 : index
    %c0_144 = arith.constant 0 : index
    %215 = vector.load %arg43[%c0_141, %c0_142, %c0_143, %c0_144] : memref<2x2x32x16xf32, #tpu.memory_space<vmem>>, vector<1x1x32x16xf32>
    %216 = vector.shape_cast %215 : vector<1x1x32x16xf32> to vector<32x16xf32>
    %cst_145 = arith.constant dense<0.000000e+00> : vector<8x16xf32>
    %217 = tpu.matmul %207, %216, %cst_145 {dimension_numbers = #tpu.dot_dimension_numbers<[1], [0], [0], [1], [0, 0, 1, 1], [], []>} : vector<8x32xf32>, vector<32x16xf32>, vector<8x16xf32> -> vector<8x16xf32>
    %c0_146 = arith.constant 0 : index
    %c0_147 = arith.constant 0 : index
    %c0_148 = arith.constant 0 : index
    %c0_149 = arith.constant 0 : index
    %218 = vector.load %arg46[%c0_146, %c0_147, %c0_148, %c0_149] : memref<2x2x1x16xf32, #tpu.memory_space<vmem>>, vector<1x1x1x16xf32>
    %219 = vector.shape_cast %218 : vector<1x1x1x16xf32> to vector<1x16xf32>
    %220 = vector.broadcast %219 : vector<1x16xf32> to vector<8x16xf32>
    %221 = arith.addf %217, %220 : vector<8x16xf32>
    %c0_150 = arith.constant 0 : index
    %c0_151 = arith.constant 0 : index
    %c0_152 = arith.constant 0 : index
    %c0_153 = arith.constant 0 : index
    %222 = vector.load %arg44[%c0_150, %c0_151, %c0_152, %c0_153] : memref<2x2x32x16xf32, #tpu.memory_space<vmem>>, vector<1x1x32x16xf32>
    %223 = vector.shape_cast %222 : vector<1x1x32x16xf32> to vector<32x16xf32>
    %cst_154 = arith.constant dense<0.000000e+00> : vector<8x16xf32>
    %224 = tpu.matmul %207, %223, %cst_154 {dimension_numbers = #tpu.dot_dimension_numbers<[1], [0], [0], [1], [0, 0, 1, 1], [], []>} : vector<8x32xf32>, vector<32x16xf32>, vector<8x16xf32> -> vector<8x16xf32>
    %c0_155 = arith.constant 0 : index
    %c0_156 = arith.constant 0 : index
    %c0_157 = arith.constant 0 : index
    %c0_158 = arith.constant 0 : index
    %225 = vector.load %arg47[%c0_155, %c0_156, %c0_157, %c0_158] : memref<2x2x1x16xf32, #tpu.memory_space<vmem>>, vector<1x1x1x16xf32>
    %226 = vector.shape_cast %225 : vector<1x1x1x16xf32> to vector<1x16xf32>
    %227 = vector.broadcast %226 : vector<1x16xf32> to vector<8x16xf32>
    %228 = arith.addf %224, %227 : vector<8x16xf32>
    %cst_159 = arith.constant dense<0.000000e+00> : vector<8x8xf32>
    %229 = tpu.matmul %214, %221, %cst_159 {dimension_numbers = #tpu.dot_dimension_numbers<[1], [1], [0], [0], [0, 0, 1, 0], [], []>} : vector<8x16xf32>, vector<8x16xf32>, vector<8x8xf32> -> vector<8x8xf32>
    %cst_160 = arith.constant 2.500000e-01 : f32
    %230 = vector.broadcast %cst_160 : f32 to vector<8x8xf32>
    %231 = arith.mulf %229, %230 : vector<8x8xf32>
    %232 = arith.addf %231, %182 : vector<8x8xf32>
    %cst_161 = arith.constant dense<0xFF800000> : vector<8xf32>
    %233 = vector.multi_reduction <maximumf>, %232, %cst_161 [1] : vector<8x8xf32> to vector<8xf32>
    %234 = vector.shape_cast %233 : vector<8xf32> to vector<8x1xf32>
    %235 = vector.broadcast %234 : vector<8x1xf32> to vector<8x8xf32>
    %236 = arith.subf %232, %235 : vector<8x8xf32>
    %237 = math.exp %236 : vector<8x8xf32>
    %cst_162 = arith.constant dense<0.000000e+00> : vector<8xf32>
    %238 = vector.multi_reduction <add>, %237, %cst_162 [1] : vector<8x8xf32> to vector<8xf32>
    %239 = vector.shape_cast %238 : vector<8xf32> to vector<8x1xf32>
    %240 = tpu.reciprocal %239 {approx = true} : vector<8x1xf32> -> vector<8x1xf32>
    %241 = vector.broadcast %240 : vector<8x1xf32> to vector<8x8xf32>
    %242 = arith.mulf %237, %241 : vector<8x8xf32>
    %cst_163 = arith.constant dense<0.000000e+00> : vector<8x16xf32>
    %243 = tpu.matmul %242, %228, %cst_163 {dimension_numbers = #tpu.dot_dimension_numbers<[1], [0], [0], [1], [0, 0, 1, 1], [], []>} : vector<8x8xf32>, vector<8x16xf32>, vector<8x16xf32> -> vector<8x16xf32>
    %c0_164 = arith.constant 0 : index
    %c0_165 = arith.constant 0 : index
    %c0_166 = arith.constant 0 : index
    %c0_167 = arith.constant 0 : index
    %244 = vector.load %arg48[%c0_164, %c0_165, %c0_166, %c0_167] : memref<2x2x16x32xf32, #tpu.memory_space<vmem>>, vector<1x1x16x32xf32>
    %245 = vector.shape_cast %244 : vector<1x1x16x32xf32> to vector<16x32xf32>
    %cst_168 = arith.constant dense<0.000000e+00> : vector<8x32xf32>
    %246 = tpu.matmul %243, %245, %cst_168 {dimension_numbers = #tpu.dot_dimension_numbers<[1], [0], [0], [1], [0, 0, 1, 1], [], []>} : vector<8x16xf32>, vector<16x32xf32>, vector<8x32xf32> -> vector<8x32xf32>
    %c0_169 = arith.constant 0 : index
    %c1 = arith.constant 1 : index
    %c0_170 = arith.constant 0 : index
    %c0_171 = arith.constant 0 : index
    %247 = vector.load %arg42[%c0_169, %c1, %c0_170, %c0_171] : memref<2x2x32x16xf32, #tpu.memory_space<vmem>>, vector<1x1x32x16xf32>
    %248 = vector.shape_cast %247 : vector<1x1x32x16xf32> to vector<32x16xf32>
    %cst_172 = arith.constant dense<0.000000e+00> : vector<8x16xf32>
    %249 = tpu.matmul %207, %248, %cst_172 {dimension_numbers = #tpu.dot_dimension_numbers<[1], [0], [0], [1], [0, 0, 1, 1], [], []>} : vector<8x32xf32>, vector<32x16xf32>, vector<8x16xf32> -> vector<8x16xf32>
    %c0_173 = arith.constant 0 : index
    %c1_174 = arith.constant 1 : index
    %c0_175 = arith.constant 0 : index
    %c0_176 = arith.constant 0 : index
    %250 = vector.load %arg45[%c0_173, %c1_174, %c0_175, %c0_176] : memref<2x2x1x16xf32, #tpu.memory_space<vmem>>, vector<1x1x1x16xf32>
    %251 = vector.shape_cast %250 : vector<1x1x1x16xf32> to vector<1x16xf32>
    %252 = vector.broadcast %251 : vector<1x16xf32> to vector<8x16xf32>
    %253 = arith.addf %249, %252 : vector<8x16xf32>
    %c0_177 = arith.constant 0 : index
    %c1_178 = arith.constant 1 : index
    %c0_179 = arith.constant 0 : index
    %c0_180 = arith.constant 0 : index
    %254 = vector.load %arg43[%c0_177, %c1_178, %c0_179, %c0_180] : memref<2x2x32x16xf32, #tpu.memory_space<vmem>>, vector<1x1x32x16xf32>
    %255 = vector.shape_cast %254 : vector<1x1x32x16xf32> to vector<32x16xf32>
    %cst_181 = arith.constant dense<0.000000e+00> : vector<8x16xf32>
    %256 = tpu.matmul %207, %255, %cst_181 {dimension_numbers = #tpu.dot_dimension_numbers<[1], [0], [0], [1], [0, 0, 1, 1], [], []>} : vector<8x32xf32>, vector<32x16xf32>, vector<8x16xf32> -> vector<8x16xf32>
    %c0_182 = arith.constant 0 : index
    %c1_183 = arith.constant 1 : index
    %c0_184 = arith.constant 0 : index
    %c0_185 = arith.constant 0 : index
    %257 = vector.load %arg46[%c0_182, %c1_183, %c0_184, %c0_185] : memref<2x2x1x16xf32, #tpu.memory_space<vmem>>, vector<1x1x1x16xf32>
    %258 = vector.shape_cast %257 : vector<1x1x1x16xf32> to vector<1x16xf32>
    %259 = vector.broadcast %258 : vector<1x16xf32> to vector<8x16xf32>
    %260 = arith.addf %256, %259 : vector<8x16xf32>
    %c0_186 = arith.constant 0 : index
    %c1_187 = arith.constant 1 : index
    %c0_188 = arith.constant 0 : index
    %c0_189 = arith.constant 0 : index
    %261 = vector.load %arg44[%c0_186, %c1_187, %c0_188, %c0_189] : memref<2x2x32x16xf32, #tpu.memory_space<vmem>>, vector<1x1x32x16xf32>
    %262 = vector.shape_cast %261 : vector<1x1x32x16xf32> to vector<32x16xf32>
    %cst_190 = arith.constant dense<0.000000e+00> : vector<8x16xf32>
    %263 = tpu.matmul %207, %262, %cst_190 {dimension_numbers = #tpu.dot_dimension_numbers<[1], [0], [0], [1], [0, 0, 1, 1], [], []>} : vector<8x32xf32>, vector<32x16xf32>, vector<8x16xf32> -> vector<8x16xf32>
    %c0_191 = arith.constant 0 : index
    %c1_192 = arith.constant 1 : index
    %c0_193 = arith.constant 0 : index
    %c0_194 = arith.constant 0 : index
    %264 = vector.load %arg47[%c0_191, %c1_192, %c0_193, %c0_194] : memref<2x2x1x16xf32, #tpu.memory_space<vmem>>, vector<1x1x1x16xf32>
    %265 = vector.shape_cast %264 : vector<1x1x1x16xf32> to vector<1x16xf32>
    %266 = vector.broadcast %265 : vector<1x16xf32> to vector<8x16xf32>
    %267 = arith.addf %263, %266 : vector<8x16xf32>
    %cst_195 = arith.constant dense<0.000000e+00> : vector<8x8xf32>
    %268 = tpu.matmul %253, %260, %cst_195 {dimension_numbers = #tpu.dot_dimension_numbers<[1], [1], [0], [0], [0, 0, 1, 0], [], []>} : vector<8x16xf32>, vector<8x16xf32>, vector<8x8xf32> -> vector<8x8xf32>
    %cst_196 = arith.constant 2.500000e-01 : f32
    %269 = vector.broadcast %cst_196 : f32 to vector<8x8xf32>
    %270 = arith.mulf %268, %269 : vector<8x8xf32>
    %271 = arith.addf %270, %182 : vector<8x8xf32>
    %cst_197 = arith.constant dense<0xFF800000> : vector<8xf32>
    %272 = vector.multi_reduction <maximumf>, %271, %cst_197 [1] : vector<8x8xf32> to vector<8xf32>
    %273 = vector.shape_cast %272 : vector<8xf32> to vector<8x1xf32>
    %274 = vector.broadcast %273 : vector<8x1xf32> to vector<8x8xf32>
    %275 = arith.subf %271, %274 : vector<8x8xf32>
    %276 = math.exp %275 : vector<8x8xf32>
    %cst_198 = arith.constant dense<0.000000e+00> : vector<8xf32>
    %277 = vector.multi_reduction <add>, %276, %cst_198 [1] : vector<8x8xf32> to vector<8xf32>
    %278 = vector.shape_cast %277 : vector<8xf32> to vector<8x1xf32>
    %279 = tpu.reciprocal %278 {approx = true} : vector<8x1xf32> -> vector<8x1xf32>
    %280 = vector.broadcast %279 : vector<8x1xf32> to vector<8x8xf32>
    %281 = arith.mulf %276, %280 : vector<8x8xf32>
    %cst_199 = arith.constant dense<0.000000e+00> : vector<8x16xf32>
    %282 = tpu.matmul %281, %267, %cst_199 {dimension_numbers = #tpu.dot_dimension_numbers<[1], [0], [0], [1], [0, 0, 1, 1], [], []>} : vector<8x8xf32>, vector<8x16xf32>, vector<8x16xf32> -> vector<8x16xf32>
    %c0_200 = arith.constant 0 : index
    %c1_201 = arith.constant 1 : index
    %c0_202 = arith.constant 0 : index
    %c0_203 = arith.constant 0 : index
    %283 = vector.load %arg48[%c0_200, %c1_201, %c0_202, %c0_203] : memref<2x2x16x32xf32, #tpu.memory_space<vmem>>, vector<1x1x16x32xf32>
    %284 = vector.shape_cast %283 : vector<1x1x16x32xf32> to vector<16x32xf32>
    %cst_204 = arith.constant dense<0.000000e+00> : vector<8x32xf32>
    %285 = tpu.matmul %282, %284, %cst_204 {dimension_numbers = #tpu.dot_dimension_numbers<[1], [0], [0], [1], [0, 0, 1, 1], [], []>} : vector<8x16xf32>, vector<16x32xf32>, vector<8x32xf32> -> vector<8x32xf32>
    %286 = arith.addf %246, %285 : vector<8x32xf32>
    %287 = arith.addf %181, %286 : vector<8x32xf32>
    %c0_205 = arith.constant 0 : index
    %c0_206 = arith.constant 0 : index
    %c0_207 = arith.constant 0 : index
    %288 = vector.load %arg49[%c0_205, %c0_206, %c0_207] : memref<2x1x32xf32, #tpu.memory_space<vmem>>, vector<1x1x32xf32>
    %289 = vector.shape_cast %288 : vector<1x1x32xf32> to vector<1x32xf32>
    %290 = vector.broadcast %289 : vector<1x32xf32> to vector<8x32xf32>
    %291 = arith.addf %287, %290 : vector<8x32xf32>
    %c0_208 = arith.constant 0 : index
    %c0_209 = arith.constant 0 : index
    %c0_210 = arith.constant 0 : index
    %292 = vector.load %arg38[%c0_208, %c0_209, %c0_210] : memref<2x1x32xf32, #tpu.memory_space<vmem>>, vector<1x1x32xf32>
    %293 = vector.shape_cast %292 : vector<1x1x32xf32> to vector<1x32xf32>
    %c0_211 = arith.constant 0 : index
    %c0_212 = arith.constant 0 : index
    %c0_213 = arith.constant 0 : index
    %294 = vector.load %arg39[%c0_211, %c0_212, %c0_213] : memref<2x1x32xf32, #tpu.memory_space<vmem>>, vector<1x1x32xf32>
    %295 = vector.shape_cast %294 : vector<1x1x32xf32> to vector<1x32xf32>
    %cst_214 = arith.constant dense<0.000000e+00> : vector<8xf32>
    %296 = vector.multi_reduction <add>, %291, %cst_214 [1] : vector<8x32xf32> to vector<8xf32>
    %297 = vector.shape_cast %296 : vector<8xf32> to vector<8x1xf32>
    %cst_215 = arith.constant 3.200000e+01 : f32
    %298 = vector.broadcast %cst_215 : f32 to vector<8x1xf32>
    %299 = arith.divf %297, %298 : vector<8x1xf32>
    %300 = vector.broadcast %299 : vector<8x1xf32> to vector<8x32xf32>
    %301 = arith.subf %291, %300 : vector<8x32xf32>
    %302 = arith.mulf %301, %301 : vector<8x32xf32>
    %cst_216 = arith.constant dense<0.000000e+00> : vector<8xf32>
    %303 = vector.multi_reduction <add>, %302, %cst_216 [1] : vector<8x32xf32> to vector<8xf32>
    %304 = vector.shape_cast %303 : vector<8xf32> to vector<8x1xf32>
    %cst_217 = arith.constant 3.200000e+01 : f32
    %305 = vector.broadcast %cst_217 : f32 to vector<8x1xf32>
    %306 = arith.divf %304, %305 : vector<8x1xf32>
    %cst_218 = arith.constant 9.99999974E-6 : f32
    %307 = vector.broadcast %cst_218 : f32 to vector<8x1xf32>
    %308 = arith.addf %306, %307 : vector<8x1xf32>
    %309 = math.rsqrt %308 : vector<8x1xf32>
    %310 = vector.broadcast %309 : vector<8x1xf32> to vector<8x32xf32>
    %311 = arith.mulf %301, %310 : vector<8x32xf32>
    %312 = vector.broadcast %293 : vector<1x32xf32> to vector<8x32xf32>
    %313 = arith.mulf %311, %312 : vector<8x32xf32>
    %314 = vector.broadcast %295 : vector<1x32xf32> to vector<8x32xf32>
    %315 = arith.addf %313, %314 : vector<8x32xf32>
    %c0_219 = arith.constant 0 : index
    %c0_220 = arith.constant 0 : index
    %c0_221 = arith.constant 0 : index
    %c0_222 = arith.constant 0 : index
    %316 = vector.load %arg50[%c0_219, %c0_220, %c0_221, %c0_222] : memref<2x2x32x16xf32, #tpu.memory_space<vmem>>, vector<1x1x32x16xf32>
    %317 = vector.shape_cast %316 : vector<1x1x32x16xf32> to vector<32x16xf32>
    %cst_223 = arith.constant dense<0.000000e+00> : vector<8x16xf32>
    %318 = tpu.matmul %315, %317, %cst_223 {dimension_numbers = #tpu.dot_dimension_numbers<[1], [0], [0], [1], [0, 0, 1, 1], [], []>} : vector<8x32xf32>, vector<32x16xf32>, vector<8x16xf32> -> vector<8x16xf32>
    %c0_224 = arith.constant 0 : index
    %c0_225 = arith.constant 0 : index
    %c0_226 = arith.constant 0 : index
    %c0_227 = arith.constant 0 : index
    %319 = vector.load %arg53[%c0_224, %c0_225, %c0_226, %c0_227] : memref<2x2x1x16xf32, #tpu.memory_space<vmem>>, vector<1x1x1x16xf32>
    %320 = vector.shape_cast %319 : vector<1x1x1x16xf32> to vector<1x16xf32>
    %321 = vector.broadcast %320 : vector<1x16xf32> to vector<8x16xf32>
    %322 = arith.addf %318, %321 : vector<8x16xf32>
    %c0_228 = arith.constant 0 : index
    %c0_229 = arith.constant 0 : index
    %c0_230 = arith.constant 0 : index
    %c0_231 = arith.constant 0 : index
    %323 = vector.load %arg51[%c0_228, %c0_229, %c0_230, %c0_231] : memref<2x2x32x16xf32, #tpu.memory_space<vmem>>, vector<1x1x32x16xf32>
    %324 = vector.shape_cast %323 : vector<1x1x32x16xf32> to vector<32x16xf32>
    %cst_232 = arith.constant dense<0.000000e+00> : vector<3x16xf32>
    %325 = tpu.matmul %174, %324, %cst_232 {dimension_numbers = #tpu.dot_dimension_numbers<[1], [0], [0], [1], [0, 0, 1, 1], [], []>} : vector<3x32xf32>, vector<32x16xf32>, vector<3x16xf32> -> vector<3x16xf32>
    %c0_233 = arith.constant 0 : index
    %c0_234 = arith.constant 0 : index
    %c0_235 = arith.constant 0 : index
    %c0_236 = arith.constant 0 : index
    %326 = vector.load %arg54[%c0_233, %c0_234, %c0_235, %c0_236] : memref<2x2x1x16xf32, #tpu.memory_space<vmem>>, vector<1x1x1x16xf32>
    %327 = vector.shape_cast %326 : vector<1x1x1x16xf32> to vector<1x16xf32>
    %328 = vector.broadcast %327 : vector<1x16xf32> to vector<3x16xf32>
    %329 = arith.addf %325, %328 : vector<3x16xf32>
    %c0_237 = arith.constant 0 : index
    %c0_238 = arith.constant 0 : index
    %c0_239 = arith.constant 0 : index
    %c0_240 = arith.constant 0 : index
    %330 = vector.load %arg52[%c0_237, %c0_238, %c0_239, %c0_240] : memref<2x2x32x16xf32, #tpu.memory_space<vmem>>, vector<1x1x32x16xf32>
    %331 = vector.shape_cast %330 : vector<1x1x32x16xf32> to vector<32x16xf32>
    %cst_241 = arith.constant dense<0.000000e+00> : vector<3x16xf32>
    %332 = tpu.matmul %174, %331, %cst_241 {dimension_numbers = #tpu.dot_dimension_numbers<[1], [0], [0], [1], [0, 0, 1, 1], [], []>} : vector<3x32xf32>, vector<32x16xf32>, vector<3x16xf32> -> vector<3x16xf32>
    %c0_242 = arith.constant 0 : index
    %c0_243 = arith.constant 0 : index
    %c0_244 = arith.constant 0 : index
    %c0_245 = arith.constant 0 : index
    %333 = vector.load %arg55[%c0_242, %c0_243, %c0_244, %c0_245] : memref<2x2x1x16xf32, #tpu.memory_space<vmem>>, vector<1x1x1x16xf32>
    %334 = vector.shape_cast %333 : vector<1x1x1x16xf32> to vector<1x16xf32>
    %335 = vector.broadcast %334 : vector<1x16xf32> to vector<3x16xf32>
    %336 = arith.addf %332, %335 : vector<3x16xf32>
    %cst_246 = arith.constant dense<0.000000e+00> : vector<8x3xf32>
    %337 = tpu.matmul %322, %329, %cst_246 {dimension_numbers = #tpu.dot_dimension_numbers<[1], [1], [0], [0], [0, 0, 1, 0], [], []>} : vector<8x16xf32>, vector<3x16xf32>, vector<8x3xf32> -> vector<8x3xf32>
    %cst_247 = arith.constant 2.500000e-01 : f32
    %338 = vector.broadcast %cst_247 : f32 to vector<8x3xf32>
    %339 = arith.mulf %337, %338 : vector<8x3xf32>
    %340 = arith.addf %339, %183 : vector<8x3xf32>
    %cst_248 = arith.constant dense<0xFF800000> : vector<8xf32>
    %341 = vector.multi_reduction <maximumf>, %340, %cst_248 [1] : vector<8x3xf32> to vector<8xf32>
    %342 = vector.shape_cast %341 : vector<8xf32> to vector<8x1xf32>
    %343 = vector.broadcast %342 : vector<8x1xf32> to vector<8x3xf32>
    %344 = arith.subf %340, %343 : vector<8x3xf32>
    %345 = math.exp %344 : vector<8x3xf32>
    %cst_249 = arith.constant dense<0.000000e+00> : vector<8xf32>
    %346 = vector.multi_reduction <add>, %345, %cst_249 [1] : vector<8x3xf32> to vector<8xf32>
    %347 = vector.shape_cast %346 : vector<8xf32> to vector<8x1xf32>
    %348 = tpu.reciprocal %347 {approx = true} : vector<8x1xf32> -> vector<8x1xf32>
    %349 = vector.broadcast %348 : vector<8x1xf32> to vector<8x3xf32>
    %350 = arith.mulf %345, %349 : vector<8x3xf32>
    %cst_250 = arith.constant dense<0.000000e+00> : vector<8x16xf32>
    %351 = tpu.matmul %350, %336, %cst_250 {dimension_numbers = #tpu.dot_dimension_numbers<[1], [0], [0], [1], [0, 0, 1, 1], [], []>} : vector<8x3xf32>, vector<3x16xf32>, vector<8x16xf32> -> vector<8x16xf32>
    %c0_251 = arith.constant 0 : index
    %c0_252 = arith.constant 0 : index
    %c0_253 = arith.constant 0 : index
    %c0_254 = arith.constant 0 : index
    %352 = vector.load %arg56[%c0_251, %c0_252, %c0_253, %c0_254] : memref<2x2x16x32xf32, #tpu.memory_space<vmem>>, vector<1x1x16x32xf32>
    %353 = vector.shape_cast %352 : vector<1x1x16x32xf32> to vector<16x32xf32>
    %cst_255 = arith.constant dense<0.000000e+00> : vector<8x32xf32>
    %354 = tpu.matmul %351, %353, %cst_255 {dimension_numbers = #tpu.dot_dimension_numbers<[1], [0], [0], [1], [0, 0, 1, 1], [], []>} : vector<8x16xf32>, vector<16x32xf32>, vector<8x32xf32> -> vector<8x32xf32>
    %c0_256 = arith.constant 0 : index
    %c1_257 = arith.constant 1 : index
    %c0_258 = arith.constant 0 : index
    %c0_259 = arith.constant 0 : index
    %355 = vector.load %arg50[%c0_256, %c1_257, %c0_258, %c0_259] : memref<2x2x32x16xf32, #tpu.memory_space<vmem>>, vector<1x1x32x16xf32>
    %356 = vector.shape_cast %355 : vector<1x1x32x16xf32> to vector<32x16xf32>
    %cst_260 = arith.constant dense<0.000000e+00> : vector<8x16xf32>
    %357 = tpu.matmul %315, %356, %cst_260 {dimension_numbers = #tpu.dot_dimension_numbers<[1], [0], [0], [1], [0, 0, 1, 1], [], []>} : vector<8x32xf32>, vector<32x16xf32>, vector<8x16xf32> -> vector<8x16xf32>
    %c0_261 = arith.constant 0 : index
    %c1_262 = arith.constant 1 : index
    %c0_263 = arith.constant 0 : index
    %c0_264 = arith.constant 0 : index
    %358 = vector.load %arg53[%c0_261, %c1_262, %c0_263, %c0_264] : memref<2x2x1x16xf32, #tpu.memory_space<vmem>>, vector<1x1x1x16xf32>
    %359 = vector.shape_cast %358 : vector<1x1x1x16xf32> to vector<1x16xf32>
    %360 = vector.broadcast %359 : vector<1x16xf32> to vector<8x16xf32>
    %361 = arith.addf %357, %360 : vector<8x16xf32>
    %c0_265 = arith.constant 0 : index
    %c1_266 = arith.constant 1 : index
    %c0_267 = arith.constant 0 : index
    %c0_268 = arith.constant 0 : index
    %362 = vector.load %arg51[%c0_265, %c1_266, %c0_267, %c0_268] : memref<2x2x32x16xf32, #tpu.memory_space<vmem>>, vector<1x1x32x16xf32>
    %363 = vector.shape_cast %362 : vector<1x1x32x16xf32> to vector<32x16xf32>
    %cst_269 = arith.constant dense<0.000000e+00> : vector<3x16xf32>
    %364 = tpu.matmul %174, %363, %cst_269 {dimension_numbers = #tpu.dot_dimension_numbers<[1], [0], [0], [1], [0, 0, 1, 1], [], []>} : vector<3x32xf32>, vector<32x16xf32>, vector<3x16xf32> -> vector<3x16xf32>
    %c0_270 = arith.constant 0 : index
    %c1_271 = arith.constant 1 : index
    %c0_272 = arith.constant 0 : index
    %c0_273 = arith.constant 0 : index
    %365 = vector.load %arg54[%c0_270, %c1_271, %c0_272, %c0_273] : memref<2x2x1x16xf32, #tpu.memory_space<vmem>>, vector<1x1x1x16xf32>
    %366 = vector.shape_cast %365 : vector<1x1x1x16xf32> to vector<1x16xf32>
    %367 = vector.broadcast %366 : vector<1x16xf32> to vector<3x16xf32>
    %368 = arith.addf %364, %367 : vector<3x16xf32>
    %c0_274 = arith.constant 0 : index
    %c1_275 = arith.constant 1 : index
    %c0_276 = arith.constant 0 : index
    %c0_277 = arith.constant 0 : index
    %369 = vector.load %arg52[%c0_274, %c1_275, %c0_276, %c0_277] : memref<2x2x32x16xf32, #tpu.memory_space<vmem>>, vector<1x1x32x16xf32>
    %370 = vector.shape_cast %369 : vector<1x1x32x16xf32> to vector<32x16xf32>
    %cst_278 = arith.constant dense<0.000000e+00> : vector<3x16xf32>
    %371 = tpu.matmul %174, %370, %cst_278 {dimension_numbers = #tpu.dot_dimension_numbers<[1], [0], [0], [1], [0, 0, 1, 1], [], []>} : vector<3x32xf32>, vector<32x16xf32>, vector<3x16xf32> -> vector<3x16xf32>
    %c0_279 = arith.constant 0 : index
    %c1_280 = arith.constant 1 : index
    %c0_281 = arith.constant 0 : index
    %c0_282 = arith.constant 0 : index
    %372 = vector.load %arg55[%c0_279, %c1_280, %c0_281, %c0_282] : memref<2x2x1x16xf32, #tpu.memory_space<vmem>>, vector<1x1x1x16xf32>
    %373 = vector.shape_cast %372 : vector<1x1x1x16xf32> to vector<1x16xf32>
    %374 = vector.broadcast %373 : vector<1x16xf32> to vector<3x16xf32>
    %375 = arith.addf %371, %374 : vector<3x16xf32>
    %cst_283 = arith.constant dense<0.000000e+00> : vector<8x3xf32>
    %376 = tpu.matmul %361, %368, %cst_283 {dimension_numbers = #tpu.dot_dimension_numbers<[1], [1], [0], [0], [0, 0, 1, 0], [], []>} : vector<8x16xf32>, vector<3x16xf32>, vector<8x3xf32> -> vector<8x3xf32>
    %cst_284 = arith.constant 2.500000e-01 : f32
    %377 = vector.broadcast %cst_284 : f32 to vector<8x3xf32>
    %378 = arith.mulf %376, %377 : vector<8x3xf32>
    %379 = arith.addf %378, %183 : vector<8x3xf32>
    %cst_285 = arith.constant dense<0xFF800000> : vector<8xf32>
    %380 = vector.multi_reduction <maximumf>, %379, %cst_285 [1] : vector<8x3xf32> to vector<8xf32>
    %381 = vector.shape_cast %380 : vector<8xf32> to vector<8x1xf32>
    %382 = vector.broadcast %381 : vector<8x1xf32> to vector<8x3xf32>
    %383 = arith.subf %379, %382 : vector<8x3xf32>
    %384 = math.exp %383 : vector<8x3xf32>
    %cst_286 = arith.constant dense<0.000000e+00> : vector<8xf32>
    %385 = vector.multi_reduction <add>, %384, %cst_286 [1] : vector<8x3xf32> to vector<8xf32>
    %386 = vector.shape_cast %385 : vector<8xf32> to vector<8x1xf32>
    %387 = tpu.reciprocal %386 {approx = true} : vector<8x1xf32> -> vector<8x1xf32>
    %388 = vector.broadcast %387 : vector<8x1xf32> to vector<8x3xf32>
    %389 = arith.mulf %384, %388 : vector<8x3xf32>
    %cst_287 = arith.constant dense<0.000000e+00> : vector<8x16xf32>
    %390 = tpu.matmul %389, %375, %cst_287 {dimension_numbers = #tpu.dot_dimension_numbers<[1], [0], [0], [1], [0, 0, 1, 1], [], []>} : vector<8x3xf32>, vector<3x16xf32>, vector<8x16xf32> -> vector<8x16xf32>
    %c0_288 = arith.constant 0 : index
    %c1_289 = arith.constant 1 : index
    %c0_290 = arith.constant 0 : index
    %c0_291 = arith.constant 0 : index
    %391 = vector.load %arg56[%c0_288, %c1_289, %c0_290, %c0_291] : memref<2x2x16x32xf32, #tpu.memory_space<vmem>>, vector<1x1x16x32xf32>
    %392 = vector.shape_cast %391 : vector<1x1x16x32xf32> to vector<16x32xf32>
    %cst_292 = arith.constant dense<0.000000e+00> : vector<8x32xf32>
    %393 = tpu.matmul %390, %392, %cst_292 {dimension_numbers = #tpu.dot_dimension_numbers<[1], [0], [0], [1], [0, 0, 1, 1], [], []>} : vector<8x16xf32>, vector<16x32xf32>, vector<8x32xf32> -> vector<8x32xf32>
    %394 = arith.addf %354, %393 : vector<8x32xf32>
    %395 = arith.addf %291, %394 : vector<8x32xf32>
    %c0_293 = arith.constant 0 : index
    %c0_294 = arith.constant 0 : index
    %c0_295 = arith.constant 0 : index
    %396 = vector.load %arg57[%c0_293, %c0_294, %c0_295] : memref<2x1x32xf32, #tpu.memory_space<vmem>>, vector<1x1x32xf32>
    %397 = vector.shape_cast %396 : vector<1x1x32xf32> to vector<1x32xf32>
    %398 = vector.broadcast %397 : vector<1x32xf32> to vector<8x32xf32>
    %399 = arith.addf %395, %398 : vector<8x32xf32>
    %c0_296 = arith.constant 0 : index
    %c0_297 = arith.constant 0 : index
    %c0_298 = arith.constant 0 : index
    %400 = vector.load %arg40[%c0_296, %c0_297, %c0_298] : memref<2x1x32xf32, #tpu.memory_space<vmem>>, vector<1x1x32xf32>
    %401 = vector.shape_cast %400 : vector<1x1x32xf32> to vector<1x32xf32>
    %c0_299 = arith.constant 0 : index
    %c0_300 = arith.constant 0 : index
    %c0_301 = arith.constant 0 : index
    %402 = vector.load %arg41[%c0_299, %c0_300, %c0_301] : memref<2x1x32xf32, #tpu.memory_space<vmem>>, vector<1x1x32xf32>
    %403 = vector.shape_cast %402 : vector<1x1x32xf32> to vector<1x32xf32>
    %cst_302 = arith.constant dense<0.000000e+00> : vector<8xf32>
    %404 = vector.multi_reduction <add>, %399, %cst_302 [1] : vector<8x32xf32> to vector<8xf32>
    %405 = vector.shape_cast %404 : vector<8xf32> to vector<8x1xf32>
    %cst_303 = arith.constant 3.200000e+01 : f32
    %406 = vector.broadcast %cst_303 : f32 to vector<8x1xf32>
    %407 = arith.divf %405, %406 : vector<8x1xf32>
    %408 = vector.broadcast %407 : vector<8x1xf32> to vector<8x32xf32>
    %409 = arith.subf %399, %408 : vector<8x32xf32>
    %410 = arith.mulf %409, %409 : vector<8x32xf32>
    %cst_304 = arith.constant dense<0.000000e+00> : vector<8xf32>
    %411 = vector.multi_reduction <add>, %410, %cst_304 [1] : vector<8x32xf32> to vector<8xf32>
    %412 = vector.shape_cast %411 : vector<8xf32> to vector<8x1xf32>
    %cst_305 = arith.constant 3.200000e+01 : f32
    %413 = vector.broadcast %cst_305 : f32 to vector<8x1xf32>
    %414 = arith.divf %412, %413 : vector<8x1xf32>
    %cst_306 = arith.constant 9.99999974E-6 : f32
    %415 = vector.broadcast %cst_306 : f32 to vector<8x1xf32>
    %416 = arith.addf %414, %415 : vector<8x1xf32>
    %417 = math.rsqrt %416 : vector<8x1xf32>
    %418 = vector.broadcast %417 : vector<8x1xf32> to vector<8x32xf32>
    %419 = arith.mulf %409, %418 : vector<8x32xf32>
    %420 = vector.broadcast %401 : vector<1x32xf32> to vector<8x32xf32>
    %421 = arith.mulf %419, %420 : vector<8x32xf32>
    %422 = vector.broadcast %403 : vector<1x32xf32> to vector<8x32xf32>
    %423 = arith.addf %421, %422 : vector<8x32xf32>
    %c0_307 = arith.constant 0 : index
    %c0_308 = arith.constant 0 : index
    %c0_309 = arith.constant 0 : index
    %424 = vector.load %arg58[%c0_307, %c0_308, %c0_309] : memref<2x32x128xf32, #tpu.memory_space<vmem>>, vector<1x32x128xf32>
    %425 = vector.shape_cast %424 : vector<1x32x128xf32> to vector<32x128xf32>
    %cst_310 = arith.constant dense<0.000000e+00> : vector<8x128xf32>
    %426 = tpu.matmul %423, %425, %cst_310 {dimension_numbers = #tpu.dot_dimension_numbers<[1], [0], [0], [1], [0, 0, 1, 1], [], []>} : vector<8x32xf32>, vector<32x128xf32>, vector<8x128xf32> -> vector<8x128xf32>
    %c0_311 = arith.constant 0 : index
    %c0_312 = arith.constant 0 : index
    %c0_313 = arith.constant 0 : index
    %427 = vector.load %arg59[%c0_311, %c0_312, %c0_313] : memref<2x1x128xf32, #tpu.memory_space<vmem>>, vector<1x1x128xf32>
    %428 = vector.shape_cast %427 : vector<1x1x128xf32> to vector<1x128xf32>
    %429 = vector.broadcast %428 : vector<1x128xf32> to vector<8x128xf32>
    %430 = arith.addf %426, %429 : vector<8x128xf32>
    %cst_314 = arith.constant 5.000000e-01 : f32
    %431 = vector.broadcast %cst_314 : f32 to vector<8x128xf32>
    %432 = arith.mulf %431, %430 : vector<8x128xf32>
    %cst_315 = arith.constant 4.471500e-02 : f32
    %433 = vector.broadcast %cst_315 : f32 to vector<8x128xf32>
    %434 = arith.mulf %433, %430 : vector<8x128xf32>
    %435 = arith.mulf %434, %430 : vector<8x128xf32>
    %436 = arith.mulf %435, %430 : vector<8x128xf32>
    %437 = arith.addf %430, %436 : vector<8x128xf32>
    %cst_316 = arith.constant 0.797884583 : f32
    %438 = vector.broadcast %cst_316 : f32 to vector<8x128xf32>
    %439 = arith.mulf %438, %437 : vector<8x128xf32>
    %440 = math.tanh %439 : vector<8x128xf32>
    %cst_317 = arith.constant 1.000000e+00 : f32
    %441 = vector.broadcast %cst_317 : f32 to vector<8x128xf32>
    %442 = arith.addf %441, %440 : vector<8x128xf32>
    %443 = arith.mulf %432, %442 : vector<8x128xf32>
    %c0_318 = arith.constant 0 : index
    %c0_319 = arith.constant 0 : index
    %c0_320 = arith.constant 0 : index
    %444 = vector.load %arg60[%c0_318, %c0_319, %c0_320] : memref<2x128x32xf32, #tpu.memory_space<vmem>>, vector<1x128x32xf32>
    %445 = vector.shape_cast %444 : vector<1x128x32xf32> to vector<128x32xf32>
    %cst_321 = arith.constant dense<0.000000e+00> : vector<8x32xf32>
    %446 = tpu.matmul %443, %445, %cst_321 {dimension_numbers = #tpu.dot_dimension_numbers<[1], [0], [0], [1], [0, 0, 1, 1], [], []>} : vector<8x128xf32>, vector<128x32xf32>, vector<8x32xf32> -> vector<8x32xf32>
    %447 = arith.addf %399, %446 : vector<8x32xf32>
    %c0_322 = arith.constant 0 : index
    %c0_323 = arith.constant 0 : index
    %c0_324 = arith.constant 0 : index
    %448 = vector.load %arg61[%c0_322, %c0_323, %c0_324] : memref<2x1x32xf32, #tpu.memory_space<vmem>>, vector<1x1x32xf32>
    %449 = vector.shape_cast %448 : vector<1x1x32xf32> to vector<1x32xf32>
    %450 = vector.broadcast %449 : vector<1x32xf32> to vector<8x32xf32>
    %451 = arith.addf %447, %450 : vector<8x32xf32>
    %c1_325 = arith.constant 1 : index
    %c0_326 = arith.constant 0 : index
    %c0_327 = arith.constant 0 : index
    %452 = vector.load %arg36[%c1_325, %c0_326, %c0_327] : memref<2x1x32xf32, #tpu.memory_space<vmem>>, vector<1x1x32xf32>
    %453 = vector.shape_cast %452 : vector<1x1x32xf32> to vector<1x32xf32>
    %c1_328 = arith.constant 1 : index
    %c0_329 = arith.constant 0 : index
    %c0_330 = arith.constant 0 : index
    %454 = vector.load %arg37[%c1_328, %c0_329, %c0_330] : memref<2x1x32xf32, #tpu.memory_space<vmem>>, vector<1x1x32xf32>
    %455 = vector.shape_cast %454 : vector<1x1x32xf32> to vector<1x32xf32>
    %cst_331 = arith.constant dense<0.000000e+00> : vector<8xf32>
    %456 = vector.multi_reduction <add>, %451, %cst_331 [1] : vector<8x32xf32> to vector<8xf32>
    %457 = vector.shape_cast %456 : vector<8xf32> to vector<8x1xf32>
    %cst_332 = arith.constant 3.200000e+01 : f32
    %458 = vector.broadcast %cst_332 : f32 to vector<8x1xf32>
    %459 = arith.divf %457, %458 : vector<8x1xf32>
    %460 = vector.broadcast %459 : vector<8x1xf32> to vector<8x32xf32>
    %461 = arith.subf %451, %460 : vector<8x32xf32>
    %462 = arith.mulf %461, %461 : vector<8x32xf32>
    %cst_333 = arith.constant dense<0.000000e+00> : vector<8xf32>
    %463 = vector.multi_reduction <add>, %462, %cst_333 [1] : vector<8x32xf32> to vector<8xf32>
    %464 = vector.shape_cast %463 : vector<8xf32> to vector<8x1xf32>
    %cst_334 = arith.constant 3.200000e+01 : f32
    %465 = vector.broadcast %cst_334 : f32 to vector<8x1xf32>
    %466 = arith.divf %464, %465 : vector<8x1xf32>
    %cst_335 = arith.constant 9.99999974E-6 : f32
    %467 = vector.broadcast %cst_335 : f32 to vector<8x1xf32>
    %468 = arith.addf %466, %467 : vector<8x1xf32>
    %469 = math.rsqrt %468 : vector<8x1xf32>
    %470 = vector.broadcast %469 : vector<8x1xf32> to vector<8x32xf32>
    %471 = arith.mulf %461, %470 : vector<8x32xf32>
    %472 = vector.broadcast %453 : vector<1x32xf32> to vector<8x32xf32>
    %473 = arith.mulf %471, %472 : vector<8x32xf32>
    %474 = vector.broadcast %455 : vector<1x32xf32> to vector<8x32xf32>
    %475 = arith.addf %473, %474 : vector<8x32xf32>
    %c1_336 = arith.constant 1 : index
    %c0_337 = arith.constant 0 : index
    %c0_338 = arith.constant 0 : index
    %c0_339 = arith.constant 0 : index
    %476 = vector.load %arg42[%c1_336, %c0_337, %c0_338, %c0_339] : memref<2x2x32x16xf32, #tpu.memory_space<vmem>>, vector<1x1x32x16xf32>
    %477 = vector.shape_cast %476 : vector<1x1x32x16xf32> to vector<32x16xf32>
    %cst_340 = arith.constant dense<0.000000e+00> : vector<8x16xf32>
    %478 = tpu.matmul %475, %477, %cst_340 {dimension_numbers = #tpu.dot_dimension_numbers<[1], [0], [0], [1], [0, 0, 1, 1], [], []>} : vector<8x32xf32>, vector<32x16xf32>, vector<8x16xf32> -> vector<8x16xf32>
    %c1_341 = arith.constant 1 : index
    %c0_342 = arith.constant 0 : index
    %c0_343 = arith.constant 0 : index
    %c0_344 = arith.constant 0 : index
    %479 = vector.load %arg45[%c1_341, %c0_342, %c0_343, %c0_344] : memref<2x2x1x16xf32, #tpu.memory_space<vmem>>, vector<1x1x1x16xf32>
    %480 = vector.shape_cast %479 : vector<1x1x1x16xf32> to vector<1x16xf32>
    %481 = vector.broadcast %480 : vector<1x16xf32> to vector<8x16xf32>
    %482 = arith.addf %478, %481 : vector<8x16xf32>
    %c1_345 = arith.constant 1 : index
    %c0_346 = arith.constant 0 : index
    %c0_347 = arith.constant 0 : index
    %c0_348 = arith.constant 0 : index
    %483 = vector.load %arg43[%c1_345, %c0_346, %c0_347, %c0_348] : memref<2x2x32x16xf32, #tpu.memory_space<vmem>>, vector<1x1x32x16xf32>
    %484 = vector.shape_cast %483 : vector<1x1x32x16xf32> to vector<32x16xf32>
    %cst_349 = arith.constant dense<0.000000e+00> : vector<8x16xf32>
    %485 = tpu.matmul %475, %484, %cst_349 {dimension_numbers = #tpu.dot_dimension_numbers<[1], [0], [0], [1], [0, 0, 1, 1], [], []>} : vector<8x32xf32>, vector<32x16xf32>, vector<8x16xf32> -> vector<8x16xf32>
    %c1_350 = arith.constant 1 : index
    %c0_351 = arith.constant 0 : index
    %c0_352 = arith.constant 0 : index
    %c0_353 = arith.constant 0 : index
    %486 = vector.load %arg46[%c1_350, %c0_351, %c0_352, %c0_353] : memref<2x2x1x16xf32, #tpu.memory_space<vmem>>, vector<1x1x1x16xf32>
    %487 = vector.shape_cast %486 : vector<1x1x1x16xf32> to vector<1x16xf32>
    %488 = vector.broadcast %487 : vector<1x16xf32> to vector<8x16xf32>
    %489 = arith.addf %485, %488 : vector<8x16xf32>
    %c1_354 = arith.constant 1 : index
    %c0_355 = arith.constant 0 : index
    %c0_356 = arith.constant 0 : index
    %c0_357 = arith.constant 0 : index
    %490 = vector.load %arg44[%c1_354, %c0_355, %c0_356, %c0_357] : memref<2x2x32x16xf32, #tpu.memory_space<vmem>>, vector<1x1x32x16xf32>
    %491 = vector.shape_cast %490 : vector<1x1x32x16xf32> to vector<32x16xf32>
    %cst_358 = arith.constant dense<0.000000e+00> : vector<8x16xf32>
    %492 = tpu.matmul %475, %491, %cst_358 {dimension_numbers = #tpu.dot_dimension_numbers<[1], [0], [0], [1], [0, 0, 1, 1], [], []>} : vector<8x32xf32>, vector<32x16xf32>, vector<8x16xf32> -> vector<8x16xf32>
    %c1_359 = arith.constant 1 : index
    %c0_360 = arith.constant 0 : index
    %c0_361 = arith.constant 0 : index
    %c0_362 = arith.constant 0 : index
    %493 = vector.load %arg47[%c1_359, %c0_360, %c0_361, %c0_362] : memref<2x2x1x16xf32, #tpu.memory_space<vmem>>, vector<1x1x1x16xf32>
    %494 = vector.shape_cast %493 : vector<1x1x1x16xf32> to vector<1x16xf32>
    %495 = vector.broadcast %494 : vector<1x16xf32> to vector<8x16xf32>
    %496 = arith.addf %492, %495 : vector<8x16xf32>
    %cst_363 = arith.constant dense<0.000000e+00> : vector<8x8xf32>
    %497 = tpu.matmul %482, %489, %cst_363 {dimension_numbers = #tpu.dot_dimension_numbers<[1], [1], [0], [0], [0, 0, 1, 0], [], []>} : vector<8x16xf32>, vector<8x16xf32>, vector<8x8xf32> -> vector<8x8xf32>
    %cst_364 = arith.constant 2.500000e-01 : f32
    %498 = vector.broadcast %cst_364 : f32 to vector<8x8xf32>
    %499 = arith.mulf %497, %498 : vector<8x8xf32>
    %500 = arith.addf %499, %182 : vector<8x8xf32>
    %cst_365 = arith.constant dense<0xFF800000> : vector<8xf32>
    %501 = vector.multi_reduction <maximumf>, %500, %cst_365 [1] : vector<8x8xf32> to vector<8xf32>
    %502 = vector.shape_cast %501 : vector<8xf32> to vector<8x1xf32>
    %503 = vector.broadcast %502 : vector<8x1xf32> to vector<8x8xf32>
    %504 = arith.subf %500, %503 : vector<8x8xf32>
    %505 = math.exp %504 : vector<8x8xf32>
    %cst_366 = arith.constant dense<0.000000e+00> : vector<8xf32>
    %506 = vector.multi_reduction <add>, %505, %cst_366 [1] : vector<8x8xf32> to vector<8xf32>
    %507 = vector.shape_cast %506 : vector<8xf32> to vector<8x1xf32>
    %508 = tpu.reciprocal %507 {approx = true} : vector<8x1xf32> -> vector<8x1xf32>
    %509 = vector.broadcast %508 : vector<8x1xf32> to vector<8x8xf32>
    %510 = arith.mulf %505, %509 : vector<8x8xf32>
    %cst_367 = arith.constant dense<0.000000e+00> : vector<8x16xf32>
    %511 = tpu.matmul %510, %496, %cst_367 {dimension_numbers = #tpu.dot_dimension_numbers<[1], [0], [0], [1], [0, 0, 1, 1], [], []>} : vector<8x8xf32>, vector<8x16xf32>, vector<8x16xf32> -> vector<8x16xf32>
    %c1_368 = arith.constant 1 : index
    %c0_369 = arith.constant 0 : index
    %c0_370 = arith.constant 0 : index
    %c0_371 = arith.constant 0 : index
    %512 = vector.load %arg48[%c1_368, %c0_369, %c0_370, %c0_371] : memref<2x2x16x32xf32, #tpu.memory_space<vmem>>, vector<1x1x16x32xf32>
    %513 = vector.shape_cast %512 : vector<1x1x16x32xf32> to vector<16x32xf32>
    %cst_372 = arith.constant dense<0.000000e+00> : vector<8x32xf32>
    %514 = tpu.matmul %511, %513, %cst_372 {dimension_numbers = #tpu.dot_dimension_numbers<[1], [0], [0], [1], [0, 0, 1, 1], [], []>} : vector<8x16xf32>, vector<16x32xf32>, vector<8x32xf32> -> vector<8x32xf32>
    %c1_373 = arith.constant 1 : index
    %c1_374 = arith.constant 1 : index
    %c0_375 = arith.constant 0 : index
    %c0_376 = arith.constant 0 : index
    %515 = vector.load %arg42[%c1_373, %c1_374, %c0_375, %c0_376] : memref<2x2x32x16xf32, #tpu.memory_space<vmem>>, vector<1x1x32x16xf32>
    %516 = vector.shape_cast %515 : vector<1x1x32x16xf32> to vector<32x16xf32>
    %cst_377 = arith.constant dense<0.000000e+00> : vector<8x16xf32>
    %517 = tpu.matmul %475, %516, %cst_377 {dimension_numbers = #tpu.dot_dimension_numbers<[1], [0], [0], [1], [0, 0, 1, 1], [], []>} : vector<8x32xf32>, vector<32x16xf32>, vector<8x16xf32> -> vector<8x16xf32>
    %c1_378 = arith.constant 1 : index
    %c1_379 = arith.constant 1 : index
    %c0_380 = arith.constant 0 : index
    %c0_381 = arith.constant 0 : index
    %518 = vector.load %arg45[%c1_378, %c1_379, %c0_380, %c0_381] : memref<2x2x1x16xf32, #tpu.memory_space<vmem>>, vector<1x1x1x16xf32>
    %519 = vector.shape_cast %518 : vector<1x1x1x16xf32> to vector<1x16xf32>
    %520 = vector.broadcast %519 : vector<1x16xf32> to vector<8x16xf32>
    %521 = arith.addf %517, %520 : vector<8x16xf32>
    %c1_382 = arith.constant 1 : index
    %c1_383 = arith.constant 1 : index
    %c0_384 = arith.constant 0 : index
    %c0_385 = arith.constant 0 : index
    %522 = vector.load %arg43[%c1_382, %c1_383, %c0_384, %c0_385] : memref<2x2x32x16xf32, #tpu.memory_space<vmem>>, vector<1x1x32x16xf32>
    %523 = vector.shape_cast %522 : vector<1x1x32x16xf32> to vector<32x16xf32>
    %cst_386 = arith.constant dense<0.000000e+00> : vector<8x16xf32>
    %524 = tpu.matmul %475, %523, %cst_386 {dimension_numbers = #tpu.dot_dimension_numbers<[1], [0], [0], [1], [0, 0, 1, 1], [], []>} : vector<8x32xf32>, vector<32x16xf32>, vector<8x16xf32> -> vector<8x16xf32>
    %c1_387 = arith.constant 1 : index
    %c1_388 = arith.constant 1 : index
    %c0_389 = arith.constant 0 : index
    %c0_390 = arith.constant 0 : index
    %525 = vector.load %arg46[%c1_387, %c1_388, %c0_389, %c0_390] : memref<2x2x1x16xf32, #tpu.memory_space<vmem>>, vector<1x1x1x16xf32>
    %526 = vector.shape_cast %525 : vector<1x1x1x16xf32> to vector<1x16xf32>
    %527 = vector.broadcast %526 : vector<1x16xf32> to vector<8x16xf32>
    %528 = arith.addf %524, %527 : vector<8x16xf32>
    %c1_391 = arith.constant 1 : index
    %c1_392 = arith.constant 1 : index
    %c0_393 = arith.constant 0 : index
    %c0_394 = arith.constant 0 : index
    %529 = vector.load %arg44[%c1_391, %c1_392, %c0_393, %c0_394] : memref<2x2x32x16xf32, #tpu.memory_space<vmem>>, vector<1x1x32x16xf32>
    %530 = vector.shape_cast %529 : vector<1x1x32x16xf32> to vector<32x16xf32>
    %cst_395 = arith.constant dense<0.000000e+00> : vector<8x16xf32>
    %531 = tpu.matmul %475, %530, %cst_395 {dimension_numbers = #tpu.dot_dimension_numbers<[1], [0], [0], [1], [0, 0, 1, 1], [], []>} : vector<8x32xf32>, vector<32x16xf32>, vector<8x16xf32> -> vector<8x16xf32>
    %c1_396 = arith.constant 1 : index
    %c1_397 = arith.constant 1 : index
    %c0_398 = arith.constant 0 : index
    %c0_399 = arith.constant 0 : index
    %532 = vector.load %arg47[%c1_396, %c1_397, %c0_398, %c0_399] : memref<2x2x1x16xf32, #tpu.memory_space<vmem>>, vector<1x1x1x16xf32>
    %533 = vector.shape_cast %532 : vector<1x1x1x16xf32> to vector<1x16xf32>
    %534 = vector.broadcast %533 : vector<1x16xf32> to vector<8x16xf32>
    %535 = arith.addf %531, %534 : vector<8x16xf32>
    %cst_400 = arith.constant dense<0.000000e+00> : vector<8x8xf32>
    %536 = tpu.matmul %521, %528, %cst_400 {dimension_numbers = #tpu.dot_dimension_numbers<[1], [1], [0], [0], [0, 0, 1, 0], [], []>} : vector<8x16xf32>, vector<8x16xf32>, vector<8x8xf32> -> vector<8x8xf32>
    %cst_401 = arith.constant 2.500000e-01 : f32
    %537 = vector.broadcast %cst_401 : f32 to vector<8x8xf32>
    %538 = arith.mulf %536, %537 : vector<8x8xf32>
    %539 = arith.addf %538, %182 : vector<8x8xf32>
    %cst_402 = arith.constant dense<0xFF800000> : vector<8xf32>
    %540 = vector.multi_reduction <maximumf>, %539, %cst_402 [1] : vector<8x8xf32> to vector<8xf32>
    %541 = vector.shape_cast %540 : vector<8xf32> to vector<8x1xf32>
    %542 = vector.broadcast %541 : vector<8x1xf32> to vector<8x8xf32>
    %543 = arith.subf %539, %542 : vector<8x8xf32>
    %544 = math.exp %543 : vector<8x8xf32>
    %cst_403 = arith.constant dense<0.000000e+00> : vector<8xf32>
    %545 = vector.multi_reduction <add>, %544, %cst_403 [1] : vector<8x8xf32> to vector<8xf32>
    %546 = vector.shape_cast %545 : vector<8xf32> to vector<8x1xf32>
    %547 = tpu.reciprocal %546 {approx = true} : vector<8x1xf32> -> vector<8x1xf32>
    %548 = vector.broadcast %547 : vector<8x1xf32> to vector<8x8xf32>
    %549 = arith.mulf %544, %548 : vector<8x8xf32>
    %cst_404 = arith.constant dense<0.000000e+00> : vector<8x16xf32>
    %550 = tpu.matmul %549, %535, %cst_404 {dimension_numbers = #tpu.dot_dimension_numbers<[1], [0], [0], [1], [0, 0, 1, 1], [], []>} : vector<8x8xf32>, vector<8x16xf32>, vector<8x16xf32> -> vector<8x16xf32>
    %c1_405 = arith.constant 1 : index
    %c1_406 = arith.constant 1 : index
    %c0_407 = arith.constant 0 : index
    %c0_408 = arith.constant 0 : index
    %551 = vector.load %arg48[%c1_405, %c1_406, %c0_407, %c0_408] : memref<2x2x16x32xf32, #tpu.memory_space<vmem>>, vector<1x1x16x32xf32>
    %552 = vector.shape_cast %551 : vector<1x1x16x32xf32> to vector<16x32xf32>
    %cst_409 = arith.constant dense<0.000000e+00> : vector<8x32xf32>
    %553 = tpu.matmul %550, %552, %cst_409 {dimension_numbers = #tpu.dot_dimension_numbers<[1], [0], [0], [1], [0, 0, 1, 1], [], []>} : vector<8x16xf32>, vector<16x32xf32>, vector<8x32xf32> -> vector<8x32xf32>
    %554 = arith.addf %514, %553 : vector<8x32xf32>
    %555 = arith.addf %451, %554 : vector<8x32xf32>
    %c1_410 = arith.constant 1 : index
    %c0_411 = arith.constant 0 : index
    %c0_412 = arith.constant 0 : index
    %556 = vector.load %arg49[%c1_410, %c0_411, %c0_412] : memref<2x1x32xf32, #tpu.memory_space<vmem>>, vector<1x1x32xf32>
    %557 = vector.shape_cast %556 : vector<1x1x32xf32> to vector<1x32xf32>
    %558 = vector.broadcast %557 : vector<1x32xf32> to vector<8x32xf32>
    %559 = arith.addf %555, %558 : vector<8x32xf32>
    %c1_413 = arith.constant 1 : index
    %c0_414 = arith.constant 0 : index
    %c0_415 = arith.constant 0 : index
    %560 = vector.load %arg38[%c1_413, %c0_414, %c0_415] : memref<2x1x32xf32, #tpu.memory_space<vmem>>, vector<1x1x32xf32>
    %561 = vector.shape_cast %560 : vector<1x1x32xf32> to vector<1x32xf32>
    %c1_416 = arith.constant 1 : index
    %c0_417 = arith.constant 0 : index
    %c0_418 = arith.constant 0 : index
    %562 = vector.load %arg39[%c1_416, %c0_417, %c0_418] : memref<2x1x32xf32, #tpu.memory_space<vmem>>, vector<1x1x32xf32>
    %563 = vector.shape_cast %562 : vector<1x1x32xf32> to vector<1x32xf32>
    %cst_419 = arith.constant dense<0.000000e+00> : vector<8xf32>
    %564 = vector.multi_reduction <add>, %559, %cst_419 [1] : vector<8x32xf32> to vector<8xf32>
    %565 = vector.shape_cast %564 : vector<8xf32> to vector<8x1xf32>
    %cst_420 = arith.constant 3.200000e+01 : f32
    %566 = vector.broadcast %cst_420 : f32 to vector<8x1xf32>
    %567 = arith.divf %565, %566 : vector<8x1xf32>
    %568 = vector.broadcast %567 : vector<8x1xf32> to vector<8x32xf32>
    %569 = arith.subf %559, %568 : vector<8x32xf32>
    %570 = arith.mulf %569, %569 : vector<8x32xf32>
    %cst_421 = arith.constant dense<0.000000e+00> : vector<8xf32>
    %571 = vector.multi_reduction <add>, %570, %cst_421 [1] : vector<8x32xf32> to vector<8xf32>
    %572 = vector.shape_cast %571 : vector<8xf32> to vector<8x1xf32>
    %cst_422 = arith.constant 3.200000e+01 : f32
    %573 = vector.broadcast %cst_422 : f32 to vector<8x1xf32>
    %574 = arith.divf %572, %573 : vector<8x1xf32>
    %cst_423 = arith.constant 9.99999974E-6 : f32
    %575 = vector.broadcast %cst_423 : f32 to vector<8x1xf32>
    %576 = arith.addf %574, %575 : vector<8x1xf32>
    %577 = math.rsqrt %576 : vector<8x1xf32>
    %578 = vector.broadcast %577 : vector<8x1xf32> to vector<8x32xf32>
    %579 = arith.mulf %569, %578 : vector<8x32xf32>
    %580 = vector.broadcast %561 : vector<1x32xf32> to vector<8x32xf32>
    %581 = arith.mulf %579, %580 : vector<8x32xf32>
    %582 = vector.broadcast %563 : vector<1x32xf32> to vector<8x32xf32>
    %583 = arith.addf %581, %582 : vector<8x32xf32>
    %c1_424 = arith.constant 1 : index
    %c0_425 = arith.constant 0 : index
    %c0_426 = arith.constant 0 : index
    %c0_427 = arith.constant 0 : index
    %584 = vector.load %arg50[%c1_424, %c0_425, %c0_426, %c0_427] : memref<2x2x32x16xf32, #tpu.memory_space<vmem>>, vector<1x1x32x16xf32>
    %585 = vector.shape_cast %584 : vector<1x1x32x16xf32> to vector<32x16xf32>
    %cst_428 = arith.constant dense<0.000000e+00> : vector<8x16xf32>
    %586 = tpu.matmul %583, %585, %cst_428 {dimension_numbers = #tpu.dot_dimension_numbers<[1], [0], [0], [1], [0, 0, 1, 1], [], []>} : vector<8x32xf32>, vector<32x16xf32>, vector<8x16xf32> -> vector<8x16xf32>
    %c1_429 = arith.constant 1 : index
    %c0_430 = arith.constant 0 : index
    %c0_431 = arith.constant 0 : index
    %c0_432 = arith.constant 0 : index
    %587 = vector.load %arg53[%c1_429, %c0_430, %c0_431, %c0_432] : memref<2x2x1x16xf32, #tpu.memory_space<vmem>>, vector<1x1x1x16xf32>
    %588 = vector.shape_cast %587 : vector<1x1x1x16xf32> to vector<1x16xf32>
    %589 = vector.broadcast %588 : vector<1x16xf32> to vector<8x16xf32>
    %590 = arith.addf %586, %589 : vector<8x16xf32>
    %c1_433 = arith.constant 1 : index
    %c0_434 = arith.constant 0 : index
    %c0_435 = arith.constant 0 : index
    %c0_436 = arith.constant 0 : index
    %591 = vector.load %arg51[%c1_433, %c0_434, %c0_435, %c0_436] : memref<2x2x32x16xf32, #tpu.memory_space<vmem>>, vector<1x1x32x16xf32>
    %592 = vector.shape_cast %591 : vector<1x1x32x16xf32> to vector<32x16xf32>
    %cst_437 = arith.constant dense<0.000000e+00> : vector<3x16xf32>
    %593 = tpu.matmul %174, %592, %cst_437 {dimension_numbers = #tpu.dot_dimension_numbers<[1], [0], [0], [1], [0, 0, 1, 1], [], []>} : vector<3x32xf32>, vector<32x16xf32>, vector<3x16xf32> -> vector<3x16xf32>
    %c1_438 = arith.constant 1 : index
    %c0_439 = arith.constant 0 : index
    %c0_440 = arith.constant 0 : index
    %c0_441 = arith.constant 0 : index
    %594 = vector.load %arg54[%c1_438, %c0_439, %c0_440, %c0_441] : memref<2x2x1x16xf32, #tpu.memory_space<vmem>>, vector<1x1x1x16xf32>
    %595 = vector.shape_cast %594 : vector<1x1x1x16xf32> to vector<1x16xf32>
    %596 = vector.broadcast %595 : vector<1x16xf32> to vector<3x16xf32>
    %597 = arith.addf %593, %596 : vector<3x16xf32>
    %c1_442 = arith.constant 1 : index
    %c0_443 = arith.constant 0 : index
    %c0_444 = arith.constant 0 : index
    %c0_445 = arith.constant 0 : index
    %598 = vector.load %arg52[%c1_442, %c0_443, %c0_444, %c0_445] : memref<2x2x32x16xf32, #tpu.memory_space<vmem>>, vector<1x1x32x16xf32>
    %599 = vector.shape_cast %598 : vector<1x1x32x16xf32> to vector<32x16xf32>
    %cst_446 = arith.constant dense<0.000000e+00> : vector<3x16xf32>
    %600 = tpu.matmul %174, %599, %cst_446 {dimension_numbers = #tpu.dot_dimension_numbers<[1], [0], [0], [1], [0, 0, 1, 1], [], []>} : vector<3x32xf32>, vector<32x16xf32>, vector<3x16xf32> -> vector<3x16xf32>
    %c1_447 = arith.constant 1 : index
    %c0_448 = arith.constant 0 : index
    %c0_449 = arith.constant 0 : index
    %c0_450 = arith.constant 0 : index
    %601 = vector.load %arg55[%c1_447, %c0_448, %c0_449, %c0_450] : memref<2x2x1x16xf32, #tpu.memory_space<vmem>>, vector<1x1x1x16xf32>
    %602 = vector.shape_cast %601 : vector<1x1x1x16xf32> to vector<1x16xf32>
    %603 = vector.broadcast %602 : vector<1x16xf32> to vector<3x16xf32>
    %604 = arith.addf %600, %603 : vector<3x16xf32>
    %cst_451 = arith.constant dense<0.000000e+00> : vector<8x3xf32>
    %605 = tpu.matmul %590, %597, %cst_451 {dimension_numbers = #tpu.dot_dimension_numbers<[1], [1], [0], [0], [0, 0, 1, 0], [], []>} : vector<8x16xf32>, vector<3x16xf32>, vector<8x3xf32> -> vector<8x3xf32>
    %cst_452 = arith.constant 2.500000e-01 : f32
    %606 = vector.broadcast %cst_452 : f32 to vector<8x3xf32>
    %607 = arith.mulf %605, %606 : vector<8x3xf32>
    %608 = arith.addf %607, %183 : vector<8x3xf32>
    %cst_453 = arith.constant dense<0xFF800000> : vector<8xf32>
    %609 = vector.multi_reduction <maximumf>, %608, %cst_453 [1] : vector<8x3xf32> to vector<8xf32>
    %610 = vector.shape_cast %609 : vector<8xf32> to vector<8x1xf32>
    %611 = vector.broadcast %610 : vector<8x1xf32> to vector<8x3xf32>
    %612 = arith.subf %608, %611 : vector<8x3xf32>
    %613 = math.exp %612 : vector<8x3xf32>
    %cst_454 = arith.constant dense<0.000000e+00> : vector<8xf32>
    %614 = vector.multi_reduction <add>, %613, %cst_454 [1] : vector<8x3xf32> to vector<8xf32>
    %615 = vector.shape_cast %614 : vector<8xf32> to vector<8x1xf32>
    %616 = tpu.reciprocal %615 {approx = true} : vector<8x1xf32> -> vector<8x1xf32>
    %617 = vector.broadcast %616 : vector<8x1xf32> to vector<8x3xf32>
    %618 = arith.mulf %613, %617 : vector<8x3xf32>
    %cst_455 = arith.constant dense<0.000000e+00> : vector<8x16xf32>
    %619 = tpu.matmul %618, %604, %cst_455 {dimension_numbers = #tpu.dot_dimension_numbers<[1], [0], [0], [1], [0, 0, 1, 1], [], []>} : vector<8x3xf32>, vector<3x16xf32>, vector<8x16xf32> -> vector<8x16xf32>
    %c1_456 = arith.constant 1 : index
    %c0_457 = arith.constant 0 : index
    %c0_458 = arith.constant 0 : index
    %c0_459 = arith.constant 0 : index
    %620 = vector.load %arg56[%c1_456, %c0_457, %c0_458, %c0_459] : memref<2x2x16x32xf32, #tpu.memory_space<vmem>>, vector<1x1x16x32xf32>
    %621 = vector.shape_cast %620 : vector<1x1x16x32xf32> to vector<16x32xf32>
    %cst_460 = arith.constant dense<0.000000e+00> : vector<8x32xf32>
    %622 = tpu.matmul %619, %621, %cst_460 {dimension_numbers = #tpu.dot_dimension_numbers<[1], [0], [0], [1], [0, 0, 1, 1], [], []>} : vector<8x16xf32>, vector<16x32xf32>, vector<8x32xf32> -> vector<8x32xf32>
    %c1_461 = arith.constant 1 : index
    %c1_462 = arith.constant 1 : index
    %c0_463 = arith.constant 0 : index
    %c0_464 = arith.constant 0 : index
    %623 = vector.load %arg50[%c1_461, %c1_462, %c0_463, %c0_464] : memref<2x2x32x16xf32, #tpu.memory_space<vmem>>, vector<1x1x32x16xf32>
    %624 = vector.shape_cast %623 : vector<1x1x32x16xf32> to vector<32x16xf32>
    %cst_465 = arith.constant dense<0.000000e+00> : vector<8x16xf32>
    %625 = tpu.matmul %583, %624, %cst_465 {dimension_numbers = #tpu.dot_dimension_numbers<[1], [0], [0], [1], [0, 0, 1, 1], [], []>} : vector<8x32xf32>, vector<32x16xf32>, vector<8x16xf32> -> vector<8x16xf32>
    %c1_466 = arith.constant 1 : index
    %c1_467 = arith.constant 1 : index
    %c0_468 = arith.constant 0 : index
    %c0_469 = arith.constant 0 : index
    %626 = vector.load %arg53[%c1_466, %c1_467, %c0_468, %c0_469] : memref<2x2x1x16xf32, #tpu.memory_space<vmem>>, vector<1x1x1x16xf32>
    %627 = vector.shape_cast %626 : vector<1x1x1x16xf32> to vector<1x16xf32>
    %628 = vector.broadcast %627 : vector<1x16xf32> to vector<8x16xf32>
    %629 = arith.addf %625, %628 : vector<8x16xf32>
    %c1_470 = arith.constant 1 : index
    %c1_471 = arith.constant 1 : index
    %c0_472 = arith.constant 0 : index
    %c0_473 = arith.constant 0 : index
    %630 = vector.load %arg51[%c1_470, %c1_471, %c0_472, %c0_473] : memref<2x2x32x16xf32, #tpu.memory_space<vmem>>, vector<1x1x32x16xf32>
    %631 = vector.shape_cast %630 : vector<1x1x32x16xf32> to vector<32x16xf32>
    %cst_474 = arith.constant dense<0.000000e+00> : vector<3x16xf32>
    %632 = tpu.matmul %174, %631, %cst_474 {dimension_numbers = #tpu.dot_dimension_numbers<[1], [0], [0], [1], [0, 0, 1, 1], [], []>} : vector<3x32xf32>, vector<32x16xf32>, vector<3x16xf32> -> vector<3x16xf32>
    %c1_475 = arith.constant 1 : index
    %c1_476 = arith.constant 1 : index
    %c0_477 = arith.constant 0 : index
    %c0_478 = arith.constant 0 : index
    %633 = vector.load %arg54[%c1_475, %c1_476, %c0_477, %c0_478] : memref<2x2x1x16xf32, #tpu.memory_space<vmem>>, vector<1x1x1x16xf32>
    %634 = vector.shape_cast %633 : vector<1x1x1x16xf32> to vector<1x16xf32>
    %635 = vector.broadcast %634 : vector<1x16xf32> to vector<3x16xf32>
    %636 = arith.addf %632, %635 : vector<3x16xf32>
    %c1_479 = arith.constant 1 : index
    %c1_480 = arith.constant 1 : index
    %c0_481 = arith.constant 0 : index
    %c0_482 = arith.constant 0 : index
    %637 = vector.load %arg52[%c1_479, %c1_480, %c0_481, %c0_482] : memref<2x2x32x16xf32, #tpu.memory_space<vmem>>, vector<1x1x32x16xf32>
    %638 = vector.shape_cast %637 : vector<1x1x32x16xf32> to vector<32x16xf32>
    %cst_483 = arith.constant dense<0.000000e+00> : vector<3x16xf32>
    %639 = tpu.matmul %174, %638, %cst_483 {dimension_numbers = #tpu.dot_dimension_numbers<[1], [0], [0], [1], [0, 0, 1, 1], [], []>} : vector<3x32xf32>, vector<32x16xf32>, vector<3x16xf32> -> vector<3x16xf32>
    %c1_484 = arith.constant 1 : index
    %c1_485 = arith.constant 1 : index
    %c0_486 = arith.constant 0 : index
    %c0_487 = arith.constant 0 : index
    %640 = vector.load %arg55[%c1_484, %c1_485, %c0_486, %c0_487] : memref<2x2x1x16xf32, #tpu.memory_space<vmem>>, vector<1x1x1x16xf32>
    %641 = vector.shape_cast %640 : vector<1x1x1x16xf32> to vector<1x16xf32>
    %642 = vector.broadcast %641 : vector<1x16xf32> to vector<3x16xf32>
    %643 = arith.addf %639, %642 : vector<3x16xf32>
    %cst_488 = arith.constant dense<0.000000e+00> : vector<8x3xf32>
    %644 = tpu.matmul %629, %636, %cst_488 {dimension_numbers = #tpu.dot_dimension_numbers<[1], [1], [0], [0], [0, 0, 1, 0], [], []>} : vector<8x16xf32>, vector<3x16xf32>, vector<8x3xf32> -> vector<8x3xf32>
    %cst_489 = arith.constant 2.500000e-01 : f32
    %645 = vector.broadcast %cst_489 : f32 to vector<8x3xf32>
    %646 = arith.mulf %644, %645 : vector<8x3xf32>
    %647 = arith.addf %646, %183 : vector<8x3xf32>
    %cst_490 = arith.constant dense<0xFF800000> : vector<8xf32>
    %648 = vector.multi_reduction <maximumf>, %647, %cst_490 [1] : vector<8x3xf32> to vector<8xf32>
    %649 = vector.shape_cast %648 : vector<8xf32> to vector<8x1xf32>
    %650 = vector.broadcast %649 : vector<8x1xf32> to vector<8x3xf32>
    %651 = arith.subf %647, %650 : vector<8x3xf32>
    %652 = math.exp %651 : vector<8x3xf32>
    %cst_491 = arith.constant dense<0.000000e+00> : vector<8xf32>
    %653 = vector.multi_reduction <add>, %652, %cst_491 [1] : vector<8x3xf32> to vector<8xf32>
    %654 = vector.shape_cast %653 : vector<8xf32> to vector<8x1xf32>
    %655 = tpu.reciprocal %654 {approx = true} : vector<8x1xf32> -> vector<8x1xf32>
    %656 = vector.broadcast %655 : vector<8x1xf32> to vector<8x3xf32>
    %657 = arith.mulf %652, %656 : vector<8x3xf32>
    %cst_492 = arith.constant dense<0.000000e+00> : vector<8x16xf32>
    %658 = tpu.matmul %657, %643, %cst_492 {dimension_numbers = #tpu.dot_dimension_numbers<[1], [0], [0], [1], [0, 0, 1, 1], [], []>} : vector<8x3xf32>, vector<3x16xf32>, vector<8x16xf32> -> vector<8x16xf32>
    %c1_493 = arith.constant 1 : index
    %c1_494 = arith.constant 1 : index
    %c0_495 = arith.constant 0 : index
    %c0_496 = arith.constant 0 : index
    %659 = vector.load %arg56[%c1_493, %c1_494, %c0_495, %c0_496] : memref<2x2x16x32xf32, #tpu.memory_space<vmem>>, vector<1x1x16x32xf32>
    %660 = vector.shape_cast %659 : vector<1x1x16x32xf32> to vector<16x32xf32>
    %cst_497 = arith.constant dense<0.000000e+00> : vector<8x32xf32>
    %661 = tpu.matmul %658, %660, %cst_497 {dimension_numbers = #tpu.dot_dimension_numbers<[1], [0], [0], [1], [0, 0, 1, 1], [], []>} : vector<8x16xf32>, vector<16x32xf32>, vector<8x32xf32> -> vector<8x32xf32>
    %662 = arith.addf %622, %661 : vector<8x32xf32>
    %663 = arith.addf %559, %662 : vector<8x32xf32>
    %c1_498 = arith.constant 1 : index
    %c0_499 = arith.constant 0 : index
    %c0_500 = arith.constant 0 : index
    %664 = vector.load %arg57[%c1_498, %c0_499, %c0_500] : memref<2x1x32xf32, #tpu.memory_space<vmem>>, vector<1x1x32xf32>
    %665 = vector.shape_cast %664 : vector<1x1x32xf32> to vector<1x32xf32>
    %666 = vector.broadcast %665 : vector<1x32xf32> to vector<8x32xf32>
    %667 = arith.addf %663, %666 : vector<8x32xf32>
    %c1_501 = arith.constant 1 : index
    %c0_502 = arith.constant 0 : index
    %c0_503 = arith.constant 0 : index
    %668 = vector.load %arg40[%c1_501, %c0_502, %c0_503] : memref<2x1x32xf32, #tpu.memory_space<vmem>>, vector<1x1x32xf32>
    %669 = vector.shape_cast %668 : vector<1x1x32xf32> to vector<1x32xf32>
    %c1_504 = arith.constant 1 : index
    %c0_505 = arith.constant 0 : index
    %c0_506 = arith.constant 0 : index
    %670 = vector.load %arg41[%c1_504, %c0_505, %c0_506] : memref<2x1x32xf32, #tpu.memory_space<vmem>>, vector<1x1x32xf32>
    %671 = vector.shape_cast %670 : vector<1x1x32xf32> to vector<1x32xf32>
    %cst_507 = arith.constant dense<0.000000e+00> : vector<8xf32>
    %672 = vector.multi_reduction <add>, %667, %cst_507 [1] : vector<8x32xf32> to vector<8xf32>
    %673 = vector.shape_cast %672 : vector<8xf32> to vector<8x1xf32>
    %cst_508 = arith.constant 3.200000e+01 : f32
    %674 = vector.broadcast %cst_508 : f32 to vector<8x1xf32>
    %675 = arith.divf %673, %674 : vector<8x1xf32>
    %676 = vector.broadcast %675 : vector<8x1xf32> to vector<8x32xf32>
    %677 = arith.subf %667, %676 : vector<8x32xf32>
    %678 = arith.mulf %677, %677 : vector<8x32xf32>
    %cst_509 = arith.constant dense<0.000000e+00> : vector<8xf32>
    %679 = vector.multi_reduction <add>, %678, %cst_509 [1] : vector<8x32xf32> to vector<8xf32>
    %680 = vector.shape_cast %679 : vector<8xf32> to vector<8x1xf32>
    %cst_510 = arith.constant 3.200000e+01 : f32
    %681 = vector.broadcast %cst_510 : f32 to vector<8x1xf32>
    %682 = arith.divf %680, %681 : vector<8x1xf32>
    %cst_511 = arith.constant 9.99999974E-6 : f32
    %683 = vector.broadcast %cst_511 : f32 to vector<8x1xf32>
    %684 = arith.addf %682, %683 : vector<8x1xf32>
    %685 = math.rsqrt %684 : vector<8x1xf32>
    %686 = vector.broadcast %685 : vector<8x1xf32> to vector<8x32xf32>
    %687 = arith.mulf %677, %686 : vector<8x32xf32>
    %688 = vector.broadcast %669 : vector<1x32xf32> to vector<8x32xf32>
    %689 = arith.mulf %687, %688 : vector<8x32xf32>
    %690 = vector.broadcast %671 : vector<1x32xf32> to vector<8x32xf32>
    %691 = arith.addf %689, %690 : vector<8x32xf32>
    %c1_512 = arith.constant 1 : index
    %c0_513 = arith.constant 0 : index
    %c0_514 = arith.constant 0 : index
    %692 = vector.load %arg58[%c1_512, %c0_513, %c0_514] : memref<2x32x128xf32, #tpu.memory_space<vmem>>, vector<1x32x128xf32>
    %693 = vector.shape_cast %692 : vector<1x32x128xf32> to vector<32x128xf32>
    %cst_515 = arith.constant dense<0.000000e+00> : vector<8x128xf32>
    %694 = tpu.matmul %691, %693, %cst_515 {dimension_numbers = #tpu.dot_dimension_numbers<[1], [0], [0], [1], [0, 0, 1, 1], [], []>} : vector<8x32xf32>, vector<32x128xf32>, vector<8x128xf32> -> vector<8x128xf32>
    %c1_516 = arith.constant 1 : index
    %c0_517 = arith.constant 0 : index
    %c0_518 = arith.constant 0 : index
    %695 = vector.load %arg59[%c1_516, %c0_517, %c0_518] : memref<2x1x128xf32, #tpu.memory_space<vmem>>, vector<1x1x128xf32>
    %696 = vector.shape_cast %695 : vector<1x1x128xf32> to vector<1x128xf32>
    %697 = vector.broadcast %696 : vector<1x128xf32> to vector<8x128xf32>
    %698 = arith.addf %694, %697 : vector<8x128xf32>
    %cst_519 = arith.constant 5.000000e-01 : f32
    %699 = vector.broadcast %cst_519 : f32 to vector<8x128xf32>
    %700 = arith.mulf %699, %698 : vector<8x128xf32>
    %cst_520 = arith.constant 4.471500e-02 : f32
    %701 = vector.broadcast %cst_520 : f32 to vector<8x128xf32>
    %702 = arith.mulf %701, %698 : vector<8x128xf32>
    %703 = arith.mulf %702, %698 : vector<8x128xf32>
    %704 = arith.mulf %703, %698 : vector<8x128xf32>
    %705 = arith.addf %698, %704 : vector<8x128xf32>
    %cst_521 = arith.constant 0.797884583 : f32
    %706 = vector.broadcast %cst_521 : f32 to vector<8x128xf32>
    %707 = arith.mulf %706, %705 : vector<8x128xf32>
    %708 = math.tanh %707 : vector<8x128xf32>
    %cst_522 = arith.constant 1.000000e+00 : f32
    %709 = vector.broadcast %cst_522 : f32 to vector<8x128xf32>
    %710 = arith.addf %709, %708 : vector<8x128xf32>
    %711 = arith.mulf %700, %710 : vector<8x128xf32>
    %c1_523 = arith.constant 1 : index
    %c0_524 = arith.constant 0 : index
    %c0_525 = arith.constant 0 : index
    %712 = vector.load %arg60[%c1_523, %c0_524, %c0_525] : memref<2x128x32xf32, #tpu.memory_space<vmem>>, vector<1x128x32xf32>
    %713 = vector.shape_cast %712 : vector<1x128x32xf32> to vector<128x32xf32>
    %cst_526 = arith.constant dense<0.000000e+00> : vector<8x32xf32>
    %714 = tpu.matmul %711, %713, %cst_526 {dimension_numbers = #tpu.dot_dimension_numbers<[1], [0], [0], [1], [0, 0, 1, 1], [], []>} : vector<8x128xf32>, vector<128x32xf32>, vector<8x32xf32> -> vector<8x32xf32>
    %715 = arith.addf %667, %714 : vector<8x32xf32>
    %c1_527 = arith.constant 1 : index
    %c0_528 = arith.constant 0 : index
    %c0_529 = arith.constant 0 : index
    %716 = vector.load %arg61[%c1_527, %c0_528, %c0_529] : memref<2x1x32xf32, #tpu.memory_space<vmem>>, vector<1x1x32xf32>
    %717 = vector.shape_cast %716 : vector<1x1x32xf32> to vector<1x32xf32>
    %718 = vector.broadcast %717 : vector<1x32xf32> to vector<8x32xf32>
    %719 = arith.addf %715, %718 : vector<8x32xf32>
    %c0_530 = arith.constant 0 : index
    %c0_531 = arith.constant 0 : index
    %720 = vector.load %arg62[%c0_530, %c0_531] : memref<1x32xf32, #tpu.memory_space<vmem>>, vector<1x32xf32>
    %c0_532 = arith.constant 0 : index
    %c0_533 = arith.constant 0 : index
    %721 = vector.load %arg63[%c0_532, %c0_533] : memref<1x32xf32, #tpu.memory_space<vmem>>, vector<1x32xf32>
    %cst_534 = arith.constant dense<0.000000e+00> : vector<8xf32>
    %722 = vector.multi_reduction <add>, %719, %cst_534 [1] : vector<8x32xf32> to vector<8xf32>
    %723 = vector.shape_cast %722 : vector<8xf32> to vector<8x1xf32>
    %cst_535 = arith.constant 3.200000e+01 : f32
    %724 = vector.broadcast %cst_535 : f32 to vector<8x1xf32>
    %725 = arith.divf %723, %724 : vector<8x1xf32>
    %726 = vector.broadcast %725 : vector<8x1xf32> to vector<8x32xf32>
    %727 = arith.subf %719, %726 : vector<8x32xf32>
    %728 = arith.mulf %727, %727 : vector<8x32xf32>
    %cst_536 = arith.constant dense<0.000000e+00> : vector<8xf32>
    %729 = vector.multi_reduction <add>, %728, %cst_536 [1] : vector<8x32xf32> to vector<8xf32>
    %730 = vector.shape_cast %729 : vector<8xf32> to vector<8x1xf32>
    %cst_537 = arith.constant 3.200000e+01 : f32
    %731 = vector.broadcast %cst_537 : f32 to vector<8x1xf32>
    %732 = arith.divf %730, %731 : vector<8x1xf32>
    %cst_538 = arith.constant 9.99999974E-6 : f32
    %733 = vector.broadcast %cst_538 : f32 to vector<8x1xf32>
    %734 = arith.addf %732, %733 : vector<8x1xf32>
    %735 = math.rsqrt %734 : vector<8x1xf32>
    %736 = vector.broadcast %735 : vector<8x1xf32> to vector<8x32xf32>
    %737 = arith.mulf %727, %736 : vector<8x32xf32>
    %738 = vector.broadcast %720 : vector<1x32xf32> to vector<8x32xf32>
    %739 = arith.mulf %737, %738 : vector<8x32xf32>
    %740 = vector.broadcast %721 : vector<1x32xf32> to vector<8x32xf32>
    %741 = arith.addf %739, %740 : vector<8x32xf32>
    %c0_539 = arith.constant 0 : index
    %c0_540 = arith.constant 0 : index
    %742 = vector.load %arg64[%c0_539, %c0_540] : memref<32x4xf32, #tpu.memory_space<vmem>>, vector<32x4xf32>
    %cst_541 = arith.constant dense<0.000000e+00> : vector<8x4xf32>
    %743 = tpu.matmul %741, %742, %cst_541 {dimension_numbers = #tpu.dot_dimension_numbers<[1], [0], [0], [1], [0, 0, 1, 1], [], []>} : vector<8x32xf32>, vector<32x4xf32>, vector<8x4xf32> -> vector<8x4xf32>
    %c0_542 = arith.constant 0 : index
    %c0_543 = arith.constant 0 : index
    %744 = vector.load %arg65[%c0_542, %c0_543] : memref<1x4xf32, #tpu.memory_space<vmem>>, vector<1x4xf32>
    %745 = vector.broadcast %744 : vector<1x4xf32> to vector<8x4xf32>
    %746 = arith.addf %743, %745 : vector<8x4xf32>
    %747 = arith.subf %746, %136 : vector<8x4xf32>
    %748 = arith.mulf %747, %747 : vector<8x4xf32>
    %cst_544 = arith.constant dense<0.000000e+00> : vector<8xf32>
    %749 = vector.multi_reduction <add>, %748, %cst_544 [1] : vector<8x4xf32> to vector<8xf32>
    %750 = vector.shape_cast %749 : vector<8xf32> to vector<8x1xf32>
    %cst_545 = arith.constant dense<0.000000e+00> : vector<1xf32>
    %751 = vector.multi_reduction <add>, %750, %cst_545 [0] : vector<8x1xf32> to vector<1xf32>
    %752 = vector.shape_cast %751 : vector<1xf32> to vector<1x1xf32>
    %c0_546 = arith.constant 0 : index
    %c0_547 = arith.constant 0 : index
    %c0_548 = arith.constant 0 : index
    %753 = vector.load %arg68[%c0_546, %c0_547, %c0_548] : memref<1x1x1xf32, #tpu.memory_space<vmem>>, vector<1x1x1xf32>
    %754 = vector.shape_cast %753 : vector<1x1x1xf32> to vector<1x1xf32>
    %755 = vector.shape_cast %752 : vector<1x1xf32> to vector<1x1x1xf32>
    tpu.vector_store %arg68[%c0_546, %c0_547, %c0_548], %755 {strides = array<i32>} : memref<1x1x1xf32, #tpu.memory_space<vmem>>, vector<1x1x1xf32>,
    return
  }
  func.func @transform_0(%arg0: i32) -> (i32, i32, i32) {
    %c0_i32 = arith.constant 0 : i32
    %c0_i32_0 = arith.constant 0 : i32
    %c0_i32_1 = arith.constant 0 : i32
    return %arg0, %c0_i32, %c0_i32_0 : i32, i32, i32
  }
  func.func @transform_1(%arg0: i32) -> (i32, i32, i32) {
    %c0_i32 = arith.constant 0 : i32
    %c0_i32_0 = arith.constant 0 : i32
    %c0_i32_1 = arith.constant 0 : i32
    return %arg0, %c0_i32, %c0_i32_0 : i32, i32, i32
  }
  func.func @transform_2(%arg0: i32) -> (i32, i32, i32) {
    %c0_i32 = arith.constant 0 : i32
    %c0_i32_0 = arith.constant 0 : i32
    %c0_i32_1 = arith.constant 0 : i32
    return %arg0, %c0_i32, %c0_i32_0 : i32, i32, i32
  }
  func.func @transform_3(%arg0: i32) -> i32 {
    %c0_i32 = arith.constant 0 : i32
    %c0_i32_0 = arith.constant 0 : i32
    return %c0_i32 : i32
  }
  func.func @transform_4(%arg0: i32) -> i32 {
    %c0_i32 = arith.constant 0 : i32
    %c0_i32_0 = arith.constant 0 : i32
    return %c0_i32 : i32
  }
  func.func @transform_5(%arg0: i32) -> i32 {
    %c0_i32 = arith.constant 0 : i32
    %c0_i32_0 = arith.constant 0 : i32
    return %c0_i32 : i32
  }
  func.func @transform_6(%arg0: i32) -> (i32, i32) {
    %c0_i32 = arith.constant 0 : i32
    %c0_i32_0 = arith.constant 0 : i32
    %c0_i32_1 = arith.constant 0 : i32
    return %c0_i32, %c0_i32_0 : i32, i32
  }
  func.func @transform_7(%arg0: i32) -> (i32, i32) {
    %c0_i32 = arith.constant 0 : i32
    %c0_i32_0 = arith.constant 0 : i32
    %c0_i32_1 = arith.constant 0 : i32
    return %c0_i32, %c0_i32_0 : i32, i32
  }
  func.func @transform_8(%arg0: i32) -> (i32, i32) {
    %c0_i32 = arith.constant 0 : i32
    %c0_i32_0 = arith.constant 0 : i32
    %c0_i32_1 = arith.constant 0 : i32
    return %c0_i32, %c0_i32_0 : i32, i32
  }
  func.func @transform_9(%arg0: i32) -> (i32, i32) {
    %c0_i32 = arith.constant 0 : i32
    %c0_i32_0 = arith.constant 0 : i32
    %c0_i32_1 = arith.constant 0 : i32
    return %c0_i32, %c0_i32_0 : i32, i32
  }
  func.func @transform_10(%arg0: i32) -> (i32, i32) {
    %c0_i32 = arith.constant 0 : i32
    %c0_i32_0 = arith.constant 0 : i32
    %c0_i32_1 = arith.constant 0 : i32
    return %c0_i32, %c0_i32_0 : i32, i32
  }
  func.func @transform_11(%arg0: i32) -> (i32, i32) {
    %c0_i32 = arith.constant 0 : i32
    %c0_i32_0 = arith.constant 0 : i32
    %c0_i32_1 = arith.constant 0 : i32
    return %c0_i32, %c0_i32_0 : i32, i32
  }
  func.func @transform_12(%arg0: i32) -> (i32, i32) {
    %c0_i32 = arith.constant 0 : i32
    %c0_i32_0 = arith.constant 0 : i32
    %c0_i32_1 = arith.constant 0 : i32
    return %c0_i32, %c0_i32_0 : i32, i32
  }
  func.func @transform_13(%arg0: i32) -> (i32, i32) {
    %c0_i32 = arith.constant 0 : i32
    %c0_i32_0 = arith.constant 0 : i32
    %c0_i32_1 = arith.constant 0 : i32
    return %c0_i32, %c0_i32_0 : i32, i32
  }
  func.func @transform_14(%arg0: i32) -> (i32, i32) {
    %c0_i32 = arith.constant 0 : i32
    %c0_i32_0 = arith.constant 0 : i32
    %c0_i32_1 = arith.constant 0 : i32
    return %c0_i32, %c0_i32_0 : i32, i32
  }
  func.func @transform_15(%arg0: i32) -> (i32, i32) {
    %c0_i32 = arith.constant 0 : i32
    %c0_i32_0 = arith.constant 0 : i32
    %c0_i32_1 = arith.constant 0 : i32
    return %c0_i32, %c0_i32_0 : i32, i32
  }
  func.func @transform_16(%arg0: i32) -> (i32, i32) {
    %c0_i32 = arith.constant 0 : i32
    %c0_i32_0 = arith.constant 0 : i32
    %c0_i32_1 = arith.constant 0 : i32
    return %c0_i32, %c0_i32_0 : i32, i32
  }
  func.func @transform_17(%arg0: i32) -> (i32, i32) {
    %c0_i32 = arith.constant 0 : i32
    %c0_i32_0 = arith.constant 0 : i32
    %c0_i32_1 = arith.constant 0 : i32
    return %c0_i32, %c0_i32_0 : i32, i32
  }
  func.func @transform_18(%arg0: i32) -> (i32, i32) {
    %c0_i32 = arith.constant 0 : i32
    %c0_i32_0 = arith.constant 0 : i32
    %c0_i32_1 = arith.constant 0 : i32
    return %c0_i32, %c0_i32_0 : i32, i32
  }
  func.func @transform_19(%arg0: i32) -> (i32, i32) {
    %c0_i32 = arith.constant 0 : i32
    %c0_i32_0 = arith.constant 0 : i32
    %c0_i32_1 = arith.constant 0 : i32
    return %c0_i32, %c0_i32_0 : i32, i32
  }
  func.func @transform_20(%arg0: i32) -> (i32, i32) {
    %c0_i32 = arith.constant 0 : i32
    %c0_i32_0 = arith.constant 0 : i32
    %c0_i32_1 = arith.constant 0 : i32
    return %c0_i32, %c0_i32_0 : i32, i32
  }
  func.func @transform_21(%arg0: i32) -> (i32, i32) {
    %c0_i32 = arith.constant 0 : i32
    %c0_i32_0 = arith.constant 0 : i32
    %c0_i32_1 = arith.constant 0 : i32
    return %c0_i32, %c0_i32_0 : i32, i32
  }
  func.func @transform_22(%arg0: i32) -> (i32, i32) {
    %c0_i32 = arith.constant 0 : i32
    %c0_i32_0 = arith.constant 0 : i32
    %c0_i32_1 = arith.constant 0 : i32
    return %c0_i32, %c0_i32_0 : i32, i32
  }
  func.func @transform_23(%arg0: i32) -> (i32, i32) {
    %c0_i32 = arith.constant 0 : i32
    %c0_i32_0 = arith.constant 0 : i32
    %c0_i32_1 = arith.constant 0 : i32
    return %c0_i32, %c0_i32_0 : i32, i32
  }
  func.func @transform_24(%arg0: i32) -> (i32, i32, i32) {
    %c0_i32 = arith.constant 0 : i32
    %c0_i32_0 = arith.constant 0 : i32
    %c0_i32_1 = arith.constant 0 : i32
    %c0_i32_2 = arith.constant 0 : i32
    return %c0_i32, %c0_i32_0, %c0_i32_1 : i32, i32, i32
  }
  func.func @transform_25(%arg0: i32) -> (i32, i32) {
    %c0_i32 = arith.constant 0 : i32
    %c0_i32_0 = arith.constant 0 : i32
    %c0_i32_1 = arith.constant 0 : i32
    return %c0_i32, %c0_i32_0 : i32, i32
  }
  func.func @transform_26(%arg0: i32) -> (i32, i32) {
    %c0_i32 = arith.constant 0 : i32
    %c0_i32_0 = arith.constant 0 : i32
    %c0_i32_1 = arith.constant 0 : i32
    return %c0_i32, %c0_i32_0 : i32, i32
  }
  func.func @transform_27(%arg0: i32) -> (i32, i32) {
    %c0_i32 = arith.constant 0 : i32
    %c0_i32_0 = arith.constant 0 : i32
    %c0_i32_1 = arith.constant 0 : i32
    return %c0_i32, %c0_i32_0 : i32, i32
  }
  func.func @transform_28(%arg0: i32) -> (i32, i32) {
    %c0_i32 = arith.constant 0 : i32
    %c0_i32_0 = arith.constant 0 : i32
    %c0_i32_1 = arith.constant 0 : i32
    return %c0_i32, %c0_i32_0 : i32, i32
  }
  func.func @transform_29(%arg0: i32) -> (i32, i32) {
    %c0_i32 = arith.constant 0 : i32
    %c0_i32_0 = arith.constant 0 : i32
    %c0_i32_1 = arith.constant 0 : i32
    return %c0_i32, %c0_i32_0 : i32, i32
  }
  func.func @transform_30(%arg0: i32) -> (i32, i32) {
    %c0_i32 = arith.constant 0 : i32
    %c0_i32_0 = arith.constant 0 : i32
    %c0_i32_1 = arith.constant 0 : i32
    return %c0_i32, %c0_i32_0 : i32, i32
  }
  func.func @transform_31(%arg0: i32) -> (i32, i32) {
    %c0_i32 = arith.constant 0 : i32
    %c0_i32_0 = arith.constant 0 : i32
    %c0_i32_1 = arith.constant 0 : i32
    return %c0_i32, %c0_i32_0 : i32, i32
  }
  func.func @transform_32(%arg0: i32) -> (i32, i32) {
    %c0_i32 = arith.constant 0 : i32
    %c0_i32_0 = arith.constant 0 : i32
    %c0_i32_1 = arith.constant 0 : i32
    return %c0_i32, %c0_i32_0 : i32, i32
  }
  func.func @transform_33(%arg0: i32) -> (i32, i32) {
    %c0_i32 = arith.constant 0 : i32
    %c0_i32_0 = arith.constant 0 : i32
    %c0_i32_1 = arith.constant 0 : i32
    return %c0_i32, %c0_i32_0 : i32, i32
  }
  func.func @transform_34(%arg0: i32) -> (i32, i32) {
    %c0_i32 = arith.constant 0 : i32
    %c0_i32_0 = arith.constant 0 : i32
    %c0_i32_1 = arith.constant 0 : i32
    return %c0_i32, %c0_i32_0 : i32, i32
  }
  func.func @transform_35(%arg0: i32) -> (i32, i32, i32) {
    %c0_i32 = arith.constant 0 : i32
    %c0_i32_0 = arith.constant 0 : i32
    %c0_i32_1 = arith.constant 0 : i32
    %c0_i32_2 = arith.constant 0 : i32
    return %c0_i32, %c0_i32_0, %c0_i32_1 : i32, i32, i32
  }
  func.func @transform_36(%arg0: i32) -> (i32, i32, i32) {
    %c0_i32 = arith.constant 0 : i32
    %c0_i32_0 = arith.constant 0 : i32
    %c0_i32_1 = arith.constant 0 : i32
    %c0_i32_2 = arith.constant 0 : i32
    return %c0_i32, %c0_i32_0, %c0_i32_1 : i32, i32, i32
  }
  func.func @transform_37(%arg0: i32) -> (i32, i32, i32) {
    %c0_i32 = arith.constant 0 : i32
    %c0_i32_0 = arith.constant 0 : i32
    %c0_i32_1 = arith.constant 0 : i32
    %c0_i32_2 = arith.constant 0 : i32
    return %c0_i32, %c0_i32_0, %c0_i32_1 : i32, i32, i32
  }
  func.func @transform_38(%arg0: i32) -> (i32, i32, i32) {
    %c0_i32 = arith.constant 0 : i32
    %c0_i32_0 = arith.constant 0 : i32
    %c0_i32_1 = arith.constant 0 : i32
    %c0_i32_2 = arith.constant 0 : i32
    return %c0_i32, %c0_i32_0, %c0_i32_1 : i32, i32, i32
  }
  func.func @transform_39(%arg0: i32) -> (i32, i32, i32) {
    %c0_i32 = arith.constant 0 : i32
    %c0_i32_0 = arith.constant 0 : i32
    %c0_i32_1 = arith.constant 0 : i32
    %c0_i32_2 = arith.constant 0 : i32
    return %c0_i32, %c0_i32_0, %c0_i32_1 : i32, i32, i32
  }
  func.func @transform_40(%arg0: i32) -> (i32, i32, i32) {
    %c0_i32 = arith.constant 0 : i32
    %c0_i32_0 = arith.constant 0 : i32
    %c0_i32_1 = arith.constant 0 : i32
    %c0_i32_2 = arith.constant 0 : i32
    return %c0_i32, %c0_i32_0, %c0_i32_1 : i32, i32, i32
  }
  func.func @transform_41(%arg0: i32) -> (i32, i32, i32, i32) {
    %c0_i32 = arith.constant 0 : i32
    %c0_i32_0 = arith.constant 0 : i32
    %c0_i32_1 = arith.constant 0 : i32
    %c0_i32_2 = arith.constant 0 : i32
    %c0_i32_3 = arith.constant 0 : i32
    return %c0_i32, %c0_i32_0, %c0_i32_1, %c0_i32_2 : i32, i32, i32, i32
  }
  func.func @transform_42(%arg0: i32) -> (i32, i32, i32, i32) {
    %c0_i32 = arith.constant 0 : i32
    %c0_i32_0 = arith.constant 0 : i32
    %c0_i32_1 = arith.constant 0 : i32
    %c0_i32_2 = arith.constant 0 : i32
    %c0_i32_3 = arith.constant 0 : i32
    return %c0_i32, %c0_i32_0, %c0_i32_1, %c0_i32_2 : i32, i32, i32, i32
  }
  func.func @transform_43(%arg0: i32) -> (i32, i32, i32, i32) {
    %c0_i32 = arith.constant 0 : i32
    %c0_i32_0 = arith.constant 0 : i32
    %c0_i32_1 = arith.constant 0 : i32
    %c0_i32_2 = arith.constant 0 : i32
    %c0_i32_3 = arith.constant 0 : i32
    return %c0_i32, %c0_i32_0, %c0_i32_1, %c0_i32_2 : i32, i32, i32, i32
  }
  func.func @transform_44(%arg0: i32) -> (i32, i32, i32, i32) {
    %c0_i32 = arith.constant 0 : i32
    %c0_i32_0 = arith.constant 0 : i32
    %c0_i32_1 = arith.constant 0 : i32
    %c0_i32_2 = arith.constant 0 : i32
    %c0_i32_3 = arith.constant 0 : i32
    return %c0_i32, %c0_i32_0, %c0_i32_1, %c0_i32_2 : i32, i32, i32, i32
  }
  func.func @transform_45(%arg0: i32) -> (i32, i32, i32, i32) {
    %c0_i32 = arith.constant 0 : i32
    %c0_i32_0 = arith.constant 0 : i32
    %c0_i32_1 = arith.constant 0 : i32
    %c0_i32_2 = arith.constant 0 : i32
    %c0_i32_3 = arith.constant 0 : i32
    return %c0_i32, %c0_i32_0, %c0_i32_1, %c0_i32_2 : i32, i32, i32, i32
  }
  func.func @transform_46(%arg0: i32) -> (i32, i32, i32, i32) {
    %c0_i32 = arith.constant 0 : i32
    %c0_i32_0 = arith.constant 0 : i32
    %c0_i32_1 = arith.constant 0 : i32
    %c0_i32_2 = arith.constant 0 : i32
    %c0_i32_3 = arith.constant 0 : i32
    return %c0_i32, %c0_i32_0, %c0_i32_1, %c0_i32_2 : i32, i32, i32, i32
  }
  func.func @transform_47(%arg0: i32) -> (i32, i32, i32, i32) {
    %c0_i32 = arith.constant 0 : i32
    %c0_i32_0 = arith.constant 0 : i32
    %c0_i32_1 = arith.constant 0 : i32
    %c0_i32_2 = arith.constant 0 : i32
    %c0_i32_3 = arith.constant 0 : i32
    return %c0_i32, %c0_i32_0, %c0_i32_1, %c0_i32_2 : i32, i32, i32, i32
  }
  func.func @transform_48(%arg0: i32) -> (i32, i32, i32) {
    %c0_i32 = arith.constant 0 : i32
    %c0_i32_0 = arith.constant 0 : i32
    %c0_i32_1 = arith.constant 0 : i32
    %c0_i32_2 = arith.constant 0 : i32
    return %c0_i32, %c0_i32_0, %c0_i32_1 : i32, i32, i32
  }
  func.func @transform_49(%arg0: i32) -> (i32, i32, i32, i32) {
    %c0_i32 = arith.constant 0 : i32
    %c0_i32_0 = arith.constant 0 : i32
    %c0_i32_1 = arith.constant 0 : i32
    %c0_i32_2 = arith.constant 0 : i32
    %c0_i32_3 = arith.constant 0 : i32
    return %c0_i32, %c0_i32_0, %c0_i32_1, %c0_i32_2 : i32, i32, i32, i32
  }
  func.func @transform_50(%arg0: i32) -> (i32, i32, i32, i32) {
    %c0_i32 = arith.constant 0 : i32
    %c0_i32_0 = arith.constant 0 : i32
    %c0_i32_1 = arith.constant 0 : i32
    %c0_i32_2 = arith.constant 0 : i32
    %c0_i32_3 = arith.constant 0 : i32
    return %c0_i32, %c0_i32_0, %c0_i32_1, %c0_i32_2 : i32, i32, i32, i32
  }
  func.func @transform_51(%arg0: i32) -> (i32, i32, i32, i32) {
    %c0_i32 = arith.constant 0 : i32
    %c0_i32_0 = arith.constant 0 : i32
    %c0_i32_1 = arith.constant 0 : i32
    %c0_i32_2 = arith.constant 0 : i32
    %c0_i32_3 = arith.constant 0 : i32
    return %c0_i32, %c0_i32_0, %c0_i32_1, %c0_i32_2 : i32, i32, i32, i32
  }
  func.func @transform_52(%arg0: i32) -> (i32, i32, i32, i32) {
    %c0_i32 = arith.constant 0 : i32
    %c0_i32_0 = arith.constant 0 : i32
    %c0_i32_1 = arith.constant 0 : i32
    %c0_i32_2 = arith.constant 0 : i32
    %c0_i32_3 = arith.constant 0 : i32
    return %c0_i32, %c0_i32_0, %c0_i32_1, %c0_i32_2 : i32, i32, i32, i32
  }
  func.func @transform_53(%arg0: i32) -> (i32, i32, i32, i32) {
    %c0_i32 = arith.constant 0 : i32
    %c0_i32_0 = arith.constant 0 : i32
    %c0_i32_1 = arith.constant 0 : i32
    %c0_i32_2 = arith.constant 0 : i32
    %c0_i32_3 = arith.constant 0 : i32
    return %c0_i32, %c0_i32_0, %c0_i32_1, %c0_i32_2 : i32, i32, i32, i32
  }
  func.func @transform_54(%arg0: i32) -> (i32, i32, i32, i32) {
    %c0_i32 = arith.constant 0 : i32
    %c0_i32_0 = arith.constant 0 : i32
    %c0_i32_1 = arith.constant 0 : i32
    %c0_i32_2 = arith.constant 0 : i32
    %c0_i32_3 = arith.constant 0 : i32
    return %c0_i32, %c0_i32_0, %c0_i32_1, %c0_i32_2 : i32, i32, i32, i32
  }
  func.func @transform_55(%arg0: i32) -> (i32, i32, i32, i32) {
    %c0_i32 = arith.constant 0 : i32
    %c0_i32_0 = arith.constant 0 : i32
    %c0_i32_1 = arith.constant 0 : i32
    %c0_i32_2 = arith.constant 0 : i32
    %c0_i32_3 = arith.constant 0 : i32
    return %c0_i32, %c0_i32_0, %c0_i32_1, %c0_i32_2 : i32, i32, i32, i32
  }
  func.func @transform_56(%arg0: i32) -> (i32, i32, i32) {
    %c0_i32 = arith.constant 0 : i32
    %c0_i32_0 = arith.constant 0 : i32
    %c0_i32_1 = arith.constant 0 : i32
    %c0_i32_2 = arith.constant 0 : i32
    return %c0_i32, %c0_i32_0, %c0_i32_1 : i32, i32, i32
  }
  func.func @transform_57(%arg0: i32) -> (i32, i32, i32) {
    %c0_i32 = arith.constant 0 : i32
    %c0_i32_0 = arith.constant 0 : i32
    %c0_i32_1 = arith.constant 0 : i32
    %c0_i32_2 = arith.constant 0 : i32
    return %c0_i32, %c0_i32_0, %c0_i32_1 : i32, i32, i32
  }
  func.func @transform_58(%arg0: i32) -> (i32, i32, i32) {
    %c0_i32 = arith.constant 0 : i32
    %c0_i32_0 = arith.constant 0 : i32
    %c0_i32_1 = arith.constant 0 : i32
    %c0_i32_2 = arith.constant 0 : i32
    return %c0_i32, %c0_i32_0, %c0_i32_1 : i32, i32, i32
  }
  func.func @transform_59(%arg0: i32) -> (i32, i32, i32) {
    %c0_i32 = arith.constant 0 : i32
    %c0_i32_0 = arith.constant 0 : i32
    %c0_i32_1 = arith.constant 0 : i32
    %c0_i32_2 = arith.constant 0 : i32
    return %c0_i32, %c0_i32_0, %c0_i32_1 : i32, i32, i32
  }
  func.func @transform_60(%arg0: i32) -> (i32, i32, i32) {
    %c0_i32 = arith.constant 0 : i32
    %c0_i32_0 = arith.constant 0 : i32
    %c0_i32_1 = arith.constant 0 : i32
    %c0_i32_2 = arith.constant 0 : i32
    return %c0_i32, %c0_i32_0, %c0_i32_1 : i32, i32, i32
  }
  func.func @transform_61(%arg0: i32) -> (i32, i32) {
    %c0_i32 = arith.constant 0 : i32
    %c0_i32_0 = arith.constant 0 : i32
    %c0_i32_1 = arith.constant 0 : i32
    return %c0_i32, %c0_i32_0 : i32, i32
  }
  func.func @transform_62(%arg0: i32) -> (i32, i32) {
    %c0_i32 = arith.constant 0 : i32
    %c0_i32_0 = arith.constant 0 : i32
    %c0_i32_1 = arith.constant 0 : i32
    return %c0_i32, %c0_i32_0 : i32, i32
  }
  func.func @transform_63(%arg0: i32) -> (i32, i32) {
    %c0_i32 = arith.constant 0 : i32
    %c0_i32_0 = arith.constant 0 : i32
    %c0_i32_1 = arith.constant 0 : i32
    return %c0_i32, %c0_i32_0 : i32, i32
  }
  func.func @transform_64(%arg0: i32) -> (i32, i32) {
    %c0_i32 = arith.constant 0 : i32
    %c0_i32_0 = arith.constant 0 : i32
    %c0_i32_1 = arith.constant 0 : i32
    return %c0_i32, %c0_i32_0 : i32, i32
  }
  func.func @transform_65(%arg0: i32) -> (i32, i32) {
    %c0_i32 = arith.constant 0 : i32
    %c0_i32_0 = arith.constant 0 : i32
    %c0_i32_1 = arith.constant 0 : i32
    return %c0_i32, %c0_i32_0 : i32, i32
  }
  func.func @transform_66(%arg0: i32) -> (i32, i32) {
    %c0_i32 = arith.constant 0 : i32
    %c0_i32_0 = arith.constant 0 : i32
    %c0_i32_1 = arith.constant 0 : i32
    return %c0_i32, %c0_i32_0 : i32, i32
  }
  func.func @transform_67(%arg0: i32) -> (i32, i32, i32) {
    %c0_i32 = arith.constant 0 : i32
    %c0_i32_0 = arith.constant 0 : i32
    %c0_i32_1 = arith.constant 0 : i32
    return %arg0, %c0_i32, %c0_i32_0 : i32, i32, i32
  }
}

</mosaic_0001>

<bundles_post_ra>
// kernel: policy_forward.21
= control target key start
LH: loop header
LB: loop body
LE: loop exit
PB: predicated region body
PF: predicated region fallthrough
CT: control target
= control target key end

     0   :  { %s6435_s6 = smov 1   ;;  %s6436_s10 = smov 2   ;;  %s7681_s0 = inlined_call_operand.smem [shape: u32[68], index: -1, kind: input, shape index: {}] }
   0x1   :  { %s6527_s5 = sld [smem:[%s7681_s0]]   ;;  %s6437_s14 = smov 3  }
   0x2   :  { %s6532_s9 = sld [smem:[%s7681_s0 + %s6435_s6]]   ;;  %s6438_s18 = smov 4  }
   0x3   :  { %s6537_s13 = sld [smem:[%s7681_s0 + %s6436_s10]]   ;;  %s6439_s22 = smov 5  }
   0x4   :  { %s6542_s17 = sld [smem:[%s7681_s0 + %s6437_s14]]   ;;  %s6440_s26 = smov 6  }
   0x5   :  { %s6547_s21 = sld [smem:[%s7681_s0 + %s6438_s18]]   ;;  %s6441_s30 = smov 7  }
   0x6   :  { %s6552_s25 = sld [smem:[%s7681_s0 + %s6439_s22]]   ;;  %s6442_s4 = smov 8  }
   0x7   :  { %7747 = sst [smem:[#allocation36_spill]] %s6527_s5  ;;  %s6443_s10 = smov 9  }
   0x8   :  { %7748 = sst [smem:[#allocation37_spill]] %s6532_s9  ;;  %s6444_s15 = smov 10  }
   0x9   :  { %7749 = sst [smem:[#allocation38_spill]] %s6537_s13  ;;  %s6445_s20 = smov 11  }
   0xa   :  { %7750 = sst [smem:[#allocation39_spill]] %s6542_s17  ;;  %s6447_s1 = smov 13  }
   0xb   :  { %7751 = sst [smem:[#allocation40_spill]] %s6547_s21  ;;  %s6448_s7 = smov 14  }
   0xc   :  { %7752 = sst [smem:[#allocation41_spill]] %s6552_s25  ;;  %s6450_s22 = smov 16  }
   0xd   :  { %s6557_s29 = sld [smem:[%s7681_s0 + %s6440_s26]]   ;;  %s6446_s26 = smov 12  }
   0xe   :  { %s6562_s3 = sld [smem:[%s7681_s0 + %s6441_s30]]   ;;  %s6451_s28 = smov 17  }
   0xf   :  { %s6567_s8 = sld [smem:[%s7681_s0 + %s6442_s4]]  }
  0x10   :  { %s6572_s14 = sld [smem:[%s7681_s0 + %s6443_s10]]  }
  0x11   :  { %s6577_s19 = sld [smem:[%s7681_s0 + %s6444_s15]]   ;;  %s6449_s15 = smov 15  }
  0x12   :  { %s6582_s24 = sld [smem:[%s7681_s0 + %s6445_s20]]  }
  0x13   :  { %7753 = sst [smem:[#allocation42_spill]] %s6557_s29 }
  0x14   :  { %7754 = sst [smem:[#allocation43_spill]] %s6562_s3 }
  0x15   :  { %7755 = sst [smem:[#allocation44_spill]] %s6567_s8 }
  0x16   :  { %7756 = sst [smem:[#allocation45_spill]] %s6572_s14 }
  0x17   :  { %7757 = sst [smem:[#allocation46_spill]] %s6577_s19 }
  0x18   :  { %7758 = sst [smem:[#allocation47_spill]] %s6582_s24 }
  0x19   :  { %s6587_s30 = sld [smem:[%s7681_s0 + %s6446_s26]]  }
  0x1a   :  { %s6592_s6 = sld [smem:[%s7681_s0 + %s6447_s1]]  }
  0x1b   :  { %s6597_s12 = sld [smem:[%s7681_s0 + %s6448_s7]]   ;;  %s6452_s7 = smov 18  }
  0x1c   :  { %s6602_s20 = sld [smem:[%s7681_s0 + %s6449_s15]]   ;;  %s6453_s15 = smov 19  }
  0x1d   :  { %s6607_s27 = sld [smem:[%s7681_s0 + %s6450_s22]]   ;;  %s6454_s22 = smov 20  }
  0x1e   :  { %s6612_s4 = sld [smem:[%s7681_s0 + %s6451_s28]]   ;;  %s6455_s28 = smov 21  }
  0x1f   :  { %s6617_s13 = sld [smem:[%s7681_s0 + %s6452_s7]]   ;;  %s6456_s7 = smov 22  }
  0x20   :  { %7759 = sst [smem:[#allocation48_spill]] %s6592_s6 }
  0x21   :  { %7760 = sst [smem:[#allocation49_spill]] %s6597_s12 }
  0x22   :  { %7761 = sst [smem:[#allocation50_spill]] %s6602_s20 }
  0x23   :  { %7762 = sst [smem:[#allocation51_spill]] %s6607_s27 }
  0x24   :  { %7763 = sst [smem:[#allocation52_spill]] %s6612_s4 }
  0x25   :  { %7764 = sst [smem:[#allocation53_spill]] %s6617_s13 }
  0x26   :  { %s6622_s9 = sld [smem:[%s7681_s0 + %s6453_s15]]   ;;  %s6457_s15 = smov 23  }
  0x27   :  { %s6627_s20 = sld [smem:[%s7681_s0 + %s6454_s22]]   ;;  %s6458_s22 = smov 24  }
  0x28   :  { %s6632_s4 = sld [smem:[%s7681_s0 + %s6455_s28]]   ;;  %s6459_s28 = smov 25  }
  0x29   :  { %s6637_s13 = sld [smem:[%s7681_s0 + %s6456_s7]]   ;;  %s6460_s7 = smov 26  }
  0x2a   :  { %s6652_s12 = sld [smem:[%s7681_s0 + %s6459_s28]]   ;;  %s6463_s28 = smov 29  }
  0x2b   :  { %s6657_s24 = sld [smem:[%s7681_s0 + %s6460_s7]]   ;;  %s6464_s7 = smov 30  }
  0x2c   :  { %7765 = sst [smem:[#allocation54_spill]] %s6622_s9 }
  0x2d   :  { %7766 = sst [smem:[#allocation55_spill]] %s6627_s20 }
  0x2e   :  { %7767 = sst [smem:[#allocation56_spill]] %s6632_s4 }
  0x2f   :  { %7768 = sst [smem:[#allocation57_spill]] %s6637_s13 }
  0x30   :  { %s6642_s9 = sld [smem:[%s7681_s0 + %s6457_s15]]   ;;  %s6461_s15 = smov 27  }
  0x31   :  { %s6647_s20 = sld [smem:[%s7681_s0 + %s6458_s22]]   ;;  %s6462_s22 = smov 28  }
  0x32   :  { %7771 = sst [smem:[#allocation60_spill]] %s6652_s12 }
  0x33   :  { %7772 = sst [smem:[#allocation61_spill]] %s6657_s24 }
  0x34   :  { %s6662_s14 = sld [smem:[%s7681_s0 + %s6461_s15]]   ;;  %s6465_s15 = smov 31  }
  0x35   :  { %s6672_s12 = sld [smem:[%s7681_s0 + %s6463_s28]]   ;;  %s6467_s28 = smov 33  }
  0x36   :  { %7769 = sst [smem:[#allocation58_spill]] %s6642_s9 }
  0x37   :  { %7770 = sst [smem:[#allocation59_spill]] %s6647_s20 }
  0x38   :  { %s6667_s20 = sld [smem:[%s7681_s0 + %s6462_s22]]   ;;  %s6466_s22 = smov 32  }
  0x39   :  { %s6677_s19 = sld [smem:[%s7681_s0 + %s6464_s7]]   ;;  %s6468_s7 = smov 34  }
  0x3a   :  { %7773 = sst [smem:[#allocation62_spill]] %s6662_s14 }
  0x3b   :  { %7775 = sst [smem:[#allocation64_spill]] %s6672_s12 }
  0x3c   :  { %s6682_s14 = sld [smem:[%s7681_s0 + %s6465_s15]]   ;;  %s6469_s15 = smov 35  }
  0x3d   :  { %s6692_s3 = sld [smem:[%s7681_s0 + %s6467_s28]]   ;;  %s6471_s28 = smov 37  }
  0x3e   :  { %7774 = sst [smem:[#allocation63_spill]] %s6667_s20 }
  0x3f   :  { %7776 = sst [smem:[#allocation65_spill]] %s6677_s19 }
  0x40   :  { %s6687_s20 = sld [smem:[%s7681_s0 + %s6466_s22]]   ;;  %s6470_s22 = smov 36  }
  0x41   :  { %s6697_s19 = sld [smem:[%s7681_s0 + %s6468_s7]]   ;;  %s6472_s7 = smov 38  }
  0x42   :  { %7777 = sst [smem:[#allocation66_spill]] %s6682_s14 }
  0x43   :  { %7779 = sst [smem:[#allocation68_spill]] %s6692_s3 }
  0x44   :  { %s6702_s14 = sld [smem:[%s7681_s0 + %s6469_s15]]   ;;  %s6473_s15 = smov 39  }
  0x45   :  { %s6707_s29 = sld [smem:[%s7681_s0 + %s6470_s22]]   ;;  %s6474_s22 = smov 40  }
  0x46   :  { %7778 = sst [smem:[#allocation67_spill]] %s6687_s20 }
  0x47   :  { %7780 = sst [smem:[#allocation69_spill]] %s6697_s19 }
  0x48   :  { %s6712_s3 = sld [smem:[%s7681_s0 + %s6471_s28]]   ;;  %s6475_s28 = smov 41  }
  0x49   :  { %s6717_s5 = sld [smem:[%s7681_s0 + %s6472_s7]]   ;;  %s6476_s7 = smov 42  }
  0x4a   :  { %7781 = sst [smem:[#allocation70_spill]] %s6702_s14 }
  0x4b   :  { %7782 = sst [smem:[#allocation71_spill]] %s6707_s29 }
  0x4c   :  { %s6722_s14 = sld [smem:[%s7681_s0 + %s6473_s15]]   ;;  %s6477_s15 = smov 43  }
  0x4d   :  { %s6727_s29 = sld [smem:[%s7681_s0 + %s6474_s22]]   ;;  %s6478_s22 = smov 44  }
  0x4e   :  { %7783 = sst [smem:[#allocation72_spill]] %s6712_s3 }
  0x4f   :  { %7784 = sst [smem:[#allocation73_spill]] %s6717_s5 }
  0x50   :  { %s6732_s3 = sld [smem:[%s7681_s0 + %s6475_s28]]   ;;  %s6479_s28 = smov 45  }
  0x51   :  { %s6737_s5 = sld [smem:[%s7681_s0 + %s6476_s7]]   ;;  %s6480_s7 = smov 46  }
  0x52   :  { %7785 = sst [smem:[#allocation74_spill]] %s6722_s14 }
  0x53   :  { %7786 = sst [smem:[#allocation75_spill]] %s6727_s29 }
  0x54   :  { %s6742_s14 = sld [smem:[%s7681_s0 + %s6477_s15]]   ;;  %s6481_s15 = smov 47  }
  0x55   :  { %s6747_s29 = sld [smem:[%s7681_s0 + %s6478_s22]]   ;;  %s6482_s22 = smov 48  }
  0x56   :  { %7787 = sst [smem:[#allocation76_spill]] %s6732_s3 }
  0x57   :  { %7788 = sst [smem:[#allocation77_spill]] %s6737_s5 }
  0x58   :  { %s6752_s3 = sld [smem:[%s7681_s0 + %s6479_s28]]   ;;  %s6483_s28 = smov 49  }
  0x59   :  { %s6757_s5 = sld [smem:[%s7681_s0 + %s6480_s7]]   ;;  %s6484_s7 = smov 50  }
  0x5a   :  { %7789 = sst [smem:[#allocation78_spill]] %s6742_s14 }
  0x5b   :  { %7790 = sst [smem:[#allocation79_spill]] %s6747_s29 }
  0x5c   :  { %s6762_s14 = sld [smem:[%s7681_s0 + %s6481_s15]]   ;;  %s6485_s15 = smov 51  }
  0x5d   :  { %s6767_s29 = sld [smem:[%s7681_s0 + %s6482_s22]]   ;;  %s6486_s22 = smov 52  }
  0x5e   :  { %7791 = sst [smem:[#allocation80_spill]] %s6752_s3 }
  0x5f   :  { %7792 = sst [smem:[#allocation81_spill]] %s6757_s5 }
  0x60   :  { %s6772_s3 = sld [smem:[%s7681_s0 + %s6483_s28]]   ;;  %s6487_s28 = smov 53  }
  0x61   :  { %s6777_s5 = sld [smem:[%s7681_s0 + %s6484_s7]]   ;;  %s6488_s7 = smov 54  }
  0x62   :  { %7793 = sst [smem:[#allocation82_spill]] %s6762_s14 }
  0x63   :  { %7794 = sst [smem:[#allocation83_spill]] %s6767_s29 }
  0x64   :  { %s6782_s14 = sld [smem:[%s7681_s0 + %s6485_s15]]   ;;  %s6489_s15 = smov 55  }
  0x65   :  { %s6787_s29 = sld [smem:[%s7681_s0 + %s6486_s22]]   ;;  %s6490_s22 = smov 56  }
  0x66   :  { %7795 = sst [smem:[#allocation84_spill]] %s6772_s3 }
  0x67   :  { %7796 = sst [smem:[#allocation85_spill]] %s6777_s5 }
  0x68   :  { %s6792_s3 = sld [smem:[%s7681_s0 + %s6487_s28]]   ;;  %s6491_s28 = smov 57  }
  0x69   :  { %s6797_s5 = sld [smem:[%s7681_s0 + %s6488_s7]]   ;;  %s6492_s7 = smov 58  }
  0x6a   :  { %7797 = sst [smem:[#allocation86_spill]] %s6782_s14 }
  0x6b   :  { %7798 = sst [smem:[#allocation87_spill]] %s6787_s29 }
  0x6c   :  { %s6802_s14 = sld [smem:[%s7681_s0 + %s6489_s15]]   ;;  %s6493_s15 = smov 59  }
  0x6d   :  { %s6807_s29 = sld [smem:[%s7681_s0 + %s6490_s22]]   ;;  %s6494_s22 = smov 60  }
  0x6e   :  { %7799 = sst [smem:[#allocation88_spill]] %s6792_s3 }
  0x6f   :  { %7800 = sst [smem:[#allocation89_spill]] %s6797_s5 }
  0x70   :  { %s6812_s3 = sld [smem:[%s7681_s0 + %s6491_s28]]   ;;  %s6495_s28 = smov 61  }
  0x71   :  { %s6817_s5 = sld [smem:[%s7681_s0 + %s6492_s7]]   ;;  %s6496_s7 = smov 62  }
  0x72   :  { %7801 = sst [smem:[#allocation90_spill]] %s6802_s14 }
  0x73   :  { %7802 = sst [smem:[#allocation91_spill]] %s6807_s29 }
  0x74   :  { %s6822_s14 = sld [smem:[%s7681_s0 + %s6493_s15]]   ;;  %s6497_s15 = smov 63  }
  0x75   :  { %s6827_s29 = sld [smem:[%s7681_s0 + %s6494_s22]]   ;;  %s6498_s22 = smov 64  }
  0x76   :  { %7803 = sst [smem:[#allocation92_spill]] %s6812_s3 }
  0x77   :  { %7804 = sst [smem:[#allocation93_spill]] %s6817_s5 }
  0x78   :  { %s6832_s3 = sld [smem:[%s7681_s0 + %s6495_s28]]   ;;  %s6499_s28 = smov 65  }
  0x79   :  { %s6837_s5 = sld [smem:[%s7681_s0 + %s6496_s7]]   ;;  %s6500_s7 = smov 66  }
  0x7a   :  { %7805 = sst [smem:[#allocation94_spill]] %s6822_s14 }
  0x7b   :  { %7806 = sst [smem:[#allocation95_spill]] %s6827_s29 }
  0x7c   :  { %s6842_s14 = sld [smem:[%s7681_s0 + %s6497_s15]]   ;;  %s6501_s15 = smov 67  }
  0x7d   :  { %s6847_s29 = sld [smem:[%s7681_s0 + %s6498_s22]]  }
  0x7e   :  { %7807 = sst [smem:[#allocation96_spill]] %s6832_s3 }
  0x7f   :  { %7808 = sst [smem:[#allocation97_spill]] %s6837_s5 }
  0x80   :  { %s6852_s8 = sld [smem:[%s7681_s0 + %s6499_s28]]  }
  0x81   :  { %s6857_s3 = sld [smem:[%s7681_s0 + %s6500_s7]]  }
  0x82   :  { %7809 = sst [smem:[#allocation98_spill]] %s6842_s14 }
  0x83   :  { %s6862_s14 = sld [smem:[%s7681_s0 + %s6501_s15]]  }
  0x86   :  { %7810 = sst [smem:[#allocation99_spill]] %s6852_s8 }
  0x87   :  { %7811 = sst [smem:[#allocation100_spill]] %s6857_s3 }
  0x89   :  { %7812 = sst [smem:[#allocation101_spill]] %s6862_s14 }
  0x8a   :  { %140 = vsyncpa [#allocation4], 0 }
  0x8b   :  { %141 = vsyncpa [#allocation6], 0 }
  0x8c   :  { %142 = vsyncpa [#allocation3], 0 }
  0x8d   :  { %143 = vsyncpa [#allocation10], 0 }
  0x8e   :  { %144 = vsyncpa [#allocation13], 0 }
  0x8f   :  { %145 = vsyncpa [#allocation16], 0 }
  0x90   :  { %146 = vsyncpa [#allocation19], 0 }
  0x91   :  { %147 = vsyncpa [#allocation22], 0 }
  0x92   :  { %148 = vsyncpa [#allocation25], 0  ;;  %s6864_s22 = smov 0  }
  0x93 LB: > { %s7813_s27 = sld [smem:[#allocation51_spill]]  ;;  %s6873_s23 = sadd.s32 4294967295, %s6433_s22   ;;  %s6433_s22 = sphi %s6864_s22, %s154_s22  }
  0x94   : > { %s7814_s25 = sld [smem:[#allocation41_spill]]  ;;  %p5308_p0 = scmp.ge.s32.totalorder %s6433_s22, 1 }
  0x95   : > { %s7815_s24 = sld [smem:[#allocation61_spill]]  ;;  %p1607_p1 = scmp.lt.s32.totalorder %s6433_s22, 3 }
  0x96   : > { %s7816_s21 = sld [smem:[#allocation40_spill]]  ;;  %p5701_p2 = scmp.eq.s32.totalorder %s6873_s23, 0 }
  0x97   : > { %s7817_s20 = sld [smem:[#allocation67_spill]]  ;;  %p6878_p3 = pnand %p5308_p0, %p1607_p1 }
  0x98   : > { %s7818_s19 = sld [smem:[#allocation69_spill]]  ;;  %s6502_s1 = smov [#allocation9]  }
  0x99   : > { %s7819_s17 = sld [smem:[#allocation39_spill]]  ;;  %p5652_p4 = pneg %p6878_p3 }
  0x9a   : > { %s7820_s13 = sld [smem:[#allocation57_spill]]  ;;  %s6887_s2 = sshll.u32 %s6502_s1, 4 }
  0x9b   : > { %s7821_s12 = sld [smem:[#allocation64_spill]]  ;;  %p6893_p5 = pnand %p5701_p2, %p5652_p4 }
  0x9c   : > { %s7822_s9 = sld [smem:[#allocation58_spill]]  ;;  %s1629_s0 = sshll.u32 %s7816_s21, 4  ;;  %s6870_s0 = int_to_ptr.vmem [resolvable:$true] %s1629_s0 }
  0x9d   : > { %s7823_s6 = sld [smem:[#allocation48_spill]]  ;;  %s6503_s15 = smov [#allocation12]  }
  0x9e   : > { %s7824_s5 = sld [smem:[#allocation97_spill]]  ;;  %s6900_s16 = sshll.u32 %s6503_s15, 4  ;;  %s1724_s16 = int_to_ptr.vmem [resolvable:$true] %s6900_s16 }
  0x9f   : > { %s7825_s4 = sld [smem:[#allocation56_spill]]  ;;  %s5956_s18 = sshra.s32 %s6870_s0, 4  ;;  %s5957_s18 = int_to_ptr.vmem [resolvable:$true] %s5956_s18 }
  0xa0   : > { %7826 = sst [smem:[#allocation102_spill]] %s6433_s22  ;;  %s5958_s1 = scalar_lea.vmem %s5957_s18, 1 }
  0xa1   : > { %7828 = sst [smem:[#allocation103_spill]] %s6887_s2  ;;  %p5959_p6 = scmp.ne.s32.totalorder %s5957_s18, %s5958_s1 }
  0xa2   : > { %p6905_p7 = pneg %p6893_p5  ;;  %s5963_s22 = scalar_lea.vmem %s7816_s21, 1 }
  0xa3   : > { %s1679_s28 = sshll.u32 %s7823_s6, 4  ;;  %p5964_p10 = scmp.lt.s32.totalorder %s5957_s18, %s7816_s21  ;;  %s6883_s28 = int_to_ptr.hbm [resolvable:$true] %s1679_s28 }
  0xa4   : > { %p5961_p8 = pnand %p6905_p7, %p5959_p6  ;;  %p5965_p11 = scmp.lt.s32.totalorder %s5963_s22, %s5958_s1 }
  0xa5   : > { %s1721_s7 = sshll.u32 %s7825_s4, 4  ;;  %s6897_s7 = int_to_ptr.hbm [resolvable:$true] %s1721_s7 }
  0xa6   : > { %p5962_p9 = pneg %p5961_p8  ;;  %p5966_p12 = por %p5965_p11, %p5964_p10 }
  0xa8   : > { %p5967_p13 = pnand %p5966_p12, %p5962_p9 }
  0xaa   : > { %5970 = shalt.err (!%p5967_p13)
}
  0xab   : > { %s6504_s15 = smov [#allocation5]   ;;  %s5971_s11 = sshra.s32 %s6883_s28, 4  ;;  %s5972_s11 = int_to_ptr.hbm [resolvable:$true] %s5971_s11 }
  0xac   : > { %5658 = dma.vmem_to_smem (!%p6893_p5), %s6870_s0, 16, %s6504_s15, [#allocation6]  }
  0xad   : > { %s5973_s14 = scalar_lea.hbm %s5972_s11, 1  ;;  %s5978_s22 = scalar_lea.hbm %s7823_s6, 1 }
  0xae   : > { %p5974_p0 = scmp.ne.s32.totalorder %s5972_s11, %s5973_s14  ;;  %p5979_p6 = scmp.lt.s32.totalorder %s5972_s11, %s7823_s6 }
  0xaf   : > { %p5980_p8 = scmp.lt.s32.totalorder %s5978_s22, %s5973_s14 }
  0xb0   : > { %p5976_p1 = pnand %p5974_p0, %p6905_p7 }
  0xb1   : > { %p5981_p9 = por %p5980_p8, %p5979_p6 }
  0xb2   : > { %p5977_p4 = pneg %p5976_p1 }
  0xb4   : > { %p5982_p10 = pnand %p5981_p9, %p5977_p4 }
  0xb6   : > { %5985 = shalt.err (!%p5982_p10)
}
  0xb7   : > { %s7831_s18 = sld [smem:[#allocation103_spill]]  ;;  %s7833_s0 = sshll.u32 %s7822_s9, 4  ;;  %s6929_s0 = int_to_ptr.hbm [resolvable:$true] %s7833_s0 }
  0xb8   : > { %s6001_s14 = sshra.s32 %s6897_s7, 4  ;;  %s6008_s15 = scalar_lea.hbm %s7825_s4, 1  ;;  %s6002_s14 = int_to_ptr.hbm [resolvable:$true] %s6001_s14 }
  0xb9   : > { %s6003_s11 = scalar_lea.hbm %s6002_s14, 1  ;;  %p6009_p0 = scmp.lt.s32.totalorder %s6002_s14, %s7825_s4 }
  0xba   : > { %p6004_p11 = scmp.ne.s32.totalorder %s6002_s14, %s6003_s11  ;;  %p6010_p1 = scmp.lt.s32.totalorder %s6008_s15, %s6003_s11 }
  0xbc   : > { %p6006_p12 = pnand %p6004_p11, %p6905_p7  ;;  %p6011_p4 = por %p6010_p1, %p6009_p0 }
  0xbd   : > { %s7832_s1 = int_to_ptr.vmem [resolvable:$true] %s7831_s18 }
  0xbe   : > { %5667 = dma.hbm_to_vmem [thread:$0]  (!%p6893_p5), %s6883_s28, 16, %s7832_s1, [#allocation10]  }
  0xbf   : > { %p6007_p13 = pneg %p6006_p12 }
  0xc1   : > { %p6012_p6 = pnand %p6011_p4, %p6007_p13 }
  0xc3   : > { %6015 = shalt.err (!%p6012_p6)
}
  0xc4   : > { %5673 = dma.hbm_to_vmem [thread:$0]  (!%p6893_p5), %s6897_s7, 16, %s1724_s16, [#allocation13]  }
  0xc5   : > { %s1781_s28 = sshll.u32 %s7821_s12, 4  ;;  %s6505_s22 = smov [#allocation15]   ;;  %s6940_s28 = int_to_ptr.hbm [resolvable:$true] %s1781_s28 }
  0xc6   : > { %s1747_s18 = sshll.u32 %s6505_s22, 4  ;;  %s6031_s1 = sshra.s32 %s6929_s0, 4  ;;  %s1748_s18 = int_to_ptr.vmem [resolvable:$true] %s1747_s18  ;;  %s6032_s1 = int_to_ptr.hbm [resolvable:$true] %s6031_s1 }
  0xc7   : > { %s6033_s14 = scalar_lea.hbm %s6032_s1, 1  ;;  %s6038_s11 = scalar_lea.hbm %s7822_s9, 1 }
  0xc8   : > { %p6034_p8 = scmp.ne.s32.totalorder %s6032_s1, %s6033_s14  ;;  %p6039_p11 = scmp.lt.s32.totalorder %s6032_s1, %s7822_s9 }
  0xc9   : > { %p6040_p12 = scmp.lt.s32.totalorder %s6038_s11, %s6033_s14 }
  0xca   : > { %p6036_p9 = pnand %p6034_p8, %p6905_p7 }
  0xcb   : > { %p6041_p13 = por %p6040_p12, %p6039_p11 }
  0xcc   : > { %p6037_p10 = pneg %p6036_p9 }
  0xce   : > { %p6042_p0 = pnand %p6041_p13, %p6037_p10 }
  0xd0   : > { %6045 = shalt.err (!%p6042_p0)
}
  0xd1   : > { %5679 = dma.hbm_to_vmem [thread:$0]  (!%p6893_p5), %s6929_s0, 16, %s1748_s18, [#allocation16]  }
  0xd2   : > { %s6506_s7 = smov [#allocation18]   ;;  %s1814_s15 = sshll.u32 %s7818_s19, 4  ;;  %s6951_s15 = int_to_ptr.hbm [resolvable:$true] %s1814_s15 }
  0xd3   : > { %s1783_s16 = sshll.u32 %s6506_s7, 4  ;;  %s6061_s22 = sshra.s32 %s6940_s28, 4  ;;  %s1784_s16 = int_to_ptr.vmem [resolvable:$true] %s1783_s16  ;;  %s6062_s22 = int_to_ptr.hbm [resolvable:$true] %s6061_s22 }
  0xd4   : > { %s6063_s1 = scalar_lea.hbm %s6062_s22, 1  ;;  %s6068_s14 = scalar_lea.hbm %s7821_s12, 1 }
  0xd5   : > { %p6064_p1 = scmp.ne.s32.totalorder %s6062_s22, %s6063_s1  ;;  %p6069_p8 = scmp.lt.s32.totalorder %s6062_s22, %s7821_s12 }
  0xd6   : > { %p6070_p9 = scmp.lt.s32.totalorder %s6068_s14, %s6063_s1 }
  0xd7   : > { %p6066_p4 = pnand %p6064_p1, %p6905_p7 }
  0xd8   : > { %p6071_p10 = por %p6070_p9, %p6069_p8 }
  0xd9   : > { %p6067_p6 = pneg %p6066_p4 }
  0xdb   : > { %p6072_p11 = pnand %p6071_p10, %p6067_p6 }
  0xdd   : > { %6075 = shalt.err (!%p6072_p11)
}
  0xde   : > { %5685 = dma.hbm_to_vmem [thread:$0]  (!%p6893_p5), %s6940_s28, 16, %s1784_s16, [#allocation19]  }
  0xdf   : > { %s1916_s0 = sshll.u32 %s7824_s5, 4  ;;  %s6507_s18 = smov [#allocation21]   ;;  %s6962_s0 = int_to_ptr.hbm [resolvable:$true] %s1916_s0 }
  0xe0   : > { %s1816_s11 = sshll.u32 %s6507_s18, 4  ;;  %s6091_s7 = sshra.s32 %s6951_s15, 4  ;;  %s1817_s11 = int_to_ptr.vmem [resolvable:$true] %s1816_s11  ;;  %s6092_s7 = int_to_ptr.hbm [resolvable:$true] %s6091_s7 }
  0xe1   : > { %s6093_s22 = scalar_lea.hbm %s6092_s7, 1  ;;  %s6098_s1 = scalar_lea.hbm %s7818_s19, 1 }
  0xe2   : > { %p6094_p12 = scmp.ne.s32.totalorder %s6092_s7, %s6093_s22  ;;  %p6099_p1 = scmp.lt.s32.totalorder %s6092_s7, %s7818_s19 }
  0xe3   : > { %p6100_p4 = scmp.lt.s32.totalorder %s6098_s1, %s6093_s22 }
  0xe4   : > { %p6096_p13 = pnand %p6094_p12, %p6905_p7 }
  0xe5   : > { %p6101_p6 = por %p6100_p4, %p6099_p1 }
  0xe6   : > { %p6097_p0 = pneg %p6096_p13 }
  0xe8   : > { %p6102_p8 = pnand %p6101_p6, %p6097_p0 }
  0xea   : > { %6105 = shalt.err (!%p6102_p8)
}
  0xeb   : > { %5691 = dma.hbm_to_vmem [thread:$0]  (!%p6893_p5), %s6951_s15, 16, %s1817_s11, [#allocation22]  }
  0xec   : > { %s6508_s28 = smov [#allocation24]   ;;  %s1619_s14 = sshll.u32 %s7819_s17, 4  ;;  %s1620_s14 = int_to_ptr.vmem [resolvable:$true] %s1619_s14 }
  0xed   : > { %s1918_s16 = sshll.u32 %s6508_s28, 4  ;;  %s6121_s18 = sshra.s32 %s6962_s0, 4  ;;  %s1919_s16 = int_to_ptr.vmem [resolvable:$true] %s1918_s16  ;;  %s6122_s18 = int_to_ptr.hbm [resolvable:$true] %s6121_s18 }
  0xee   : > { %s6123_s7 = scalar_lea.hbm %s6122_s18, 1  ;;  %s6128_s22 = scalar_lea.hbm %s7824_s5, 1 }
  0xef   : > { %p6124_p9 = scmp.ne.s32.totalorder %s6122_s18, %s6123_s7  ;;  %p6129_p12 = scmp.lt.s32.totalorder %s6122_s18, %s7824_s5 }
  0xf0   : > { %p6130_p13 = scmp.lt.s32.totalorder %s6128_s22, %s6123_s7 }
  0xf1   : > { %p6126_p10 = pnand %p6124_p9, %p6905_p7 }
  0xf2   : > { %p6131_p0 = por %p6130_p13, %p6129_p12 }
  0xf3   : > { %p6127_p11 = pneg %p6126_p10 }
  0xf5   : > { %p6132_p1 = pnand %p6131_p0, %p6127_p11 }
  0xf7   : > { %6135 = shalt.err (!%p6132_p1)
}
  0xf8   : > { %5697 = dma.hbm_to_vmem [thread:$0]  (!%p6893_p5), %s6962_s0, 16, %s1919_s16, [#allocation25]  }
  0xf9   : > { %s1639_s15 = sshll.u32 %s7814_s25, 4  ;;  %s6151_s11 = sshra.s32 %s1620_s14, 4  ;;  %s6152_s11 = int_to_ptr.vmem [resolvable:$true] %s6151_s11  ;;  %s1640_s15 = int_to_ptr.vmem [resolvable:$true] %s1639_s15 }
  0xfa   : > { %s6153_s1 = scalar_lea.vmem %s6152_s11, 1  ;;  %s6158_s28 = scalar_lea.vmem %s7819_s17, 1 }
  0xfb   : > { %p6154_p4 = scmp.ne.s32.totalorder %s6152_s11, %s6153_s1  ;;  %p6159_p9 = scmp.lt.s32.totalorder %s6152_s11, %s7819_s17 }
  0xfc   : > { %p6160_p10 = scmp.lt.s32.totalorder %s6158_s28, %s6153_s1 }
  0xfd   : > { %p6156_p6 = pnand %p6154_p4, %p6905_p7 }
  0xfe   : > { %p6161_p11 = por %p6160_p10, %p6159_p9 }
  0xff   : > { %p6157_p8 = pneg %p6156_p6 }
 0x101   : > { %p6162_p12 = pnand %p6161_p11, %p6157_p8 }
 0x103   : > { %6165 = shalt.err (!%p6162_p12)
}
 0x104   : > { %s6509_s18 = smov [#allocation2]   ;;  %s6166_s0 = sshra.s32 %s1640_s15, 4  ;;  %s6167_s0 = int_to_ptr.vmem [resolvable:$true] %s6166_s0 }
 0x105   : > { %5655 = dma.vmem_to_smem (!%p6893_p5), %s1620_s14, 16, %s6509_s18, [#allocation4]  }
 0x106   : > { %s6168_s16 = scalar_lea.vmem %s6167_s0, 1  ;;  %s6173_s7 = scalar_lea.vmem %s7814_s25, 1 }
 0x107   : > { %p6169_p13 = scmp.ne.s32.totalorder %s6167_s0, %s6168_s16  ;;  %p6174_p4 = scmp.lt.s32.totalorder %s6167_s0, %s7814_s25 }
 0x108   : > { %p6175_p6 = scmp.lt.s32.totalorder %s6173_s7, %s6168_s16 }
 0x109   : > { %p6171_p0 = pnand %p6169_p13, %p6905_p7 }
 0x10a   : > { %p6176_p8 = por %p6175_p6, %p6174_p4 }
 0x10b   : > { %p6172_p1 = pneg %p6171_p0 }
 0x10d   : > { %p6177_p9 = pnand %p6176_p8, %p6172_p1 }
 0x10f   : > { %6180 = shalt.err (!%p6177_p9)
}
 0x110   : > { %s6510_s22 = smov [#allocation7]   ;;  %s1667_s14 = sshll.u32 %s6587_s30, 4  ;;  %s1668_s14 = int_to_ptr.hbm [resolvable:$true] %s1667_s14 }
 0x111   : > { %5661 = dma.vmem_to_smem (!%p6893_p5), %s1640_s15, 16, %s6510_s22, [#allocation6]  }
 0x112   : > { %s6511_s11 = smov [#allocation8]   ;;  %s1697_s28 = sshll.u32 %s7813_s27, 4  ;;  %s1698_s28 = int_to_ptr.hbm [resolvable:$true] %s1697_s28 }
 0x113   : > { %s1669_s1 = sshll.u32 %s6511_s11, 4  ;;  %s6181_s18 = sshra.s32 %s1668_s14, 4  ;;  %s1670_s1 = int_to_ptr.vmem [resolvable:$true] %s1669_s1  ;;  %s6182_s18 = int_to_ptr.hbm [resolvable:$true] %s6181_s18 }
 0x114   : > { %s6183_s0 = scalar_lea.hbm %s6182_s18, 1  ;;  %s6188_s16 = scalar_lea.hbm %s6587_s30, 1 }
 0x115   : > { %p6184_p10 = scmp.ne.s32.totalorder %s6182_s18, %s6183_s0  ;;  %p6189_p13 = scmp.lt.s32.totalorder %s6182_s18, %s6587_s30 }
 0x116   : > { %p6190_p0 = scmp.lt.s32.totalorder %s6188_s16, %s6183_s0 }
 0x117   : > { %p6186_p11 = pnand %p6184_p10, %p6905_p7 }
 0x118   : > { %p6191_p1 = por %p6190_p0, %p6189_p13 }
 0x119   : > { %p6187_p12 = pneg %p6186_p11 }
 0x11b   : > { %p6192_p4 = pnand %p6191_p1, %p6187_p12 }
 0x11d   : > { %6195 = shalt.err (!%p6192_p4)
}
 0x11e   : > { %5664 = dma.hbm_to_vmem [thread:$0]  (!%p6893_p5), %s1668_s14, 16, %s1670_s1, [#allocation3]  }
 0x11f   : > { %s6512_s15 = smov [#allocation11]   ;;  %s1733_s22 = sshll.u32 %s7820_s13, 4  ;;  %s7003_s22 = int_to_ptr.hbm [resolvable:$true] %s1733_s22 }
 0x120   : > { %s1699_s7 = sshll.u32 %s6512_s15, 4  ;;  %s6211_s11 = sshra.s32 %s1698_s28, 4  ;;  %s1700_s7 = int_to_ptr.vmem [resolvable:$true] %s1699_s7  ;;  %s6212_s11 = int_to_ptr.hbm [resolvable:$true] %s6211_s11 }
 0x121   : > { %s6213_s18 = scalar_lea.hbm %s6212_s11, 1  ;;  %s6218_s0 = scalar_lea.hbm %s7813_s27, 1 }
 0x122   : > { %p6214_p6 = scmp.ne.s32.totalorder %s6212_s11, %s6213_s18  ;;  %p6219_p10 = scmp.lt.s32.totalorder %s6212_s11, %s7813_s27 }
 0x123   : > { %p6220_p11 = scmp.lt.s32.totalorder %s6218_s0, %s6213_s18 }
 0x124   : > { %p6216_p8 = pnand %p6214_p6, %p6905_p7 }
 0x125   : > { %p6221_p12 = por %p6220_p11, %p6219_p10 }
 0x126   : > { %p6217_p9 = pneg %p6216_p8 }
 0x128   : > { %p6222_p13 = pnand %p6221_p12, %p6217_p9 }
 0x12a   : > { %6225 = shalt.err (!%p6222_p13)
}
 0x12b   : > { %5670 = dma.hbm_to_vmem [thread:$0]  (!%p6893_p5), %s1698_s28, 16, %s1700_s7, [#allocation10]  }
 0x12c   : > { %s1763_s14 = sshll.u32 %s7815_s24, 4  ;;  %s6513_s1 = smov [#allocation14]   ;;  %s7012_s14 = int_to_ptr.hbm [resolvable:$true] %s1763_s14 }
 0x12d   : > { %s1735_s16 = sshll.u32 %s6513_s1, 4  ;;  %s6241_s15 = sshra.s32 %s7003_s22, 4  ;;  %s1736_s16 = int_to_ptr.vmem [resolvable:$true] %s1735_s16  ;;  %s6242_s15 = int_to_ptr.hbm [resolvable:$true] %s6241_s15 }
 0x12e   : > { %s6243_s11 = scalar_lea.hbm %s6242_s15, 1  ;;  %s6248_s18 = scalar_lea.hbm %s7820_s13, 1 }
 0x12f   : > { %p6244_p0 = scmp.ne.s32.totalorder %s6242_s15, %s6243_s11  ;;  %p6249_p6 = scmp.lt.s32.totalorder %s6242_s15, %s7820_s13 }
 0x130   : > { %p6250_p8 = scmp.lt.s32.totalorder %s6248_s18, %s6243_s11 }
 0x131   : > { %p6246_p1 = pnand %p6244_p0, %p6905_p7 }
 0x132   : > { %p6251_p9 = por %p6250_p8, %p6249_p6 }
 0x133   : > { %p6247_p4 = pneg %p6246_p1 }
 0x135   : > { %p6252_p10 = pnand %p6251_p9, %p6247_p4 }
 0x137   : > { %6255 = shalt.err (!%p6252_p10)
}
 0x138   : > { %5676 = dma.hbm_to_vmem [thread:$0]  (!%p6893_p5), %s7003_s22, 16, %s1736_s16, [#allocation13]  }
 0x139   : > { %s6514_s28 = smov [#allocation17]   ;;  %s1799_s0 = sshll.u32 %s7817_s20, 4  ;;  %s7023_s0 = int_to_ptr.hbm [resolvable:$true] %s1799_s0 }
 0x13a   : > { %s1765_s7 = sshll.u32 %s6514_s28, 4  ;;  %s6271_s1 = sshra.s32 %s7012_s14, 4  ;;  %s1766_s7 = int_to_ptr.vmem [resolvable:$true] %s1765_s7  ;;  %s6272_s1 = int_to_ptr.hbm [resolvable:$true] %s6271_s1 }
 0x13b   : > { %s6273_s15 = scalar_lea.hbm %s6272_s1, 1  ;;  %s6278_s11 = scalar_lea.hbm %s7815_s24, 1 }
 0x13c   : > { %p6274_p11 = scmp.ne.s32.totalorder %s6272_s1, %s6273_s15  ;;  %p6279_p0 = scmp.lt.s32.totalorder %s6272_s1, %s7815_s24 }
 0x13d   : > { %p6280_p1 = scmp.lt.s32.totalorder %s6278_s11, %s6273_s15 }
 0x13e   : > { %p6276_p12 = pnand %p6274_p11, %p6905_p7 }
 0x13f   : > { %p6281_p4 = por %p6280_p1, %p6279_p0 }
 0x140   : > { %p6277_p13 = pneg %p6276_p12 }
 0x142   : > { %p6282_p6 = pnand %p6281_p4, %p6277_p13 }
 0x144   : > { %6285 = shalt.err (!%p6282_p6)
}
 0x145   : > { %s7834_s22 = sld [smem:[#allocation96_spill]]  ;;  %s6515_s28 = smov [#allocation20]  }
 0x146   : > { %5682 = dma.hbm_to_vmem [thread:$0]  (!%p6893_p5), %s7012_s14, 16, %s1766_s7, [#allocation16]  }
 0x147   : > { %s1801_s4 = sshll.u32 %s6515_s28, 4  ;;  %s6301_s1 = sshra.s32 %s7023_s0, 4  ;;  %s1802_s4 = int_to_ptr.vmem [resolvable:$true] %s1801_s4  ;;  %s6302_s1 = int_to_ptr.hbm [resolvable:$true] %s6301_s1 }
 0x148   : > { %s6303_s15 = scalar_lea.hbm %s6302_s1, 1  ;;  %s6308_s11 = scalar_lea.hbm %s7817_s20, 1 }
 0x149   : > { %p6304_p8 = scmp.ne.s32.totalorder %s6302_s1, %s6303_s15  ;;  %p6309_p11 = scmp.lt.s32.totalorder %s6302_s1, %s7817_s20 }
 0x14a   : > { %p6310_p12 = scmp.lt.s32.totalorder %s6308_s11, %s6303_s15 }
 0x14b   : > { %s7835_s16 = smov %s7834_s22  ;;  %s1904_s18 = sshll.u32 %s7834_s22, 4  ;;  %s7034_s18 = int_to_ptr.hbm [resolvable:$true] %s1904_s18 }
 0x14c   : > { %p6306_p9 = pnand %p6304_p8, %p6905_p7  ;;  %p6311_p13 = por %p6310_p12, %p6309_p11 }
 0x14e   : > { %p6307_p10 = pneg %p6306_p9 }
 0x150   : > { %p6312_p0 = pnand %p6311_p13, %p6307_p10 }
 0x152   : > { %6315 = shalt.err (!%p6312_p0)
}
 0x153   : > { %5688 = dma.hbm_to_vmem [thread:$0]  (!%p6893_p5), %s7023_s0, 16, %s1802_s4, [#allocation19]  }
 0x154   : > { %s6516_s14 = smov [#allocation23]   ;;  %s1931_s22 = sshll.u32 %s6847_s29, 4  ;;  %s1932_s22 = int_to_ptr.hbm [resolvable:$true] %s1931_s22 }
 0x155   : > { %s1906_s7 = sshll.u32 %s6516_s14, 4  ;;  %s6331_s28 = sshra.s32 %s7034_s18, 4  ;;  %s1907_s7 = int_to_ptr.vmem [resolvable:$true] %s1906_s7  ;;  %s6332_s28 = int_to_ptr.hbm [resolvable:$true] %s6331_s28 }
 0x156   : > { %s6333_s1 = scalar_lea.hbm %s6332_s28, 1  ;;  %s6338_s15 = scalar_lea.hbm %s7835_s16, 1 }
 0x157   : > { %p6334_p1 = scmp.ne.s32.totalorder %s6332_s28, %s6333_s1  ;;  %p6339_p8 = scmp.lt.s32.totalorder %s6332_s28, %s7835_s16 }
 0x158   : > { %p6340_p9 = scmp.lt.s32.totalorder %s6338_s15, %s6333_s1 }
 0x159   : > { %p6336_p4 = pnand %p6334_p1, %p6905_p7 }
 0x15a   : > { %p6341_p10 = por %p6340_p9, %p6339_p8 }
 0x15b   : > { %p6337_p6 = pneg %p6336_p4 }
 0x15d   : > { %p6342_p11 = pnand %p6341_p10, %p6337_p6 }
 0x15f   : > { %6345 = shalt.err (!%p6342_p11)
}
 0x160   : > { %5694 = dma.hbm_to_vmem [thread:$0]  (!%p6893_p5), %s7034_s18, 16, %s1907_s7, [#allocation22]  }
 0x161   : > { %s6517_s4 = smov [#allocation26]   ;;  %s6361_s11 = sshra.s32 %s1932_s22, 4  ;;  %s6362_s11 = int_to_ptr.hbm [resolvable:$true] %s6361_s11 }
 0x162   : > { %s1933_s0 = sshll.u32 %s6517_s4, 4  ;;  %s6363_s14 = scalar_lea.hbm %s6362_s11, 1  ;;  %s1934_s0 = int_to_ptr.vmem [resolvable:$true] %s1933_s0 }
 0x163   : > { %p6364_p12 = scmp.ne.s32.totalorder %s6362_s11, %s6363_s14  ;;  %s6368_s28 = scalar_lea.hbm %s6847_s29, 1 }
 0x164   : > { %p6369_p1 = scmp.lt.s32.totalorder %s6362_s11, %s6847_s29  ;;  %p6370_p4 = scmp.lt.s32.totalorder %s6368_s28, %s6363_s14 }
 0x165   : > { %p6366_p13 = pnand %p6364_p12, %p6905_p7 }
 0x166   : > { %p6371_p6 = por %p6370_p4, %p6369_p1 }
 0x167   : > { %p6367_p0 = pneg %p6366_p13 }
 0x169   : > { %p6372_p8 = pnand %p6371_p6, %p6367_p0 }
 0x16b   : > { %6375 = shalt.err (!%p6372_p8)
}
 0x16c   : > { %5700 = dma.hbm_to_vmem [thread:$0]  (!%p6893_p5), %s1932_s22, 16, %s1934_s0, [#allocation25]  }
 0x16d   : > { %1974 = sbr.rel (%p6878_p3) target bundleno = 8729 (0x2219), region = 288 }
 0x172   : > { %6396 = dma.done.wait (%p5701_p2), [#allocation4], 16  }
 0x173   : > { %6398 = vsyncadd (%p5701_p2), [#allocation4], 4294967280 }
 0x174   : > { %6400 = dma.done.wait (%p5701_p2), [#allocation6], 32  }
 0x175   : > { %6402 = vsyncadd (%p5701_p2), [#allocation6], 4294967264 }
 0x176   : > { %6404 = dma.done.wait (%p5701_p2), [#allocation3], 16  }
 0x177   : > { %6406 = vsyncadd (%p5701_p2), [#allocation3], 4294967280 }
 0x178   : > { %6408 = dma.done.wait (%p5701_p2), [#allocation10], 32  }
 0x179   : > { %6410 = vsyncadd (%p5701_p2), [#allocation10], 4294967264 }
 0x17a   : > { %6412 = dma.done.wait (%p5701_p2), [#allocation13], 32  }
 0x17b   : > { %6414 = vsyncadd (%p5701_p2), [#allocation13], 4294967264 }
 0x17c   : > { %6416 = dma.done.wait (%p5701_p2), [#allocation16], 32  }
 0x17d   : > { %6418 = vsyncadd (%p5701_p2), [#allocation16], 4294967264 }
 0x17e   : > { %6420 = dma.done.wait (%p5701_p2), [#allocation19], 32  }
 0x17f   : > { %6422 = vsyncadd (%p5701_p2), [#allocation19], 4294967264 }
 0x180   : > { %6424 = dma.done.wait (%p5701_p2), [#allocation22], 32  }
 0x181   : > { %6426 = vsyncadd (%p5701_p2), [#allocation22], 4294967264 }
 0x182   : > { %6428 = dma.done.wait (%p5701_p2), [#allocation25], 32  }
 0x183   : > { %6430 = vsyncadd (%p5701_p2), [#allocation25], 4294967264 }
 0x184   : > { %2056 = sfence }
 0x185   : > { %s7836_s26 = sld [smem:[#allocation44_spill]]  ;;  %p2209_p3 = scmp.lt.s32.totalorder %s6873_s23, 1  ;;  %vm2289_vm0 = vcmask 523264   ;;  %vm2368_vm1 = vcmask 261120   ;;  %vm2472_vm2 = vcmask 1041408   ;;  %vm2434_vm3 = vcmask 15360  }
 0x186   : > { %s7837_s10 = sld [smem:[#allocation36_spill]]  ;;  %vm2615_vm10 = vcmask 1040384   ;;  %vm2758_vm11 = vcmask 130048   ;;  %vm3067_vm12 = vcmask 1043456   ;;  %vm3063_vm13 = vcmask 31744  }
 0x187   : > { %s7102_s2 = scalar_select %p2209_p3, %s6873_s23, 1 }
 0x188   : > { %s7838_s18 = sld [smem:[#allocation42_spill]] }
 0x189   : > { %s7839_s7 = sld [smem:[#allocation43_spill]]  ;;  %s5586_s22 = sshll.u32 %s7102_s2, 6 }
 0x18a   : > { %s7840_s15 = sld [smem:[#allocation46_spill]] }
 0x18b   : > { %v2276_v0 = vld [vmem:[%s7836_s26 + $0x78] sm:$0xff]  ;;  %v2275_v1 = vld [vmem:[%s7836_s26 + $0x70] sm:$0xff]  ;;  %v2274_v2 = vld [vmem:[%s7836_s26 + $0x68] sm:$0xff]  ;;  %s7841_s4 = sld [smem:[#allocation45_spill]] }
 0x18c   : > { %2302 = vmatpush.msra.mxu0 %v2276_v0  ;;  %v2284_v3 = vld [vmem:[%s7836_s26 + $0xb8] sm:$0xff]  ;;  %v2273_v4 = vld [vmem:[%s7836_s26 + $0x60] sm:$0xff]  ;;  %v2283_v5 = vld [vmem:[%s7836_s26 + $0xb0] sm:$0xff]  ;;  %s7114_s1 = scalar_lea.vmem %s7837_s10, %s5586_s22  ;;  %s7842_s0 = sld [smem:[#allocation47_spill]] }
 0x18d   : > { %2339 = vmatpush.msra.mxu1 %v2284_v3  ;;  %v2282_v6 = vld [vmem:[%s7836_s26 + $0xa8] sm:$0xff]  ;;  %v2272_v7 = vld [vmem:[%s7836_s26 + $0x58] sm:$0xff]  ;;  %v2281_v8 = vld [vmem:[%s7836_s26 + $0xa0] sm:$0xff]  ;;  %s7843_s11 = sld [smem:[#allocation49_spill]] }
 0x18e   : > { %2303 = vmatpush.msra.mxu0 %v2275_v1  ;;  %v2271_v9 = vld [vmem:[%s7836_s26 + $0x50] sm:$0xff]  ;;  %v2270_v10 = vld [vmem:[%s7836_s26 + $0x48] sm:$0xff]  ;;  %v2233_v11 = vld [vmem:[%s7838_s18] sm:$0x3]  ;;  %s7844_s14 = sld [smem:[#allocation50_spill]] }
 0x18f   : > { %2340 = vmatpush.msra.mxu1 %v2283_v5  ;;  %v2280_v12 = vld [vmem:[%s7836_s26 + $0x98] sm:$0xff]  ;;  %v2236_v13 = vperm.slane %v2233_v11, 1  ;;  %v2247_v14 = vld [vmem:[%s7839_s7] sm:$0x3]  ;;  %v2226_v15 = vld [vmem:[%s7114_s1 + $0x8] sm:$0xff]  ;;  %v2235_v26 = vperm.slane %v2233_v11, 0 }
 0x190   : > { %2304 = vmatpush.msra.mxu0 %v2274_v2  ;;  %v2269_v16 = vld [vmem:[%s7836_s26 + $0x40] sm:$0xff]  ;;  %v2279_v17 = vld [vmem:[%s7836_s26 + $0x90] sm:$0xff]  ;;  %v2250_v18 = vperm.slane %v2247_v14, 1  ;;  %v2278_v19 = vld [vmem:[%s7836_s26 + $0x88] sm:$0xff]  ;;  %v2249_v36 = vperm.slane %v2247_v14, 0  ;;  %s7845_s28 = sld [smem:[#allocation54_spill]] }
 0x191   : > { %2341 = vmatpush.msra.mxu1 %v2282_v6  ;;  %v2240_v20 = vsub.f32 %v2226_v15, %v2236_v13  ;;  %v2268_v21 = vld [vmem:[%s7836_s26 + $0x38] sm:$0xff]  ;;  %v2277_v22 = vld [vmem:[%s7836_s26 + $0x80] sm:$0xff]  ;;  %v2267_v23 = vld [vmem:[%s7836_s26 + $0x30] sm:$0xff]  ;;  %s7846_s10 = sld [smem:[#allocation52_spill]] }
 0x192   : > { %2305 = vmatpush.msra.mxu0 %v2273_v4  ;;  %v2266_v25 = vld [vmem:[%s7836_s26 + $0x28] sm:$0xff]  ;;  %v2228_v27 = vld [vmem:[%s7114_s1 + $0x18] sm:$0xff]  ;;  %v2265_v28 = vld [vmem:[%s7836_s26 + $0x20] sm:$0xff]  ;;  %s7847_s18 = sld [smem:[#allocation53_spill]] }
 0x193   : > { %2342 = vmatpush.msra.mxu1 %v2281_v8  ;;  %v2254_v24 = vmul.f32 %v2250_v18, %v2240_v20  ;;  %v2242_v29 = vsub.f32 %v2228_v27, %v2236_v13  ;;  %v2264_v30 = vld [vmem:[%s7836_s26 + $0x18] sm:$0xff]  ;;  %v2225_v31 = vld [vmem:[%s7114_s1] sm:$0xff]  ;;  %v2263_v32 = vld [vmem:[%s7836_s26 + $0x10] sm:$0xff]  ;;  %s7848_s7 = sld [smem:[#allocation55_spill]] }
 0x194   : > { %2306 = vmatpush.msra.mxu0 %v2272_v7  ;;  %v2262_v34 = vld [vmem:[%s7836_s26 + $0x8] sm:$0xff]  ;;  %v2239_v35 = vsub.f32 %v2225_v31, %v2235_v26  ;;  %v2367_v38 = vld [vmem:[%s7840_s15 + $0x18] sm:$0xff]  ;;  %v2261_v39 = vld [vmem:[%s7836_s26] sm:$0xff]  ;;  %s7849_s22 = sld [smem:[#allocation60_spill]] }
 0x195   : > { %2343 = vmatpush.msra.mxu1 %v2280_v12  ;;  %v2256_v33 = vmul.f32 %v2250_v18, %v2242_v29  ;;  %v2230_v37 = vld [vmem:[%s7114_s1 + $0x28] sm:$0xff]  ;;  %2405 = vmatpush.msra.mxu2 %v2367_v38  ;;  %v2227_v40 = vld [vmem:[%s7114_s1 + $0x10] sm:$0xff]  ;;  %v2232_v45 = vld [vmem:[%s7114_s1 + $0x38] sm:$0xff]  ;;  %s7852_s9 = sld [smem:[#allocation63_spill]] }
 0x196   : > { %2307 = vmatpush.msra.mxu0 %v2271_v9  ;;  %v2244_v41 = vsub.f32 %v2230_v37, %v2236_v13  ;;  %v2253_v42 = vmul.f32 %v2249_v36, %v2239_v35  ;;  %v2241_v44 = vsub.f32 %v2227_v40, %v2235_v26  ;;  %v2246_v46 = vsub.f32 %v2232_v45, %v2236_v13  ;;  %v2229_v48 = vld [vmem:[%s7114_s1 + $0x20] sm:$0xff]  ;;  %v2231_v52 = vld [vmem:[%s7114_s1 + $0x30] sm:$0xff]  ;;  %v2365_v56 = vld [vmem:[%s7840_s15 + $0x8] sm:$0xff]  ;;  %s7850_s1 = sld [smem:[#allocation37_spill]] }
 0x197   : > { %2344 = vmatpush.msra.mxu1 %v2279_v17  ;;  %v2243_v50 = vsub.f32 %v2229_v48, %v2235_v26  ;;  %v2245_v53 = vsub.f32 %v2231_v52, %v2235_v26  ;;  %v2366_v55 = vld [vmem:[%s7840_s15 + $0x10] sm:$0xff]  ;;  %v2364_v57 = vld [vmem:[%s7840_s15] sm:$0xff]  ;;  %s7867_s8 = sld [smem:[#allocation99_spill]] }
 0x198   : > { %2308 = vmatpush.msra.mxu0 %v2270_v10  ;;  %v2258_v43 = vmul.f32 %v2250_v18, %v2244_v41  ;;  %v2255_v47 = vmul.f32 %v2249_v36, %v2241_v44  ;;  %v2260_v49 = vmul.f32 %v2250_v18, %v2246_v46  ;;  %2406 = vmatpush.msra.mxu2 %v2366_v55  ;;  %v5825_v59 = vld [vmem:[%s7841_s4] ss:$0 sm:$0xff]  ;;  %s7851_s4 = sld [smem:[#allocation38_spill]] }
 0x199   : > { %2345 = vmatpush.msra.mxu1 %v2278_v19  ;;  %v2257_v51 = vmul.f32 %v2249_v36, %v2243_v50  ;;  %v2259_v54 = vmul.f32 %v2249_v36, %v2245_v53  ;;  %v7177_v15 = vld [vmem:[%s7842_s0] sm:$0x3]  ;;  %s7246_s0 = sld [smem:[#allocation2 + %s6873_s23]] }
 0x19a   : > { %2309 = vmatpush.msra.mxu0 %v2269_v16  ;;  %2407 = vmatpush.msra.mxu2 %v2365_v56  ;;  %s7853_s23 = sld [smem:[#allocation62_spill]] }
 0x19b   : > { %2346 = vmatpush.msra.mxu1 %v2277_v22  ;;  %5361 = vmatpush.msk.msra.mxu3 %vm2472_vm2, %v7177_v15  ;;  %s7873_s12 = sld [smem:[#allocation88_spill]] }
 0x19c   : > { %2310 = vmatpush.msra.mxu0 %v2268_v21  ;;  %5347 = vmatmul.msk.f32.vlgmr.msra.gmra.mxu1 %vm2289_vm0, %v2254_v24  ;;  %s7874_s13 = sld [smem:[#allocation84_spill]] }
 0x19d   : > { %2408 = vmatpush.msra.mxu2 %v2364_v57  ;;  %5363 = vmatpush.msk.msrb.mxu3 %vm2472_vm2, %v7177_v15  ;;  %s7877_s15 = sld [smem:[#allocation89_spill]] }
 0x19e   : > { %2311 = vmatpush.msra.mxu0 %v2267_v23  ;;  %s7880_s17 = sld [smem:[#allocation73_spill]] }
 0x19f   : > { %s2918_s5 = sld [smem:[#allocation5 + %s7246_s0]] }
 0x1a0   : > { %2312 = vmatpush.msra.mxu0 %v2266_v25  ;;  %s2919_s6 = sld [smem:[#allocation7 + %s7246_s0]] }
 0x1a1   : > { %s7881_s19 = sld [smem:[#allocation87_spill]] }
 0x1a2   : > { %2313 = vmatpush.msra.mxu0 %v2265_v28  ;;  %s7882_s3 = sld [smem:[#allocation100_spill]] }
 0x1a3   : > { %s7887_s21 = sld [smem:[#allocation92_spill]] }
 0x1a4   : > { %2314 = vmatpush.msra.mxu0 %v2264_v30  ;;  %5348 = vmatmul.msk.f32.gmra.mxu1 %vm2289_vm0, %v2256_v33  ;;  %s7888_s24 = sld [smem:[#allocation94_spill]] }
 0x1a5   : > { %s7891_s26 = sld [smem:[#allocation75_spill]] }
 0x1a6   : > { %2315 = vmatpush.msra.mxu0 %v2263_v32 }
 0x1a8   : > { %2316 = vmatpush.msra.mxu0 %v2262_v34 }
 0x1aa   : > { %2317 = vmatpush.msra.mxu0 %v2261_v39 }
 0x1ab   : > { %2318 = vmatmul.f32.vlgmr.msra.gmra.mxu0 %v2253_v42 }
 0x1ac   : > { %5349 = vmatmul.msk.f32.gmra.mxu1 %vm2289_vm0, %v2258_v43  ;;  %5359 = vmatpush.msk.msrb.mxu0 %vm2472_vm2, %v7177_v15 }
 0x1b3   : > { %2321 = vmatmul.f32.gmra.mxu0 %v2255_v47 }
 0x1b4   : > { %5350 = vmatmul.msk.f32.gmra.mxu1 %vm2289_vm0, %v2260_v49 }
 0x1bb   : > { %2324 = vmatmul.f32.gmra.mxu0 %v2257_v51 }
 0x1c3   : > { %2327 = vmatmul.f32.gmra.mxu0 %v2259_v54 }
 0x219   : > { %v2348_v58 = vpop.f32.mrf.mxu1 }
 0x221   : > { %v2351_v63 = vpop.f32.mrf.mxu1 }
 0x228   : > { %v2319_v60 = vpop.f32.mrf.mxu0 }
 0x229   : > { %v2320_v61 = vadd.f32 %v5825_v59, %v2319_v60  ;;  %v2354_v3 = vpop.f32.mrf.mxu1 }
 0x22b   : > { %v7148_v62 = vadd.f32 %v2348_v58, %v2320_v61 }
 0x22d   : > { %5351 = vmatmul.msk.f32.vlgmr.msra.gmra.mxu2 %vm2368_vm1, %v7148_v62  ;;  %v2360_v11 = vmul.f32 %v7148_v62, %v7148_v62 }
 0x230   : > { %v2322_v0 = vpop.f32.mrf.mxu0 }
 0x231   : > { %v2323_v1 = vadd.f32 %v5825_v59, %v2322_v0  ;;  %v2357_v8 = vpop.f32.mrf.mxu1 }
 0x233   : > { %v7152_v2 = vadd.f32 %v2351_v63, %v2323_v1 }
 0x235   : > { %5352 = vmatmul.msk.f32.gmra.mxu2 %vm2368_vm1, %v7152_v2  ;;  %v2361_v12 = vmul.f32 %v7152_v2, %v7152_v2 }
 0x238   : > { %v2325_v4 = vpop.f32.mrf.mxu0 }
 0x239   : > { %v2326_v5 = vadd.f32 %v5825_v59, %v2325_v4 }
 0x23b   : > { %v7156_v6 = vadd.f32 %v2354_v3, %v2326_v5 }
 0x23d   : > { %5353 = vmatmul.msk.f32.gmra.mxu2 %vm2368_vm1, %v7156_v6  ;;  %v2362_v13 = vmul.f32 %v7156_v6, %v7156_v6 }
 0x240   : > { %v2328_v7 = vpop.f32.mrf.mxu0 }
 0x241   : > { %v2329_v9 = vadd.f32 %v5825_v59, %v2328_v7 }
 0x243   : > { %v7160_v10 = vadd.f32 %v2357_v8, %v2329_v9 }
 0x245   : > { %5354 = vmatmul.msk.f32.gmra.mxu2 %vm2368_vm1, %v7160_v10  ;;  %v2363_v14 = vmul.f32 %v7160_v10, %v7160_v10 }
 0x24d   : > { %5355 = vmatmul.msk.f32.gmra.mxu2 %vm2368_vm1, %v2360_v11 }
 0x255   : > { %5356 = vmatmul.msk.f32.gmra.mxu2 %vm2368_vm1, %v2361_v12 }
 0x25d   : > { %5357 = vmatmul.msk.f32.gmra.mxu2 %vm2368_vm1, %v2362_v13 }
 0x265   : > { %5358 = vmatmul.msk.f32.gmra.mxu2 %vm2368_vm1, %v2363_v14 }
 0x2b0   : > { %v2410_v16 = vpop.f32.mrf.mxu2 }
 0x2b1   : > { %v2435_v18 = vsel %vm2434_vm3, %v2410_v16, 0.0 }
 0x2b8   : > { %v2413_v17 = vpop.f32.mrf.mxu2 }
 0x2b9   : > { %v2436_v19 = vsel %vm2434_vm3, %v2413_v17, 0.0 }
 0x2ba   : > { %v2437_v20 = vadd.f32 %v2436_v19, %v2435_v18 }
 0x2bc   : > { %v2438_v21 = vrot.slane %v2437_v20, 4 }
 0x2be   : > { %v2439_v22 = vadd.f32 %v2438_v21, %v2437_v20 }
 0x2c0   : > { %v2440_v23 = vrot.slane %v2439_v22, 2  ;;  %v2416_v24 = vpop.f32.mrf.mxu2 }
 0x2c1   : > { %v2525_v32 = vsel %vm2434_vm3, %v2416_v24, 0.0 }
 0x2c2   : > { %v2441_v25 = vadd.f32 %v2440_v23, %v2439_v22 }
 0x2c4   : > { %v2442_v26 = vrot.slane %v2441_v25, 1 }
 0x2c6   : > { %v2443_v27 = vadd.f32 %v2442_v26, %v2441_v25 }
 0x2c8   : > { %v2419_v28 = vpop.f32.mrf.mxu2  ;;  %v2453_v29 = vmul.f32 0.00390625, %v2443_v27 }
 0x2c9   : > { %v2526_v31 = vsel %vm2434_vm3, %v2419_v28, 0.0 }
 0x2ca   : > { %5360 = vmatmul.msk.f32.vlgmr.msrb.gmra.mxu0 %vm2434_vm3, %v2453_v29  ;;  %v2527_v33 = vadd.f32 %v2526_v31, %v2525_v32  ;;  %v2455_v49 = vmul.f32 %v2453_v29, %v2453_v29 }
 0x2cc   : > { %v2528_v38 = vrot.slane %v2527_v33, 4 }
 0x2ce   : > { %v2529_v41 = vadd.f32 %v2528_v38, %v2527_v33 }
 0x2d0   : > { %v2422_v30 = vpop.f32.mrf.mxu2  ;;  %v2530_v45 = vrot.slane %v2529_v41, 2 }
 0x2d1   : > { %v2444_v35 = vsel %vm2434_vm3, %v2422_v30, 0.0 }
 0x2d2   : > { %v2531_v48 = vadd.f32 %v2530_v45, %v2529_v41  ;;  %v2611_v45 = vld [vmem:[%s7843_s11 + $0x18] sm:$0xff] }
 0x2d4   : > { %v2532_v56 = vrot.slane %v2531_v48, 1 }
 0x2d6   : > { %v2533_v60 = vadd.f32 %v2532_v56, %v2531_v48  ;;  %v2710_v48 = vld [vmem:[%s7844_s14 + $0x8] sm:$0xff] }
 0x2d8   : > { %v2425_v34 = vpop.f32.mrf.mxu2  ;;  %v2543_v3 = vmul.f32 0.00390625, %v2533_v60 }
 0x2d9   : > { %v2445_v36 = vsel %vm2434_vm3, %v2425_v34, 0.0 }
 0x2da   : > { %v2446_v37 = vadd.f32 %v2445_v36, %v2444_v35  ;;  %v2545_v9 = vmul.f32 %v2543_v3, %v2543_v3  ;;  %v2521_v36 = vld [vmem:[#allocation9] sm:$0x1] }
 0x2dc   : > { %v2447_v39 = vrot.slane %v2446_v37, 4 }
 0x2de   : > { %v2448_v40 = vadd.f32 %v2447_v39, %v2446_v37  ;;  %v2608_v37 = vld [vmem:[%s7843_s11] sm:$0xff] }
 0x2e0   : > { %v2449_v42 = vrot.slane %v2448_v40, 2  ;;  %v2428_v43 = vpop.f32.mrf.mxu2 }
 0x2e1   : > { %v2534_v52 = vsel %vm2434_vm3, %v2428_v43, 0.0  ;;  %v2609_v43 = vld [vmem:[%s7843_s11 + $0x8] sm:$0xff] }
 0x2e2   : > { %v2450_v44 = vadd.f32 %v2449_v42, %v2448_v40 }
 0x2e4   : > { %v2451_v46 = vrot.slane %v2450_v44, 1 }
 0x2e6   : > { %v2452_v47 = vadd.f32 %v2451_v46, %v2450_v44  ;;  %v2610_v44 = vld [vmem:[%s7843_s11 + $0x10] sm:$0xff]  ;;  %v2712_v46 = vld [vmem:[%s7844_s14 + $0x18] sm:$0xff] }
 0x2e7   : > { %2741 = vmatpush.msra.mxu0 %v2712_v46 }
 0x2e8   : > { %v2454_v50 = vmul.f32 0.00390625, %v2452_v47  ;;  %v2431_v51 = vpop.f32.mrf.mxu2  ;;  %v2711_v47 = vld [vmem:[%s7844_s14 + $0x10] sm:$0xff] }
 0x2e9   : > { %v2535_v53 = vsel %vm2434_vm3, %v2431_v51, 0.0  ;;  %2742 = vmatpush.msra.mxu0 %v2711_v47 }
 0x2ea   : > { %v2536_v54 = vadd.f32 %v2535_v53, %v2534_v52  ;;  %v2456_v55 = vsub.f32 %v2454_v50, %v2455_v49  ;;  %v2709_v49 = vld [vmem:[%s7844_s14] sm:$0xff] }
 0x2eb   : > { %2743 = vmatpush.msra.mxu0 %v2710_v48 }
 0x2ec   : > { %v2537_v57 = vrot.slane %v2536_v54, 4  ;;  %v2457_v58 = vadd.f32 1e-05, %v2456_v55 }
 0x2ed   : > { %2744 = vmatpush.msra.mxu0 %v2709_v49 }
 0x2ee   : > { %v2538_v59 = vadd.f32 %v2537_v57, %v2536_v54  ;;  %5881 = vrsqrt.f32 %v2457_v58  ;;  %vm2464_vm5 = vweird.f32 %v2457_v58 }
 0x2f0   : > { %v2539_v61 = vrot.slane %v2538_v59, 2 }
 0x2f2   : > { %v2540_v63 = vadd.f32 %v2539_v61, %v2538_v59 }
 0x2f4   : > { %v5882_v0 = vpop.eup %5881  ;;  %v2541_v1 = vrot.slane %v2540_v63, 1 }
 0x2f5   : > { %v2459_v4 = vmul.f32 %v5882_v0, %v2457_v58  ;;  %vm2465_vm4 = vweird.f32 %v5882_v0 }
 0x2f6   : > { %v2542_v5 = vadd.f32 %v2541_v1, %v2540_v63  ;;  %vm2466_vm6 = vmor %vm2464_vm5, %vm2465_vm4  ;;  %vm3658_vm4 = vcmask 1042432  }
 0x2f7   : > { %v2460_v7 = vmul.f32 %v5882_v0, %v2459_v4 }
 0x2f8   : > { %v2544_v8 = vmul.f32 0.00390625, %v2542_v5 }
 0x2f9   : > { %v2461_v11 = vmul.f32 0.5, %v2460_v7 }
 0x2fa   : > { %v2546_v12 = vsub.f32 %v2544_v8, %v2545_v9  ;;  %v5826_v8 = vld [vmem:[#allocation11] ss:$0 sm:$0xff] }
 0x2fb   : > { %v2462_v13 = vsub.f32 1.5, %v2461_v11 }
 0x2fc   : > { %v2547_v14 = vadd.f32 1e-05, %v2546_v12 }
 0x2fd   : > { %v2463_v16 = vmul.f32 %v5882_v0, %v2462_v13 }
 0x2fe   : > { %5883 = vrsqrt.f32 %v2547_v14  ;;  %vm2554_vm8 = vweird.f32 %v2547_v14 }
 0x2ff   : > { %v2467_v17 = vsel %vm2466_vm6, %v5882_v0, %v2463_v16 }
 0x300   : > { %5362 = vmatmul.msk.f32.vlgmr.msra.gmra.mxu3 %vm2434_vm3, %v2467_v17 }
 0x301   : > { %5365 = vmatpush.msk.msra.mxu3 %vm2472_vm2, %v7177_v15  ;;  %v2519_v15 = vld [vmem:[#allocation8] sm:$0x1] }
 0x304   : > { %v5884_v18 = vpop.eup %5883 }
 0x305   : > { %v2549_v19 = vmul.f32 %v5884_v18, %v2547_v14  ;;  %vm2555_vm7 = vweird.f32 %v5884_v18 }
 0x306   : > { %vm2556_vm9 = vmor %vm2554_vm8, %vm2555_vm7  ;;  %vm3643_vm8 = vcmask 23552  }
 0x307   : > { %v2550_v20 = vmul.f32 %v5884_v18, %v2549_v19 }
 0x308   : > { %5364 = vmatmul.msk.f32.vlgmr.msrb.gmra.mxu3 %vm2434_vm3, %v2543_v3 }
 0x309   : > { %v2551_v21 = vmul.f32 0.5, %v2550_v20 }
 0x30b   : > { %v2552_v22 = vsub.f32 1.5, %v2551_v21 }
 0x30d   : > { %v2553_v23 = vmul.f32 %v5884_v18, %v2552_v22 }
 0x30f   : > { %v2557_v24 = vsel %vm2556_vm9, %v5884_v18, %v2553_v23 }
 0x310   : > { %5366 = vmatmul.msk.f32.vlgmr.msra.gmra.mxu3 %vm2434_vm3, %v2557_v24 }
 0x347   : > { %v2493_v27 = vpop.f32.mrf.mxu0 }
 0x383   : > { %v2516_v25 = vpop.f32.mrf.mxu3 }
 0x384   : > { %v2522_v28 = vmul.f32 %v2516_v25, %v2493_v27  ;;  %v2520_v32 = vmul.f32 %v2519_v15, %v2516_v25 }
 0x386   : > { %v2523_v33 = vmul.f32 %v2522_v28, %v2519_v15 }
 0x388   : > { %v2524_v40 = vsub.f32 %v2521_v36, %v2523_v33 }
 0x38b   : > { %v2578_v26 = vpop.f32.mrf.mxu3 }
 0x393   : > { %v2601_v29 = vpop.f32.mrf.mxu3 }
 0x394   : > { %v2604_v30 = vmul.f32 %v2601_v29, %v2519_v15  ;;  %v2605_v31 = vmul.f32 %v2601_v29, %v2578_v26 }
 0x396   : > { %v2606_v34 = vmul.f32 %v2605_v31, %v2519_v15  ;;  %v2613_v35 = vrot.slane %v2604_v30, 7 }
 0x398   : > { %v2607_v38 = vsub.f32 %v2521_v36, %v2606_v34  ;;  %v2616_v39 = vsel %vm2615_vm10, %v2520_v32, %v2613_v35 }
 0x399   : > { %5367 = vmatpush.msk.msrb.mxu3 %vm2472_vm2, %v2616_v39 }
 0x39a   : > { %5368 = vmatmul.msk.f32.vlgmr.msrb.gmra.mxu3 %vm2434_vm3, %v2608_v37  ;;  %v2662_v41 = vperm.slane %v2607_v38, 0 }
 0x39c   : > { %v2664_v42 = vsel %vm2615_vm10, %v2524_v40, %v2662_v41 }
 0x39d   : > { %5372 = vmatpush.msk.msrb.mxu1 %vm2472_vm2, %v2664_v42  ;;  %5587 = vmatpush.msk.msra.mxu3 %vm2472_vm2, %v2664_v42 }
 0x39e   : > { %5373 = vmatmul.msk.f32.vlgmr.msrb.gmra.mxu1 %vm2434_vm3, %v2608_v37 }
 0x3a2   : > { %5369 = vmatmul.msk.f32.gmra.mxu3 %vm2434_vm3, %v2609_v43 }
 0x3a6   : > { %5374 = vmatmul.msk.f32.gmra.mxu1 %vm2434_vm3, %v2609_v43 }
 0x3aa   : > { %5370 = vmatmul.msk.f32.gmra.mxu3 %vm2434_vm3, %v2610_v44 }
 0x3b2   : > { %5371 = vmatmul.msk.f32.gmra.mxu3 %vm2434_vm3, %v2611_v45 }
 0x3ba   : > { %5375 = vmatmul.msk.f32.vlgmr.msra.gmra.mxu3 %vm2434_vm3, %v2610_v44 }
 0x3c2   : > { %5376 = vmatmul.msk.f32.gmra.mxu3 %vm2434_vm3, %v2611_v45  ;;  %vm3249_vm3 = vcmask 64512  }
 0x41b   : > { %v2685_v50 = vpop.f32.mrf.mxu1 }
 0x41d   : > { %v2649_v51 = vpop.f32.mrf.mxu3 }
 0x41e   : > { %v2697_v52 = vmul.f32 %v2649_v51, %v7148_v62 }
 0x420   : > { %v2701_v53 = vadd.f32 %v2697_v52, %v2685_v50  ;;  %v2862_v52 = vld [vmem:[%s7845_s28 + $0x8] sm:$0xff] }
 0x421   : > { %2905 = vmatpush.msra.mxu1 %v2862_v52 }
 0x422   : > { %v2705_v54 = vmax.f32 %v2701_v53, 0.0 }
 0x423   : > { %v2688_v56 = vpop.f32.mrf.mxu1 }
 0x424   : > { %5377 = vmatmul.msk.f32.vlgmr.msra.gmra.mxu0 %vm2368_vm1, %v2705_v54 }
 0x425   : > { %v2652_v55 = vpop.f32.mrf.mxu3 }
 0x426   : > { %v2698_v57 = vmul.f32 %v2652_v55, %v7152_v2 }
 0x428   : > { %v2702_v58 = vadd.f32 %v2698_v57, %v2688_v56 }
 0x42a   : > { %v2706_v59 = vmax.f32 %v2702_v58, 0.0 }
 0x42c   : > { %5378 = vmatmul.msk.f32.gmra.mxu0 %vm2368_vm1, %v2706_v59 }
 0x42d   : > { %v2655_v60 = vpop.f32.mrf.mxu3 }
 0x42e   : > { %v2699_v63 = vmul.f32 %v2655_v60, %v7156_v6 }
 0x435   : > { %v2658_v61 = vpop.f32.mrf.mxu3 }
 0x436   : > { %v2700_v62 = vmul.f32 %v2658_v61, %v7160_v10 }
 0x43d   : > { %v2691_v0 = vpop.f32.mrf.mxu3 }
 0x43e   : > { %v2703_v1 = vadd.f32 %v2699_v63, %v2691_v0 }
 0x440   : > { %v2707_v3 = vmax.f32 %v2703_v1, 0.0 }
 0x442   : > { %5379 = vmatmul.msk.f32.gmra.mxu0 %vm2368_vm1, %v2707_v3 }
 0x445   : > { %v2694_v4 = vpop.f32.mrf.mxu3 }
 0x446   : > { %v2704_v5 = vadd.f32 %v2700_v62, %v2694_v4 }
 0x448   : > { %v2708_v7 = vmax.f32 %v2704_v5, 0.0 }
 0x44a   : > { %5380 = vmatmul.msk.f32.gmra.mxu0 %vm2368_vm1, %v2708_v7 }
 0x4a1   : > { %v2746_v2 = vpop.f32.mrf.mxu0 }
 0x4a2   : > { %v2747_v9 = vadd.f32 %v5826_v8, %v2746_v2  ;;  %v2813_v2 = vld [vmem:[%s7846_s10] sm:$0x3]  ;;  %s5345_s10 = sshll.u32 %s7102_s2, 3 }
 0x4a4   : > { %v2759_v6 = vsel %vm2758_vm11, %v2747_v9, -inf }
 0x4a9   : > { %v2749_v11 = vpop.f32.mrf.mxu0 }
 0x4aa   : > { %v2750_v12 = vadd.f32 %v5826_v8, %v2749_v11  ;;  %v2863_v11 = vld [vmem:[%s7848_s7] sm:$0xff] }
 0x4ac   : > { %v2760_v13 = vsel %vm2758_vm11, %v2750_v12, -inf }
 0x4ad   : > { %v2761_v14 = vmax.f32 %v2759_v6, %v2760_v13  ;;  %v3058_v6 = vld [vmem:[%s7849_s22] sm:$0xf]  ;;  %v5827_v13 = vld [vmem:[#allocation14] ss:$0 sm:$0xff]  ;;  %s7856_s22 = sld [smem:[#allocation65_spill]] }
 0x4af   : > { %v2762_v16 = vrot.slane %v2761_v14, 4 }
 0x4b1   : > { %v2763_v17 = vmax.f32 %v2761_v14, %v2762_v16 }
 0x4b3   : > { %v2764_v18 = vrot.slane %v2763_v17, 2 }
 0x4b5   : > { %v2765_v10 = vmax.f32 %v2763_v17, %v2764_v18  ;;  %v5828_v17 = vld [vmem:[#allocation15] ss:$0 sm:$0xff] }
 0x4b7   : > { %v2766_v19 = vrot.slane %v2765_v10, 1 }
 0x4b9   : > { %v2767_v21 = vmax.f32 %v2765_v10, %v2766_v19  ;;  %v2932_v19 = vstv %s2918_s5  ;;  %s7854_s5 = sld [smem:[#allocation66_spill]] }
 0x4bb   : > { %v2768_v22 = vsub.f32 %v2747_v9, %v2767_v21  ;;  %v2769_v23 = vsub.f32 %v2750_v12, %v2767_v21  ;;  %v2864_v9 = vld [vmem:[%s7848_s7 + $0x8] sm:$0xff]  ;;  %v2861_v12 = vld [vmem:[%s7845_s28] sm:$0xff]  ;;  %s7253_s7 = scalar_lea.vmem %s7851_s4, %s5345_s10  ;;  %s7858_s4 = sld [smem:[#allocation77_spill]] }
 0x4bc   : > { %2906 = vmatpush.msra.mxu1 %v2861_v12  ;;  %v2931_v10 = vld [vmem:[%s7253_s7] sm:$0xff]  ;;  %s7894_s28 = sld [smem:[#allocation95_spill]] }
 0x4bd   : > { %v2770_v27 = vmul.f32 1.442695, %v2768_v22  ;;  %v2772_v28 = vmul.f32 1.442695, %v2769_v23 }
 0x4be   : > { %5387 = vmatpush.msk.msrb.mxu1 %vm3067_vm12, %v3058_v6 }
 0x4bf   : > { %v2752_v20 = vpop.f32.mrf.mxu0  ;;  %5885 = vpow2.f32 %v2770_v27  ;;  %v2941_v27 = vld [vmem:[%s7852_s9 + $0x10] sm:$0xff] }
 0x4c0   : > { %v2753_v24 = vadd.f32 %v5826_v8, %v2752_v20  ;;  %5887 = vpow2.f32 %v2772_v28  ;;  %v2934_v20 = vstv %s2919_s6  ;;  %v2940_v28 = vld [vmem:[%s7852_s9 + $0x8] sm:$0xff]  ;;  %s7855_s6 = sld [smem:[#allocation59_spill]] }
 0x4c1   : > { %v3165_v6 = vld [vmem:[%s7858_s4] sm:$0xff] }
 0x4c2   : > { %v2786_v15 = vsel %vm2758_vm11, %v2753_v24, -inf }
 0x4c5   : > { %v5886_v34 = vpop.eup %5885 }
 0x4c6   : > { %v5888_v36 = vpop.eup %5887  ;;  %v2774_v38 = vsel %vm2758_vm11, %v5886_v34, 0.0 }
 0x4c7   : > { %v2755_v25 = vpop.f32.mrf.mxu0  ;;  %v2775_v39 = vsel %vm2758_vm11, %v5888_v36, 0.0 }
 0x4c8   : > { %v2756_v26 = vadd.f32 %v5826_v8, %v2755_v25  ;;  %v2776_v43 = vadd.f32 %v2775_v39, %v2774_v38  ;;  %v2837_v8 = vld [vmem:[%s7847_s18] sm:$0x3]  ;;  %s2217_s18 = scalar_lea.vmem %s7850_s1, %s5345_s10  ;;  %s7857_s1 = sld [smem:[#allocation76_spill]] }
 0x4c9   : > { %v2920_v14 = vld [vmem:[%s2217_s18] sm:$0xff]  ;;  %s7859_s10 = sld [smem:[#allocation78_spill]]  ;;  %s2937_s18 = scalar_lea.vmem %s7855_s6, %s7246_s0 }
 0x4ca   : > { %v2787_v29 = vsel %vm2758_vm11, %v2756_v26, -inf  ;;  %v2777_v46 = vrot.slane %v2776_v43, 4  ;;  %v2925_v16 = vsub.f32 %v2920_v14, %v5827_v13  ;;  %s7860_s0 = sld [smem:[#allocation68_spill]]  ;;  %v5404_v14 = vld [vmem:[%s7858_s4 + $0x38] sm:$0xff] }
 0x4cb   : > { %v2788_v30 = vmax.f32 %v2786_v15, %v2787_v29  ;;  %v2939_v15 = vld [vmem:[%s7852_s9] sm:$0xff]  ;;  %s7862_s6 = sld [smem:[#allocation71_spill]] }
 0x4cc   : > { %v2778_v47 = vadd.f32 %v2777_v46, %v2776_v43  ;;  %v2930_v18 = vmul.f32 %v5828_v17, %v2925_v16  ;;  %v5403_v17 = vld [vmem:[%s7858_s4 + $0x30] sm:$0xff] }
 0x4cd   : > { %v2789_v31 = vrot.slane %v2788_v30, 4 }
 0x4ce   : > { %v2779_v54 = vrot.slane %v2778_v47, 2  ;;  %v2933_v23 = vmul.f32 %v2932_v19, %v2930_v18  ;;  %v3134_v12 = vld [vmem:[%s7857_s1] sm:$0xff] }
 0x4cf   : > { %v2790_v32 = vmax.f32 %v2788_v30, %v2789_v31  ;;  %v5829_v30 = vld [vmem:[#allocation12] ss:$0 sm:$0xff]  ;;  %v5830_v31 = vld [vmem:[#allocation17] ss:$0 sm:$0xff] }
 0x4d0   : > { %v2780_v57 = vadd.f32 %v2779_v54, %v2778_v47  ;;  %v2977_v47 = vld [vmem:[%s7854_s5 + $0x8] sm:$0xff]  ;;  %v3193_v13 = vld [vmem:[%s7859_s10] sm:$0xff] }
 0x4d1   : > { %v2791_v33 = vrot.slane %v2790_v32, 2 }
 0x4d2   : > { %v2781_v60 = vrot.slane %v2780_v57, 1 }
 0x4d3   : > { %v2792_v35 = vmax.f32 %v2790_v32, %v2791_v33 }
 0x4d4   : > { %v2782_v0 = vadd.f32 %v2781_v60, %v2780_v57  ;;  %v5831_v57 = vld [vmem:[#allocation18] ss:$0 sm:$0xff]  ;;  %v2938_v60 = vld [vmem:[%s2937_s18] sm:$0x1] }
 0x4d5   : > { %v2793_v37 = vrot.slane %v2792_v35, 1 }
 0x4d7   : > { %v2794_v40 = vmax.f32 %v2792_v35, %v2793_v37  ;;  %v3091_v35 = vld [vmem:[%s7853_s23] sm:$0xff]  ;;  %s7861_s23 = sld [smem:[#allocation70_spill]] }
 0x4d9   : > { %v2795_v41 = vsub.f32 %v2753_v24, %v2794_v40  ;;  %v2796_v42 = vsub.f32 %v2756_v26, %v2794_v40  ;;  %v2935_v24 = vmul.f32 %v2934_v20, %v2931_v10  ;;  %v2942_v26 = vld [vmem:[%s7852_s9 + $0x18] sm:$0xff]  ;;  %v5402_v10 = vld [vmem:[%s7858_s4 + $0x28] sm:$0xff]  ;;  %v5401_v20 = vld [vmem:[%s7858_s4 + $0x20] sm:$0xff] }
 0x4db   : > { %v2797_v44 = vmul.f32 1.442695, %v2795_v41  ;;  %v2799_v45 = vmul.f32 1.442695, %v2796_v42  ;;  %v2936_v25 = vadd.f32 %v2935_v24, %v2933_v23  ;;  %v6518_v41 = vmov 32.0   ;;  %v3031_v23 = vld [vmem:[%s7860_s0 + $0x68] sm:$0xff] }
 0x4dd   : > { %5889 = vpow2.f32 %v2797_v44  ;;  %v2979_v44 = vld [vmem:[%s7854_s5 + $0x18] sm:$0xff] }
 0x4de   : > { %5891 = vpow2.f32 %v2799_v45  ;;  %v2978_v45 = vld [vmem:[%s7854_s5 + $0x10] sm:$0xff] }
 0x4e3   : > { %v5890_v48 = vpop.eup %5889 }
 0x4e4   : > { %v5892_v49 = vpop.eup %5891  ;;  %v2801_v50 = vsel %vm2758_vm11, %v5890_v48, 0.0 }
 0x4e5   : > { %v2802_v51 = vsel %vm2758_vm11, %v5892_v49, 0.0 }
 0x4e6   : > { %v2803_v53 = vadd.f32 %v2802_v51, %v2801_v50 }
 0x4e8   : > { %v2804_v55 = vrot.slane %v2803_v53, 4 }
 0x4ea   : > { %v2805_v56 = vadd.f32 %v2804_v55, %v2803_v53 }
 0x4ec   : > { %v2806_v58 = vrot.slane %v2805_v56, 2 }
 0x4ee   : > { %v2807_v59 = vadd.f32 %v2806_v58, %v2805_v56 }
 0x4f0   : > { %v2808_v61 = vrot.slane %v2807_v59, 1 }
 0x4f2   : > { %v2809_v63 = vadd.f32 %v2808_v61, %v2807_v59 }
 0x4f4   : > { %5893 = vrcp.f32 %v2809_v63  ;;  %v2974_v63 = vld [vmem:[%s7856_s22] sm:$0x7]  ;;  %s7863_s22 = sld [smem:[#allocation81_spill]] }
 0x4f5   : > { %5895 = vrcp.f32 %v2782_v0 }
 0x4f6   : > { %5897 = vrcp.f32 %v6518_v41 }
 0x4fa   : > { %v5894_v1 = vpop.eup %5893  ;;  %s7864_s18 = smov %s7863_s22 }
 0x4fb   : > { %v2812_v3 = vmul.f32 %v5894_v1, %v5892_v49  ;;  %v5896_v62 = vpop.eup %5895  ;;  %v2811_v4 = vmul.f32 %v5894_v1, %v5890_v48  ;;  %v2976_v48 = vld [vmem:[%s7854_s5] sm:$0xff]  ;;  %s7865_s5 = sld [smem:[#allocation80_spill]] }
 0x4fc   : > { %v2785_v5 = vmul.f32 %v5896_v62, %v5888_v36  ;;  %v2784_v7 = vmul.f32 %v5896_v62, %v5886_v34  ;;  %v5898_v42 = vpop.eup %5897  ;;  %v3168_v62 = vld [vmem:[%s7858_s4 + $0x18] sm:$0xff] }
 0x4fd   : > { %2829 = vmatpush.msrb.mxu3 %v2812_v3  ;;  %2853 = vmatpush.msrb.mxu2 %v2812_v3  ;;  %v3101_v43 = vmul.f32 32.0, %v5898_v42  ;;  %vm3105_vm14 = vweird.f32 %v5898_v42  ;;  %v3137_v3 = vld [vmem:[%s7857_s1 + $0x18] sm:$0xff] }
 0x4ff   : > { %2830 = vmatpush.msrb.mxu3 %v2811_v4  ;;  %2854 = vmatpush.msrb.mxu2 %v2811_v4  ;;  %v3102_v46 = vsub.f32 1.0, %v3101_v43  ;;  %v3196_v4 = vld [vmem:[%s7859_s10 + $0x18] sm:$0xff] }
 0x501   : > { %2831 = vmatpush.msrb.mxu3 %v2785_v5  ;;  %2855 = vmatpush.msrb.mxu2 %v2785_v5  ;;  %v3103_v49 = vmul.f32 %v5898_v42, %v3102_v46  ;;  %v3136_v5 = vld [vmem:[%s7857_s1 + $0x10] sm:$0xff]  ;;  %v3021_v46 = vld [vmem:[%s7860_s0 + $0x18] sm:$0xff] }
 0x503   : > { %2832 = vmatpush.msrb.mxu3 %v2784_v7  ;;  %2856 = vmatpush.msrb.mxu2 %v2784_v7  ;;  %v3104_v50 = vadd.f32 %v5898_v42, %v3103_v49  ;;  %v3167_v7 = vld [vmem:[%s7858_s4 + $0x10] sm:$0xff] }
 0x504   : > { %5381 = vmatmul.msk.f32.vlgmr.msrb.gmra.mxu3 %vm2368_vm1, %v2813_v2  ;;  %5382 = vmatmul.msk.f32.vlgmr.msrb.gmra.mxu2 %vm2368_vm1, %v2837_v8  ;;  %v3195_v2 = vld [vmem:[%s7859_s10 + $0x10] sm:$0xff]  ;;  %v3135_v8 = vld [vmem:[%s7857_s1 + $0x8] sm:$0xff] }
 0x505   : > { %2882 = vmatpush.msra.mxu3 %v2864_v9  ;;  %2962 = vmatpush.msra.mxu2 %v2942_v26  ;;  %v7273_v51 = vsel %vm3105_vm14, %v5898_v42, %v3104_v50  ;;  %v3166_v9 = vld [vmem:[%s7858_s4 + $0x8] sm:$0xff]  ;;  %v3030_v26 = vld [vmem:[%s7860_s0 + $0x60] sm:$0xff]  ;;  %v3020_v49 = vld [vmem:[%s7860_s0 + $0x10] sm:$0xff] }
 0x506   : > { %v3023_v42 = vld [vmem:[%s7860_s0 + $0x28] sm:$0xff] }
 0x507   : > { %2883 = vmatpush.msra.mxu3 %v2863_v11  ;;  %2963 = vmatpush.msra.mxu2 %v2941_v27  ;;  %v3194_v11 = vld [vmem:[%s7859_s10 + $0x8] sm:$0xff] }
 0x509   : > { %2964 = vmatpush.msra.mxu2 %v2940_v28  ;;  %2999 = vmatpush.msrb.mxu3 %v2979_v44  ;;  %v3029_v28 = vld [vmem:[%s7860_s0 + $0x58] sm:$0xff]  ;;  %v5834_v44 = vld [vmem:[#allocation20] ss:$0 sm:$0xff] }
 0x50b   : > { %2965 = vmatpush.msra.mxu2 %v2939_v15  ;;  %3000 = vmatpush.msrb.mxu3 %v2978_v45  ;;  %v3022_v45 = vld [vmem:[%s7860_s0 + $0x20] sm:$0xff] }
 0x50d   : > { %3001 = vmatpush.msrb.mxu3 %v2977_v47  ;;  %3157 = vmatpush.msrb.mxu2 %v3137_v3 }
 0x50f   : > { %3002 = vmatpush.msrb.mxu3 %v2976_v48  ;;  %3158 = vmatpush.msrb.mxu2 %v3136_v5  ;;  %v5835_v5 = vld [vmem:[%s7863_s22] ss:$0 sm:$0xff]  ;;  %s7868_s22 = sld [smem:[#allocation82_spill]] }
 0x511   : > { %3159 = vmatpush.msrb.mxu2 %v3135_v8  ;;  %v5837_v8 = vld [vmem:[%s7865_s5] ss:$0 sm:$0xff] }
 0x513   : > { %3160 = vmatpush.msrb.mxu2 %v3134_v12  ;;  %v5838_v12 = vld [vmem:[%s7865_s5 + $0x1] ss:$0 sm:$0xff] }
 0x515   : > { %s7869_s9 = smov %s7868_s22 }
 0x587   : > { %v2834_v21 = vpop.f32.mrf.mxu3  ;;  %v2858_v22 = vpop.f32.mrf.mxu2 }
 0x588   : > { %5383 = vmatmul.msk.f32.vlgmr.msra.gmra.mxu3 %vm2758_vm11, %v2858_v22  ;;  %5384 = vmatmul.msk.f32.vlgmr.msra.gmra.mxu1 %vm2758_vm11, %v2834_v21  ;;  %v3033_v21 = vld [vmem:[%s7860_s0 + $0x78] sm:$0xff]  ;;  %v3032_v22 = vld [vmem:[%s7860_s0 + $0x70] sm:$0xff] }
 0x589   : > { %3185 = vmatpush.msra.mxu3 %v3168_v62  ;;  %3213 = vmatpush.msra.mxu1 %v3196_v4 }
 0x58a   : > { %3038 = vmatpush.msrb.mxu0 %v3033_v21 }
 0x58b   : > { %3186 = vmatpush.msra.mxu3 %v3167_v7  ;;  %3214 = vmatpush.msra.mxu1 %v3195_v2 }
 0x58c   : > { %3039 = vmatpush.msrb.mxu0 %v3032_v22  ;;  %v7353_v22 = vld [vmem:[%s7867_s8] sm:$0xff]  ;;  %s7870_s8 = sld [smem:[#allocation85_spill]] }
 0x58d   : > { %3187 = vmatpush.msra.mxu3 %v3166_v9  ;;  %3215 = vmatpush.msra.mxu1 %v3194_v11 }
 0x58e   : > { %3040 = vmatpush.msrb.mxu0 %v3031_v23 }
 0x58f   : > { %3188 = vmatpush.msra.mxu3 %v3165_v6  ;;  %3216 = vmatpush.msra.mxu1 %v3193_v13 }
 0x590   : > { %5388 = vmatmul.msk.f32.vlgmr.msrb.gmra.mxu1 %vm3063_vm13, %v2936_v25  ;;  %3041 = vmatpush.msrb.mxu0 %v3030_v26  ;;  %v5841_v26 = vld [vmem:[%s7864_s18 + $0x1] ss:$0 sm:$0xff] }
 0x591   : > { %3338 = vmatpush.msrb.mxu1 %v5404_v14  ;;  %v5410_v14 = vld [vmem:[%s7859_s10 + $0x38] sm:$0xff] }
 0x592   : > { %3042 = vmatpush.msrb.mxu0 %v3029_v28 }
 0x593   : > { %3339 = vmatpush.msrb.mxu1 %v5403_v17 }
 0x595   : > { %3340 = vmatpush.msrb.mxu1 %v5402_v10  ;;  %v5409_v10 = vld [vmem:[%s7859_s10 + $0x30] sm:$0xff] }
 0x597   : > { %3341 = vmatpush.msrb.mxu1 %v5401_v20  ;;  %v5407_v20 = vld [vmem:[%s7859_s10 + $0x20] sm:$0xff] }
 0x605   : > { %v2908_v29 = vpop.f32.mrf.mxu1 }
 0x60b   : > { %v2885_v32 = vpop.f32.mrf.mxu3 }
 0x60c   : > { %v2909_v33 = vadd.f32 %v2908_v29, %v2885_v32  ;;  %v3028_v29 = vld [vmem:[%s7860_s0 + $0x50] sm:$0xff] }
 0x60d   : > { %v3088_v34 = vpop.f32.mrf.mxu1  ;;  %3043 = vmatpush.msrb.mxu0 %v3028_v29 }
 0x60e   : > { %v2915_v36 = vadd.f32 %v5829_v30, %v2909_v33  ;;  %v3089_v37 = vadd.f32 %v5830_v31, %v3088_v34  ;;  %v3027_v31 = vld [vmem:[%s7860_s0 + $0x48] sm:$0xff]  ;;  %v3026_v33 = vld [vmem:[%s7860_s0 + $0x40] sm:$0xff] }
 0x60f   : > { %3044 = vmatpush.msrb.mxu0 %v3027_v31  ;;  %v5832_v34 = vld [vmem:[%s7861_s23] ss:$0 sm:$0xff] }
 0x610   : > { %v2916_v38 = vmax.f32 %v2915_v36, 0.0  ;;  %v7264_v39 = vadd.f32 %v3091_v35, %v3089_v37  ;;  %v3025_v36 = vld [vmem:[%s7860_s0 + $0x38] sm:$0xff]  ;;  %v5833_v37 = vld [vmem:[%s7862_s6] ss:$0 sm:$0xff] }
 0x611   : > { %3045 = vmatpush.msrb.mxu0 %v3026_v33  ;;  %v3285_v33 = vld [vmem:[%s7868_s22 + $0x8] sm:$0xff]  ;;  %s7871_s22 = sld [smem:[#allocation86_spill]] }
 0x612   : > { %5385 = vmatmul.msk.f32.vlgmr.msra.gmra.mxu2 %vm2368_vm1, %v2916_v38  ;;  %v3097_v40 = vsel %vm2368_vm1, %v7264_v39, 0.0 }
 0x613   : > { %3098 = vadd.xlane.f32.xlu0 %v3097_v40  ;;  %3046 = vmatpush.msrb.mxu0 %v3025_v36  ;;  %v3024_v40 = vld [vmem:[%s7860_s0 + $0x30] sm:$0xff] }
 0x615   : > { %3047 = vmatpush.msrb.mxu0 %v3024_v40 }
 0x617   : > { %3048 = vmatpush.msrb.mxu0 %v3023_v42  ;;  %v3284_v42 = vld [vmem:[%s7869_s9] sm:$0xff]  ;;  %s7872_s11 = smov %s7871_s22 }
 0x619   : > { %3049 = vmatpush.msrb.mxu0 %v3022_v45 }
 0x61b   : > { %3050 = vmatpush.msrb.mxu0 %v3021_v46 }
 0x61d   : > { %3051 = vmatpush.msrb.mxu0 %v3020_v49 }
 0x686   : > { %v3099_v52 = vpop.xlane.xlu0 %3098 }
 0x687   : > { %v3107_v53 = vmul.f32 %v7273_v51, %v3099_v52  ;;  %v3019_v52 = vld [vmem:[%s7860_s0 + $0x8] sm:$0xff] }
 0x688   : > { %3052 = vmatpush.msrb.mxu0 %v3019_v52 }
 0x689   : > { %v7277_v54 = vsub.f32 %v7264_v39, %v3107_v53  ;;  %v3018_v53 = vld [vmem:[%s7860_s0] sm:$0xff]  ;;  %s7866_s0 = sld [smem:[#allocation79_spill]] }
 0x68a   : > { %3053 = vmatpush.msrb.mxu0 %v3018_v53 }
 0x68b   : > { %v3109_v55 = vmul.f32 %v7277_v54, %v7277_v54 }
 0x68d   : > { %v3110_v56 = vsel %vm2368_vm1, %v3109_v55, 0.0  ;;  %v5398_v55 = vld [vmem:[%s7857_s1 + $0x38] sm:$0xff] }
 0x68e   : > { %3111 = vadd.xlane.f32.xlu0 %v3110_v56  ;;  %3308 = vmatpush.msra.mxu0 %v5398_v55  ;;  %v3558_v55 = vld [vmem:[%s7870_s8 + $0x10] sm:$0xff] }
 0x68f   : > { %v5836_v9 = vld [vmem:[%s7866_s0] ss:$0 sm:$0xff] }
 0x695   : > { %v2967_v58 = vpop.f32.mrf.mxu2 }
 0x696   : > { %v2968_v59 = vadd.f32 %v5831_v57, %v2967_v58  ;;  %v5397_v57 = vld [vmem:[%s7857_s1 + $0x30] sm:$0xff]  ;;  %v5396_v58 = vld [vmem:[%s7857_s1 + $0x28] sm:$0xff] }
 0x697   : > { %3309 = vmatpush.msra.mxu0 %v5397_v57  ;;  %v3556_v57 = vld [vmem:[%s7870_s8] sm:$0xff] }
 0x698   : > { %v2971_v61 = vrot.slane %v2968_v59, 7  ;;  %v5395_v59 = vld [vmem:[%s7857_s1 + $0x20] sm:$0xff] }
 0x699   : > { %3310 = vmatpush.msra.mxu0 %v5396_v58  ;;  %v5417_v58 = vld [vmem:[%s7869_s9 + $0x18] sm:$0xff] }
 0x69a   : > { %v2973_v0 = vsel %vm2615_vm10, %v2938_v60, %v2971_v61 }
 0x69b   : > { %v2975_v1 = vadd.f32 %v2974_v63, %v2973_v0  ;;  %3311 = vmatpush.msra.mxu0 %v5395_v59 }
 0x69d   : > { %5386 = vmatmul.msk.f32.vlgmr.msrb.gmra.mxu3 %vm2368_vm1, %v2975_v1 }
 0x701   : > { %v3112_v16 = vpop.xlane.xlu0 %3111 }
 0x702   : > { %v3113_v18 = vmul.f32 %v3112_v16, %v7273_v51 }
 0x704   : > { %v3114_v19 = vadd.f32 1e-05, %v3113_v18 }
 0x706   : > { %5899 = vrsqrt.f32 %v3114_v19  ;;  %vm3121_vm0 = vweird.f32 %v3114_v19 }
 0x70c   : > { %v5900_v24 = vpop.eup %5899 }
 0x70d   : > { %v3116_v25 = vmul.f32 %v5900_v24, %v3114_v19  ;;  %vm3122_vm15 = vweird.f32 %v5900_v24  ;;  %v5408_v19 = vld [vmem:[%s7859_s10 + $0x28] sm:$0xff] }
 0x70e   : > { %vm3123_vm2 = vmor %vm3121_vm0, %vm3122_vm15 }
 0x70f   : > { %v3117_v27 = vmul.f32 %v5900_v24, %v3116_v25 }
 0x711   : > { %v3118_v15 = vmul.f32 0.5, %v3117_v27 }
 0x713   : > { %v3119_v30 = vsub.f32 1.5, %v3118_v15 }
 0x715   : > { %v3120_v32 = vmul.f32 %v5900_v24, %v3119_v30 }
 0x717   : > { %v3124_v35 = vsel %vm3123_vm2, %v5900_v24, %v3120_v32 }
 0x718   : > { %v3125_v38 = vmul.f32 %v3124_v35, %v7277_v54 }
 0x71a   : > { %v3129_v41 = vmul.f32 %v5832_v34, %v3125_v38  ;;  %v5840_v38 = vld [vmem:[%s7866_s0 + $0x1] ss:$0 sm:$0xff] }
 0x71c   : > { %v7318_v43 = vadd.f32 %v5833_v37, %v3129_v41 }
 0x71e   : > { %5389 = vmatmul.msk.f32.vlgmr.msrb.gmra.mxu2 %vm2368_vm1, %v7318_v43  ;;  %5390 = vmatmul.msk.f32.vlgmr.msra.gmra.mxu3 %vm2368_vm1, %v7318_v43 }
 0x71f   : > { %5391 = vmatmul.msk.f32.vlgmr.msra.gmra.mxu1 %vm2368_vm1, %v7318_v43 }
 0x720   : > { %v3004_v47 = vpop.f32.mrf.mxu3  ;;  %3458 = vmatpush.msra.mxu1 %v5417_v58  ;;  %v5440_v58 = vld [vmem:[%s7872_s11 + $0x28] sm:$0xff] }
 0x721   : > { %v3005_v48 = vadd.f32 %v5834_v44, %v3004_v47 }
 0x723   : > { %v3008_v50 = vand.u32 2147483647, %v3005_v48  ;;  %v3007_v0 = vmax.f32 %v3005_v48, 0.0 }
 0x725   : > { %v3009_v54 = vsub.f32 0.0, %v3008_v50 }
 0x727   : > { %v3010_v56 = vmul.f32 1.442695, %v3009_v54  ;;  %5406 = vmatmul.msk.f32.vlgmr.msrb.gmra.mxu1 %vm2368_vm1, %v7318_v43  ;;  %v3559_v54 = vld [vmem:[%s7870_s8 + $0x18] sm:$0xff] }
 0x729   : > { %5901 = vpow2.f32 %v3010_v56  ;;  %v3557_v56 = vld [vmem:[%s7870_s8 + $0x8] sm:$0xff] }
 0x72f   : > { %v5902_v60 = vpop.eup %5901 }
 0x730   : > { %v3012_v61 = vadd.f32 1.0, %v5902_v60 }
 0x732   : > { %5903 = vlog2.f32 %v3012_v61 }
 0x738   : > { %v5904_v63 = vpop.eup %5903 }
 0x739   : > { %v3014_v1 = vmul.f32 0.6931472, %v5904_v63  ;;  %v5839_v63 = vld [vmem:[#allocation21] ss:$0 sm:$0xff] }
 0x73b   : > { %v3015_v3 = vadd.f32 %v3014_v1, %v3007_v0  ;;  %v5416_v1 = vld [vmem:[%s7869_s9 + $0x10] sm:$0xff] }
 0x73c   : > { %3459 = vmatpush.msra.mxu1 %v5416_v1 }
 0x73d   : > { %5905 = vtanh.f32 %v3015_v3  ;;  %v3590_v3 = vld [vmem:[%s7871_s22 + $0x18] sm:$0xff]  ;;  %s7875_s22 = sld [smem:[#allocation83_spill]] }
 0x73e   : > { %3607 = vmatpush.msrb.mxu1 %v3590_v3  ;;  %v7429_v3 = vld [vmem:[%s7882_s3] sm:$0xff] }
 0x743   : > { %v5906_v62 = vpop.eup %5905  ;;  %s7876_s14 = smov %s7875_s22 }
 0x744   : > { %v3017_v4 = vmul.f32 %v5906_v62, %v3005_v48  ;;  %v3589_v62 = vld [vmem:[%s7872_s11 + $0x10] sm:$0xff] }
 0x745   : > { %3608 = vmatpush.msrb.mxu1 %v3589_v62 }
 0x746   : > { %3054 = vmatmul.f32.vlgmr.msrb.gmra.mxu0 %v3017_v4  ;;  %v3588_v4 = vld [vmem:[%s7872_s11 + $0x8] sm:$0xff] }
 0x747   : > { %3609 = vmatpush.msrb.mxu1 %v3588_v4 }
 0x74e   : > { %5400 = vmatmul.msk.f32.vlgmr.msra.gmra.mxu0 %vm2368_vm1, %v7318_v43 }
 0x79c   : > { %v3218_v7 = vpop.f32.mrf.mxu1 }
 0x79d   : > { %v3219_v2 = vadd.f32 %v5835_v5, %v3218_v7  ;;  %v3587_v5 = vld [vmem:[%s7872_s11] sm:$0xff]  ;;  %v5436_v7 = vld [vmem:[%s7870_s8 + $0x38] sm:$0xff] }
 0x79e   : > { %3610 = vmatpush.msrb.mxu1 %v3587_v5 }
 0x79f   : > { %3279 = vmatpush.msrb.mxu3 %v3219_v2 }
 0x7a1   : > { %v3190_v11 = vpop.f32.mrf.mxu3  ;;  %v3162_v6 = vpop.f32.mrf.mxu2 }
 0x7a2   : > { %v3191_v13 = vadd.f32 %v5837_v8, %v3190_v11  ;;  %v3163_v17 = vadd.f32 %v5836_v9, %v3162_v6  ;;  %v5435_v8 = vld [vmem:[%s7870_s8 + $0x30] sm:$0xff]  ;;  %v5434_v9 = vld [vmem:[%s7870_s8 + $0x28] sm:$0xff]  ;;  %v5842_v11 = vld [vmem:[%s7873_s12] ss:$0 sm:$0xff] }
 0x7a4   : > { %v3343_v16 = vpop.f32.mrf.mxu1  ;;  %5392 = vmatpush.xpose.msk.msra.mxu2 %vm2758_vm11, %v3191_v13 }
 0x7a5   : > { %v3344_v18 = vadd.f32 %v5838_v12, %v3343_v16  ;;  %v5433_v12 = vld [vmem:[%s7870_s8 + $0x20] sm:$0xff]  ;;  %v3527_v16 = vld [vmem:[%s7874_s13 + $0x10] sm:$0xff] }
 0x7a7   : > { %5413 = vmatpush.xpose.msk.msra.mxu3 %vm2758_vm11, %v3344_v18  ;;  %5393 = vmatmul.msk.f32.vlgmr.msra.gmra.mxu2 %vm2758_vm11, %v3163_v17  ;;  %v3526_v17 = vld [vmem:[%s7874_s13 + $0x8] sm:$0xff]  ;;  %v3525_v18 = vld [vmem:[%s7874_s13] sm:$0xff] }
 0x7a8   : > { %3368 = vmatpush.msrb.mxu2 %v5410_v14  ;;  %v3528_v14 = vld [vmem:[%s7874_s13 + $0x18] sm:$0xff] }
 0x7aa   : > { %3369 = vmatpush.msrb.mxu2 %v5409_v10 }
 0x7ac   : > { %3370 = vmatpush.msrb.mxu2 %v5408_v19 }
 0x7ae   : > { %3371 = vmatpush.msrb.mxu2 %v5407_v20 }
 0x7af   : > { %5412 = vmatmul.msk.f32.vlgmr.msrb.gmra.mxu2 %vm2368_vm1, %v7318_v43 }
 0x7b0   : > { %3481 = vmatpush.msra.mxu2 %v3285_v33  ;;  %v5429_v33 = vld [vmem:[%s7874_s13 + $0x30] sm:$0xff] }
 0x7b2   : > { %3482 = vmatpush.msra.mxu2 %v3284_v42 }
 0x7c3   : > { %v3055_v35 = vpop.f32.mrf.mxu0 }
 0x7c4   : > { %v7374_v0 = vadd.f32 %v5839_v63, %v3055_v35  ;;  %v5427_v35 = vld [vmem:[%s7874_s13 + $0x20] sm:$0xff] }
 0x7cb   : > { %v3313_v40 = vpop.f32.mrf.mxu0 }
 0x7cc   : > { %v3314_v41 = vadd.f32 %v5840_v38, %v3313_v40 }
 0x82a   : > { %v3244_v21 = vpop.f32.mrf.mxu2 }
 0x82b   : > { %v3247_v23 = vmul.f32 0.25, %v3244_v21  ;;  %v5843_v21 = vld [vmem:[%s7875_s22] ss:$0 sm:$0xff]  ;;  %s7878_s22 = sld [smem:[#allocation72_spill]] }
 0x82d   : > { %v3248_v24 = vadd.f32 %v3247_v23, %v7353_v22 }
 0x82f   : > { %v3250_v25 = vsel %vm3249_vm3, %v3248_v24, -inf }
 0x830   : > { %3251 = vmax.xlane.f32.xlu1 %v3250_v25  ;;  %v5844_v25 = vld [vmem:[%s7877_s15] ss:$0 sm:$0xff] }
 0x831   : > { %s7879_s16 = smov %s7878_s22 }
 0x832   : > { %v3373_v27 = vpop.f32.mrf.mxu2 }
 0x833   : > { %v3374_v28 = vadd.f32 %v5841_v26, %v3373_v27 }
 0x835   : > { %3433 = vmatpush.msrb.mxu0 %v3374_v28 }
 0x837   : > { %3579 = vmatpush.msra.mxu0 %v3559_v54 }
 0x839   : > { %3580 = vmatpush.msra.mxu0 %v3558_v55 }
 0x83b   : > { %3581 = vmatpush.msra.mxu0 %v3557_v56  ;;  %v5442_v56 = vld [vmem:[%s7872_s11 + $0x38] sm:$0xff] }
 0x83d   : > { %3582 = vmatpush.msra.mxu0 %v3556_v57  ;;  %v5441_v57 = vld [vmem:[%s7872_s11 + $0x30] sm:$0xff] }
 0x8a3   : > { %v3252_v15 = vpop.xlane.xlu1 %3251 }
 0x8a4   : > { %v3253_v29 = vsub.f32 %v3248_v24, %v3252_v15 }
 0x8a6   : > { %v3254_v30 = vmul.f32 1.442695, %v3253_v29 }
 0x8a8   : > { %5907 = vpow2.f32 %v3254_v30 }
 0x8ae   : > { %v5908_v31 = vpop.eup %5907 }
 0x8af   : > { %v3256_v32 = vsel %vm3249_vm3, %v5908_v31, 0.0 }
 0x8b0   : > { %3257 = vadd.xlane.f32.xlu1 %v3256_v32  ;;  %v5430_v32 = vld [vmem:[%s7874_s13 + $0x38] sm:$0xff] }
 0x923   : > { %v3258_v34 = vpop.xlane.xlu1 %3257 }
 0x924   : > { %5909 = vrcp.f32 %v3258_v34  ;;  %v5428_v34 = vld [vmem:[%s7874_s13 + $0x28] sm:$0xff] }
 0x92a   : > { %v5910_v36 = vpop.eup %5909 }
 0x92b   : > { %v3260_v37 = vmul.f32 %v5910_v36, %v5908_v31 }
 0x92d   : > { %5394 = vmatmul.msk.f32.vlgmr.msrb.gmra.mxu3 %vm3249_vm3, %v3260_v37 }
 0x92e   : > { %3548 = vmatpush.msrb.mxu3 %v3528_v14 }
 0x930   : > { %3549 = vmatpush.msrb.mxu3 %v3527_v16 }
 0x932   : > { %3550 = vmatpush.msrb.mxu3 %v3526_v17 }
 0x934   : > { %3551 = vmatpush.msrb.mxu3 %v3525_v18 }
 0x935   : > { %5414 = vmatmul.msk.f32.vlgmr.msra.gmra.mxu3 %vm2758_vm11, %v3314_v41 }
 0x9b0   : > { %v3281_v43 = vpop.f32.mrf.mxu3 }
 0x9b1   : > { %5419 = vmatmul.msk.f32.vlgmr.msra.gmra.mxu2 %vm2758_vm11, %v3281_v43 }
 0x9b8   : > { %v3399_v44 = vpop.f32.mrf.mxu3 }
 0x9b9   : > { %v3402_v45 = vmul.f32 0.25, %v3399_v44 }
 0x9bb   : > { %v3403_v46 = vadd.f32 %v3402_v45, %v7353_v22 }
 0x9bd   : > { %v3404_v47 = vsel %vm3249_vm3, %v3403_v46, -inf }
 0x9be   : > { %3405 = vmax.xlane.f32.xlu2 %v3404_v47 }
 0xa31   : > { %v3406_v48 = vpop.xlane.xlu2 %3405 }
 0xa32   : > { %v3407_v49 = vsub.f32 %v3403_v46, %v3406_v48  ;;  %v5846_v46 = vld [vmem:[%s7878_s22] ss:$0 sm:$0xff]  ;;  %s7883_s22 = sld [smem:[#allocation90_spill]] }
 0xa34   : > { %v3408_v50 = vmul.f32 1.442695, %v3407_v49  ;;  %v3484_v10 = vpop.f32.mrf.mxu2  ;;  %v5847_v49 = vld [vmem:[%s7880_s17] ss:$0 sm:$0xff] }
 0xa36   : > { %5911 = vpow2.f32 %v3408_v50  ;;  %v5845_v50 = vld [vmem:[%s7873_s12 + $0x1] ss:$0 sm:$0xff] }
 0xa38   : > { %s7884_s20 = smov %s7883_s22  ;;  %v3683_v14 = vld [vmem:[%s7883_s22 + $0x8] sm:$0xff]  ;;  %s7885_s22 = sld [smem:[#allocation91_spill]] }
 0xa3c   : > { %v5912_v52 = vpop.eup %5911 }
 0xa3d   : > { %v3410_v53 = vsel %vm3249_vm3, %v5912_v52, 0.0 }
 0xa3e   : > { %3411 = vadd.xlane.f32.xlu2 %v3410_v53  ;;  %s7886_s3 = smov %s7885_s22 }
 0xab1   : > { %v3412_v59 = vpop.xlane.xlu2 %3411 }
 0xab2   : > { %5913 = vrcp.f32 %v3412_v59  ;;  %v5439_v59 = vld [vmem:[%s7872_s11 + $0x20] sm:$0xff] }
 0xab8   : > { %v5914_v60 = vpop.eup %5913 }
 0xab9   : > { %v3414_v61 = vmul.f32 %v5914_v60, %v5912_v52  ;;  %v5849_v60 = vld [vmem:[%s7881_s19] ss:$0 sm:$0xff] }
 0xabb   : > { %5415 = vmatmul.msk.f32.vlgmr.msrb.gmra.mxu0 %vm3249_vm3, %v3414_v61 }
 0xabc   : > { %3706 = vmatpush.msrb.mxu0 %v5430_v32  ;;  %v5450_v32 = vld [vmem:[%s7884_s20 + $0x18] sm:$0xff] }
 0xabe   : > { %3707 = vmatpush.msrb.mxu0 %v5429_v33 }
 0xac0   : > { %3708 = vmatpush.msrb.mxu0 %v5428_v34 }
 0xac2   : > { %3709 = vmatpush.msrb.mxu0 %v5427_v35 }
 0xac3   : > { %5421 = vmatmul.msk.f32.vlgmr.msra.gmra.mxu0 %vm2368_vm1, %v7374_v0 }
 0xb38   : > { %v3435_v2 = vpop.f32.mrf.mxu0 }
 0xb39   : > { %5418 = vmatmul.msk.f32.vlgmr.msra.gmra.mxu1 %vm2758_vm11, %v3435_v2 }
 0xb3a   : > { %3736 = vmatpush.msra.mxu1 %v5436_v7  ;;  %v5850_v7 = vld [vmem:[%s7877_s15 + $0x1] ss:$0 sm:$0xff] }
 0xb3c   : > { %3737 = vmatpush.msra.mxu1 %v5435_v8 }
 0xb3e   : > { %3738 = vmatpush.msra.mxu1 %v5434_v9 }
 0xb40   : > { %v3584_v6 = vpop.f32.mrf.mxu0  ;;  %3739 = vmatpush.msra.mxu1 %v5433_v12 }
 0xb41   : > { %v3585_v13 = vadd.f32 %v5842_v11, %v3584_v6  ;;  %5422 = vmatmul.msk.f32.vlgmr.msrb.gmra.mxu1 %vm2368_vm1, %v7374_v0 }
 0xb42   : > { %3859 = vmatpush.msrb.mxu1 %v5450_v32 }
 0xb43   : > { %5423 = vmatpush.xpose.msk.msrb.mxu2 %vm2758_vm11, %v3585_v13 }
 0xb47   : > { %3766 = vmatpush.msra.mxu2 %v5442_v56  ;;  %v3980_v56 = vld [vmem:[%s7888_s24 + $0x70] sm:$0xff] }
 0xb49   : > { %5438 = vmatmul.msk.f32.vlgmr.msra.gmra.mxu1 %vm2368_vm1, %v7374_v0  ;;  %3767 = vmatpush.msra.mxu2 %v5441_v57  ;;  %v3979_v57 = vld [vmem:[%s7888_s24 + $0x68] sm:$0xff] }
 0xb4b   : > { %3768 = vmatpush.msra.mxu2 %v5440_v58 }
 0xb4d   : > { %3769 = vmatpush.msra.mxu2 %v5439_v59 }
 0xbb6   : > { %v3461_v19 = vpop.f32.mrf.mxu1 }
 0xbb7   : > { %v3485_v20 = vadd.f32 %v3484_v10, %v3461_v19  ;;  %v5848_v10 = vld [vmem:[%s7881_s19 + $0x1] ss:$0 sm:$0xff] }
 0xbb9   : > { %v3487_v23 = vadd.f32 %v3485_v20, %v7264_v39 }
 0xbbb   : > { %v7400_v24 = vadd.f32 %v5843_v21, %v3487_v23  ;;  %v3682_v21 = vld [vmem:[%s7884_s20] sm:$0xff] }
 0xbbd   : > { %v3495_v26 = vsel %vm2368_vm1, %v7400_v24, 0.0 }
 0xbbe   : > { %3496 = vadd.xlane.f32.xlu0 %v3495_v26  ;;  %v3612_v27 = vpop.f32.mrf.mxu1 }
 0xbbf   : > { %v3613_v28 = vadd.f32 %v5844_v25, %v3612_v27 }
 0xbc1   : > { %5425 = vmatpush.msk.msra.mxu3 %vm3658_vm4, %v3613_v28 }
 0xbc6   : > { %v3741_v52 = vpop.f32.mrf.mxu1 }
 0xbc7   : > { %v3742_v55 = vadd.f32 %v5845_v50, %v3741_v52  ;;  %v3928_v52 = vld [vmem:[%s7887_s21 + $0x10] sm:$0xff] }
 0xc31   : > { %v3497_v15 = vpop.xlane.xlu0 %3496 }
 0xc32   : > { %v3498_v29 = vmul.f32 %v3497_v15, %v7273_v51 }
 0xc34   : > { %v3499_v39 = vsub.f32 %v7400_v24, %v3498_v29 }
 0xc36   : > { %v3500_v30 = vmul.f32 %v3499_v39, %v3499_v39 }
 0xc38   : > { %v3501_v31 = vsel %vm2368_vm1, %v3500_v30, 0.0 }
 0xc39   : > { %3502 = vadd.xlane.f32.xlu1 %v3501_v31 }
 0xcac   : > { %v3503_v36 = vpop.xlane.xlu1 %3502 }
 0xcad   : > { %v3504_v37 = vmul.f32 %v3503_v36, %v7273_v51  ;;  %v5449_v36 = vld [vmem:[%s7884_s20 + $0x10] sm:$0xff] }
 0xcae   : > { %3860 = vmatpush.msrb.mxu1 %v5449_v36 }
 0xcaf   : > { %v3505_v38 = vadd.f32 1e-05, %v3504_v37 }
 0xcb1   : > { %5915 = vrsqrt.f32 %v3505_v38  ;;  %vm3512_vm6 = vweird.f32 %v3505_v38 }
 0xcb7   : > { %v5916_v40 = vpop.eup %5915 }
 0xcb8   : > { %v3507_v41 = vmul.f32 %v5916_v40, %v3505_v38  ;;  %vm3513_vm5 = vweird.f32 %v5916_v40 }
 0xcb9   : > { %vm3514_vm7 = vmor %vm3512_vm6, %vm3513_vm5 }
 0xcba   : > { %v3508_v42 = vmul.f32 %v5916_v40, %v3507_v41 }
 0xcbc   : > { %v3509_v43 = vmul.f32 0.5, %v3508_v42  ;;  %v5851_v42 = vld [vmem:[%s7885_s22] ss:$0 sm:$0xff]  ;;  %s7889_s22 = sld [smem:[#allocation74_spill]] }
 0xcbe   : > { %v3510_v44 = vsub.f32 1.5, %v3509_v43 }
 0xcc0   : > { %v3511_v45 = vmul.f32 %v5916_v40, %v3510_v44 }
 0xcc2   : > { %v3515_v47 = vsel %vm3514_vm7, %v5916_v40, %v3511_v45  ;;  %s7890_s25 = smov %s7889_s22 }
 0xcc3   : > { %v3516_v48 = vmul.f32 %v3515_v47, %v3499_v39 }
 0xcc5   : > { %v3520_v53 = vmul.f32 %v5846_v46, %v3516_v48 }
 0xcc7   : > { %v3524_v54 = vadd.f32 %v5847_v49, %v3520_v53  ;;  %v3927_v53 = vld [vmem:[%s7887_s21 + $0x8] sm:$0xff] }
 0xcc9   : > { %5420 = vmatmul.msk.f32.vlgmr.msrb.gmra.mxu3 %vm2368_vm1, %v3524_v54  ;;  %5432 = vmatmul.msk.f32.vlgmr.msrb.gmra.mxu0 %vm2368_vm1, %v3524_v54  ;;  %v3926_v54 = vld [vmem:[%s7887_s21] sm:$0xff] }
 0xcca   : > { %5445 = vmatpush.xpose.msk.msrb.mxu3 %vm2758_vm11, %v3742_v55  ;;  %v3981_v55 = vld [vmem:[%s7888_s24 + $0x78] sm:$0xff] }
 0xd46   : > { %v3711_v19 = vpop.f32.mrf.mxu0 }
 0xd47   : > { %v3712_v20 = vadd.f32 %v5848_v10, %v3711_v19  ;;  %v3972_v10 = vld [vmem:[%s7888_s24 + $0x30] sm:$0xff]  ;;  %v3971_v19 = vld [vmem:[%s7888_s24 + $0x28] sm:$0xff] }
 0xd4c   : > { %v3553_v61 = vpop.f32.mrf.mxu3 }
 0xd4d   : > { %v3554_v63 = vadd.f32 %v5849_v60, %v3553_v61  ;;  %v3978_v60 = vld [vmem:[%s7888_s24 + $0x60] sm:$0xff] }
 0xd4f   : > { %5424 = vmatmul.msk.f32.vlgmr.msrb.gmra.mxu2 %vm2758_vm11, %v3554_v63 }
 0xd50   : > { %3882 = vmatpush.msrb.mxu2 %v3683_v14  ;;  %v3976_v14 = vld [vmem:[%s7888_s24 + $0x50] sm:$0xff] }
 0xd52   : > { %3883 = vmatpush.msrb.mxu2 %v3682_v21  ;;  %v3969_v21 = vld [vmem:[%s7888_s24 + $0x18] sm:$0xff] }
 0xd57   : > { %5444 = vmatmul.msk.f32.vlgmr.msra.gmra.mxu2 %vm2368_vm1, %v7374_v0 }
 0xdd2   : > { %v3638_v1 = vpop.f32.mrf.mxu2 }
 0xdd3   : > { %v3641_v62 = vmul.f32 0.25, %v3638_v1 }
 0xdd5   : > { %v3642_v4 = vadd.f32 %v3641_v62, %v7429_v3 }
 0xdd7   : > { %v3644_v5 = vsel %vm3643_vm8, %v3642_v4, -inf }
 0xdd8   : > { %3645 = vmax.xlane.f32.xlu2 %v3644_v5 }
 0xdda   : > { %v3771_v2 = vpop.f32.mrf.mxu2 }
 0xddb   : > { %v3772_v8 = vadd.f32 %v5850_v7, %v3771_v2  ;;  %v5852_v2 = vld [vmem:[%s7889_s22] ss:$0 sm:$0xff]  ;;  %s7892_s22 = sld [smem:[#allocation93_spill]] }
 0xddd   : > { %5447 = vmatpush.msk.msra.mxu0 %vm3658_vm4, %v3772_v8 }
 0xddf   : > { %3982 = vmatpush.msrb.mxu0 %v3981_v55  ;;  %v5463_v55 = vld [vmem:[%s7858_s4 + $0x48] sm:$0xff] }
 0xde1   : > { %3983 = vmatpush.msrb.mxu0 %v3980_v56  ;;  %s7893_s27 = smov %s7892_s22  ;;  %v5469_v56 = vld [vmem:[%s7859_s10 + $0x48] sm:$0xff] }
 0xde3   : > { %3984 = vmatpush.msrb.mxu0 %v3979_v57  ;;  %v5456_v57 = vld [vmem:[%s7857_s1 + $0x40] sm:$0xff] }
 0xde5   : > { %3985 = vmatpush.msrb.mxu0 %v3978_v60  ;;  %v5482_v60 = vld [vmem:[%s7857_s1 + $0x78] sm:$0xff] }
 0xe4b   : > { %v3646_v9 = vpop.xlane.xlu2 %3645 }
 0xe4c   : > { %v3647_v11 = vsub.f32 %v3642_v4, %v3646_v9 }
 0xe4e   : > { %v3648_v12 = vmul.f32 1.442695, %v3647_v11  ;;  %v5853_v11 = vld [vmem:[%s7891_s26] ss:$0 sm:$0xff] }
 0xe50   : > { %5917 = vpow2.f32 %v3648_v12 }
 0xe56   : > { %v5918_v6 = vpop.eup %5917 }
 0xe57   : > { %v3650_v13 = vsel %vm3643_vm8, %v5918_v6, 0.0 }
 0xe58   : > { %3651 = vadd.xlane.f32.xlu0 %v3650_v13  ;;  %v3977_v13 = vld [vmem:[%s7888_s24 + $0x58] sm:$0xff] }
 0xe59   : > { %3986 = vmatpush.msrb.mxu0 %v3977_v13 }
 0xe5b   : > { %3987 = vmatpush.msrb.mxu0 %v3976_v14  ;;  %v5857_v14 = vld [vmem:[%s7862_s6 + $0x1] ss:$0 sm:$0xff] }
 0xecb   : > { %v3652_v16 = vpop.xlane.xlu0 %3651 }
 0xecc   : > { %5919 = vrcp.f32 %v3652_v16  ;;  %v3975_v16 = vld [vmem:[%s7888_s24 + $0x48] sm:$0xff] }
 0xecd   : > { %3988 = vmatpush.msrb.mxu0 %v3975_v16 }
 0xed2   : > { %v5920_v17 = vpop.eup %5919 }
 0xed3   : > { %v3654_v18 = vmul.f32 %v5920_v17, %v5918_v6  ;;  %v3974_v17 = vld [vmem:[%s7888_s24 + $0x40] sm:$0xff] }
 0xed4   : > { %3989 = vmatpush.msrb.mxu0 %v3974_v17 }
 0xed5   : > { %5426 = vmatmul.msk.f32.vlgmr.msra.gmra.mxu3 %vm3643_vm8, %v3654_v18  ;;  %v3973_v18 = vld [vmem:[%s7888_s24 + $0x38] sm:$0xff] }
 0xed6   : > { %3990 = vmatpush.msrb.mxu0 %v3973_v18 }
 0xed8   : > { %3991 = vmatpush.msrb.mxu0 %v3972_v10  ;;  %v5859_v10 = vld [vmem:[%s7865_s5 + $0x2] ss:$0 sm:$0xff] }
 0xeda   : > { %3992 = vmatpush.msrb.mxu0 %v3971_v19  ;;  %v5860_v19 = vld [vmem:[%s7864_s18 + $0x2] ss:$0 sm:$0xff] }
 0xedd   : > { %5446 = vmatmul.msk.f32.vlgmr.msrb.gmra.mxu3 %vm2758_vm11, %v3712_v20  ;;  %v3970_v20 = vld [vmem:[%s7888_s24 + $0x20] sm:$0xff] }
 0xede   : > { %3993 = vmatpush.msrb.mxu0 %v3970_v20  ;;  %v5858_v20 = vld [vmem:[%s7866_s0 + $0x2] ss:$0 sm:$0xff] }
 0xee0   : > { %3994 = vmatpush.msrb.mxu0 %v3969_v21 }
 0xf58   : > { %v3679_v23 = vpop.f32.mrf.mxu3 }
 0xf59   : > { %5452 = vmatmul.msk.f32.vlgmr.msrb.gmra.mxu2 %vm2758_vm11, %v3679_v23  ;;  %v3968_v23 = vld [vmem:[%s7888_s24 + $0x10] sm:$0xff] }
 0xf5a   : > { %3995 = vmatpush.msrb.mxu0 %v3968_v23 }
 0xf60   : > { %v3797_v25 = vpop.f32.mrf.mxu3 }
 0xf61   : > { %v3800_v26 = vmul.f32 0.25, %v3797_v25  ;;  %v3967_v25 = vld [vmem:[%s7888_s24 + $0x8] sm:$0xff] }
 0xf62   : > { %3996 = vmatpush.msrb.mxu0 %v3967_v25 }
 0xf63   : > { %v3801_v27 = vadd.f32 %v3800_v26, %v7429_v3  ;;  %v3966_v26 = vld [vmem:[%s7888_s24] sm:$0xff] }
 0xf64   : > { %3997 = vmatpush.msrb.mxu0 %v3966_v26 }
 0xf65   : > { %v3802_v28 = vsel %vm3643_vm8, %v3801_v27, -inf }
 0xf66   : > { %3803 = vmax.xlane.f32.xlu1 %v3802_v28 }
 0xfd9   : > { %v3804_v15 = vpop.xlane.xlu1 %3803 }
 0xfda   : > { %v3805_v29 = vsub.f32 %v3801_v27, %v3804_v15  ;;  %v5854_v27 = vld [vmem:[%s7892_s22] ss:$0 sm:$0xff]  ;;  %s7895_s22 = sld [smem:[#allocation98_spill]] }
 0xfdc   : > { %v3806_v39 = vmul.f32 1.442695, %v3805_v29  ;;  %v3885_v38 = vpop.f32.mrf.mxu2 }
 0xfde   : > { %5921 = vpow2.f32 %v3806_v39 }
 0xfe4   : > { %v5922_v30 = vpop.eup %5921 }
 0xfe5   : > { %v3808_v31 = vsel %vm3643_vm8, %v5922_v30, 0.0 }
 0xfe6   : > { %3809 = vadd.xlane.f32.xlu2 %v3808_v31 }
0x1059   : > { %v3810_v33 = vpop.xlane.xlu2 %3809 }
0x105a   : > { %5923 = vrcp.f32 %v3810_v33 }
0x1060   : > { %v5924_v34 = vpop.eup %5923 }
0x1061   : > { %v3812_v35 = vmul.f32 %v5924_v34, %v5922_v30 }
0x1063   : > { %5448 = vmatmul.msk.f32.vlgmr.msra.gmra.mxu0 %vm3643_vm8, %v3812_v35 }
0x10e0   : > { %v3836_v37 = vpop.f32.mrf.mxu0 }
0x10e1   : > { %5451 = vmatmul.msk.f32.vlgmr.msrb.gmra.mxu1 %vm2758_vm11, %v3836_v37  ;;  %v5855_v37 = vld [vmem:[%s7894_s28] ss:$0 sm:$0xff] }
0x115e   : > { %v3862_v40 = vpop.f32.mrf.mxu1 }
0x115f   : > { %v3886_v41 = vadd.f32 %v3885_v38, %v3862_v40 }
0x1161   : > { %v3888_v43 = vadd.f32 %v3886_v41, %v7400_v24  ;;  %v3929_v24 = vld [vmem:[%s7887_s21 + $0x18] sm:$0xff] }
0x1162   : > { %3949 = vmatpush.msra.mxu3 %v3929_v24  ;;  %v5458_v24 = vld [vmem:[%s7857_s1 + $0x50] sm:$0xff] }
0x1163   : > { %v7451_v44 = vadd.f32 %v5851_v42, %v3888_v43 }
0x1164   : > { %3950 = vmatpush.msra.mxu3 %v3928_v52  ;;  %v5464_v52 = vld [vmem:[%s7858_s4 + $0x50] sm:$0xff] }
0x1165   : > { %v3896_v45 = vsel %vm2368_vm1, %v7451_v44, 0.0 }
0x1166   : > { %3897 = vadd.xlane.f32.xlu0 %v3896_v45  ;;  %3951 = vmatpush.msra.mxu3 %v3927_v53  ;;  %v5470_v53 = vld [vmem:[%s7859_s10 + $0x50] sm:$0xff] }
0x1168   : > { %3952 = vmatpush.msra.mxu3 %v3926_v54  ;;  %v5457_v54 = vld [vmem:[%s7857_s1 + $0x48] sm:$0xff] }
0x11d9   : > { %v3898_v46 = vpop.xlane.xlu0 %3897 }
0x11da   : > { %v3899_v47 = vmul.f32 %v3898_v46, %v7273_v51 }
0x11dc   : > { %v3900_v48 = vsub.f32 %v7451_v44, %v3899_v47 }
0x11de   : > { %v3901_v49 = vmul.f32 %v3900_v48, %v3900_v48 }
0x11e0   : > { %v3902_v50 = vsel %vm2368_vm1, %v3901_v49, 0.0  ;;  %v5465_v49 = vld [vmem:[%s7858_s4 + $0x58] sm:$0xff] }
0x11e1   : > { %3903 = vadd.xlane.f32.xlu1 %v3902_v50  ;;  %v5471_v50 = vld [vmem:[%s7859_s10 + $0x58] sm:$0xff]  ;;  %4097 = vmatpush.msra.mxu2 %v5465_v49 }
0x11e2   : > { %4127 = vmatpush.msrb.mxu3 %v5471_v50 }
0x11e3   : > { %4098 = vmatpush.msra.mxu2 %v5464_v52  ;;  %v5494_v52 = vld [vmem:[%s7859_s10 + $0x78] sm:$0xff] }
0x11e4   : > { %4128 = vmatpush.msrb.mxu3 %v5470_v53  ;;  %v5493_v53 = vld [vmem:[%s7859_s10 + $0x70] sm:$0xff] }
0x11e5   : > { %4099 = vmatpush.msra.mxu2 %v5463_v55  ;;  %v5491_v55 = vld [vmem:[%s7859_s10 + $0x60] sm:$0xff] }
0x11e6   : > { %4129 = vmatpush.msrb.mxu3 %v5469_v56  ;;  %v5478_v56 = vld [vmem:[%s7869_s9 + $0x28] sm:$0xff] }
0x1254   : > { %v3904_v58 = vpop.xlane.xlu1 %3903 }
0x1255   : > { %v3905_v59 = vmul.f32 %v3904_v58, %v7273_v51  ;;  %v5462_v58 = vld [vmem:[%s7858_s4 + $0x40] sm:$0xff] }
0x1256   : > { %4100 = vmatpush.msra.mxu2 %v5462_v58 }
0x1257   : > { %v3906_v61 = vadd.f32 1e-05, %v3905_v59  ;;  %v5468_v59 = vld [vmem:[%s7859_s10 + $0x40] sm:$0xff] }
0x1258   : > { %4130 = vmatpush.msrb.mxu3 %v5468_v59 }
0x1259   : > { %5925 = vrsqrt.f32 %v3906_v61  ;;  %vm3913_vm10 = vweird.f32 %v3906_v61 }
0x125f   : > { %v5926_v63 = vpop.eup %5925 }
0x1260   : > { %v3908_v1 = vmul.f32 %v5926_v63, %v3906_v61  ;;  %vm3914_vm9 = vweird.f32 %v5926_v63  ;;  %v5481_v61 = vld [vmem:[%s7857_s1 + $0x70] sm:$0xff] }
0x1261   : > { %vm3915_vm12 = vmor %vm3913_vm10, %vm3914_vm9  ;;  %vm5008_vm10 = vcmask 0  }
0x1262   : > { %v3909_v62 = vmul.f32 %v5926_v63, %v3908_v1  ;;  %v5480_v1 = vld [vmem:[%s7857_s1 + $0x68] sm:$0xff] }
0x1264   : > { %v3910_v4 = vmul.f32 0.5, %v3909_v62 }
0x1266   : > { %v3911_v5 = vsub.f32 1.5, %v3910_v4  ;;  %v5479_v4 = vld [vmem:[%s7857_s1 + $0x60] sm:$0xff] }
0x1268   : > { %v3912_v7 = vmul.f32 %v5926_v63, %v3911_v5 }
0x126a   : > { %v3916_v8 = vsel %vm3915_vm12, %v5926_v63, %v3912_v7 }
0x126b   : > { %v3917_v9 = vmul.f32 %v3916_v8, %v3900_v48 }
0x126d   : > { %v3921_v12 = vmul.f32 %v5852_v2, %v3917_v9 }
0x126f   : > { %v3925_v6 = vadd.f32 %v5853_v11, %v3921_v12 }
0x1271   : > { %5453 = vmatmul.msk.f32.vlgmr.msra.gmra.mxu3 %vm2368_vm1, %v3925_v6  ;;  %v5856_v6 = vld [vmem:[%s7861_s23 + $0x1] ss:$0 sm:$0xff] }
0x1272   : > { %4222 = vmatpush.msra.mxu3 %v5482_v60 }
0x1274   : > { %4223 = vmatpush.msra.mxu3 %v5481_v61 }
0x1276   : > { %4224 = vmatpush.msra.mxu3 %v5480_v1 }
0x1278   : > { %4225 = vmatpush.msra.mxu3 %v5479_v4 }
0x12f4   : > { %v3954_v28 = vpop.f32.mrf.mxu3 }
0x12f5   : > { %v3955_v15 = vadd.f32 %v5854_v27, %v3954_v28  ;;  %v5488_v27 = vld [vmem:[%s7858_s4 + $0x78] sm:$0xff] }
0x12f7   : > { %v3958_v29 = vmul.f32 0.044715, %v3955_v15  ;;  %v3957_v34 = vmul.f32 0.5, %v3955_v15 }
0x12f9   : > { %v3959_v39 = vmul.f32 %v3958_v29, %v3955_v15  ;;  %v5487_v29 = vld [vmem:[%s7858_s4 + $0x70] sm:$0xff] }
0x12fb   : > { %v3960_v30 = vmul.f32 %v3959_v39, %v3955_v15  ;;  %v5486_v39 = vld [vmem:[%s7858_s4 + $0x68] sm:$0xff] }
0x12fd   : > { %v3961_v31 = vadd.f32 %v3960_v30, %v3955_v15  ;;  %v5485_v30 = vld [vmem:[%s7858_s4 + $0x60] sm:$0xff] }
0x12ff   : > { %v3962_v32 = vmul.f32 0.7978846, %v3961_v31 }
0x1301   : > { %5927 = vtanh.f32 %v3962_v32 }
0x1307   : > { %v5928_v33 = vpop.eup %5927 }
0x1308   : > { %v3964_v35 = vadd.f32 1.0, %v5928_v33 }
0x130a   : > { %v3965_v36 = vmul.f32 %v3964_v35, %v3957_v34  ;;  %v5862_v35 = vld [vmem:[%s7865_s5 + $0x3] ss:$0 sm:$0xff] }
0x130c   : > { %3998 = vmatmul.f32.vlgmr.msrb.gmra.mxu0 %v3965_v36  ;;  %v5861_v36 = vld [vmem:[%s7866_s0 + $0x3] ss:$0 sm:$0xff]  ;;  %s7896_s0 = smov %s7895_s22 }
0x1389   : > { %v3999_v38 = vpop.f32.mrf.mxu0 }
0x138a   : > { %v4002_v40 = vadd.f32 %v3999_v38, %v7451_v44  ;;  %v5459_v44 = vld [vmem:[%s7857_s1 + $0x58] sm:$0xff] }
0x138b   : > { %4067 = vmatpush.msra.mxu1 %v5459_v44 }
0x138c   : > { %v7485_v41 = vadd.f32 %v5855_v37, %v4002_v40 }
0x138d   : > { %4068 = vmatpush.msra.mxu1 %v5458_v24 }
0x138e   : > { %v4012_v42 = vsel %vm2368_vm1, %v7485_v41, 0.0 }
0x138f   : > { %4013 = vadd.xlane.f32.xlu2 %v4012_v42  ;;  %4069 = vmatpush.msra.mxu1 %v5457_v54  ;;  %v5492_v54 = vld [vmem:[%s7859_s10 + $0x68] sm:$0xff] }
0x1391   : > { %4070 = vmatpush.msra.mxu1 %v5456_v57 }
0x1402   : > { %v4014_v43 = vpop.xlane.xlu2 %4013 }
0x1403   : > { %v4015_v45 = vmul.f32 %v4014_v43, %v7273_v51 }
0x1405   : > { %v4016_v46 = vsub.f32 %v7485_v41, %v4015_v45 }
0x1407   : > { %v4017_v47 = vmul.f32 %v4016_v46, %v4016_v46 }
0x1409   : > { %v4018_v48 = vsel %vm2368_vm1, %v4017_v47, 0.0 }
0x140a   : > { %4019 = vadd.xlane.f32.xlu0 %v4018_v48 }
0x147d   : > { %v4020_v63 = vpop.xlane.xlu0 %4019 }
0x147e   : > { %v4021_v62 = vmul.f32 %v4020_v63, %v7273_v51 }
0x1480   : > { %v4022_v5 = vadd.f32 1e-05, %v4021_v62  ;;  %v5477_v62 = vld [vmem:[%s7869_s9 + $0x20] sm:$0xff] }
0x1482   : > { %5929 = vrsqrt.f32 %v4022_v5  ;;  %vm4029_vm15 = vweird.f32 %v4022_v5 }
0x1488   : > { %v5930_v7 = vpop.eup %5929 }
0x1489   : > { %v4024_v2 = vmul.f32 %v5930_v7, %v4022_v5  ;;  %vm4030_vm14 = vweird.f32 %v5930_v7 }
0x148a   : > { %vm4031_vm0 = vmor %vm4029_vm15, %vm4030_vm14 }
0x148b   : > { %v4025_v8 = vmul.f32 %v5930_v7, %v4024_v2 }
0x148d   : > { %v4026_v9 = vmul.f32 0.5, %v4025_v8 }
0x148f   : > { %v4027_v11 = vsub.f32 1.5, %v4026_v9  ;;  %v5516_v9 = vld [vmem:[%s7870_s8 + $0x58] sm:$0xff] }
0x1491   : > { %v4028_v12 = vmul.f32 %v5930_v7, %v4027_v11 }
0x1493   : > { %v4032_v13 = vsel %vm4031_vm0, %v5930_v7, %v4028_v12  ;;  %v5863_v7 = vld [vmem:[%s7864_s18 + $0x3] ss:$0 sm:$0xff] }
0x1494   : > { %v4033_v16 = vmul.f32 %v4032_v13, %v4016_v46  ;;  %v5514_v13 = vld [vmem:[%s7870_s8 + $0x48] sm:$0xff] }
0x1496   : > { %v4037_v17 = vmul.f32 %v5856_v6, %v4033_v16  ;;  %v5515_v6 = vld [vmem:[%s7870_s8 + $0x50] sm:$0xff]  ;;  %v5501_v16 = vld [vmem:[%s7869_s9 + $0x38] sm:$0xff] }
0x1498   : > { %v7511_v18 = vadd.f32 %v5857_v14, %v4037_v17  ;;  %v5513_v14 = vld [vmem:[%s7870_s8 + $0x40] sm:$0xff]  ;;  %v5500_v17 = vld [vmem:[%s7869_s9 + $0x30] sm:$0xff] }
0x149a   : > { %5461 = vmatmul.msk.f32.vlgmr.msra.gmra.mxu1 %vm2368_vm1, %v7511_v18  ;;  %5467 = vmatmul.msk.f32.vlgmr.msra.gmra.mxu2 %vm2368_vm1, %v7511_v18 }
0x149b   : > { %5473 = vmatmul.msk.f32.vlgmr.msrb.gmra.mxu3 %vm2368_vm1, %v7511_v18 }
0x14a3   : > { %5484 = vmatmul.msk.f32.vlgmr.msra.gmra.mxu3 %vm2368_vm1, %v7511_v18 }
0x1517   : > { %v4072_v23 = vpop.f32.mrf.mxu1 }
0x1518   : > { %v4073_v15 = vadd.f32 %v5858_v20, %v4072_v23  ;;  %v5519_v20 = vld [vmem:[%s7872_s11 + $0x40] sm:$0xff] }
0x151d   : > { %v4102_v21 = vpop.f32.mrf.mxu2 }
0x151e   : > { %v4103_v25 = vadd.f32 %v5859_v10, %v4102_v21  ;;  %v4132_v26 = vpop.f32.mrf.mxu3  ;;  %v5521_v10 = vld [vmem:[%s7872_s11 + $0x50] sm:$0xff]  ;;  %v5540_v21 = vld [vmem:[%s7870_s8 + $0x78] sm:$0xff] }
0x151f   : > { %v4133_v28 = vadd.f32 %v5860_v19, %v4132_v26  ;;  %v5520_v19 = vld [vmem:[%s7872_s11 + $0x48] sm:$0xff] }
0x1520   : > { %5474 = vmatpush.xpose.msk.msrb.mxu1 %vm2758_vm11, %v4103_v25  ;;  %v5539_v25 = vld [vmem:[%s7870_s8 + $0x70] sm:$0xff]  ;;  %v5538_v26 = vld [vmem:[%s7870_s8 + $0x68] sm:$0xff] }
0x1521   : > { %4192 = vmatpush.msrb.mxu2 %v4133_v28  ;;  %v5537_v28 = vld [vmem:[%s7870_s8 + $0x60] sm:$0xff] }
0x1523   : > { %5475 = vmatmul.msk.f32.vlgmr.msrb.gmra.mxu1 %vm2758_vm11, %v4073_v15  ;;  %4282 = vmatpush.msra.mxu2 %v5494_v52  ;;  %v5531_v52 = vld [vmem:[%s7874_s13 + $0x60] sm:$0xff] }
0x1524   : > { %4252 = vmatpush.msra.mxu1 %v5488_v27  ;;  %v5864_v27 = vld [vmem:[%s7873_s12 + $0x2] ss:$0 sm:$0xff] }
0x1525   : > { %4283 = vmatpush.msra.mxu2 %v5493_v53 }
0x1526   : > { %4253 = vmatpush.msra.mxu1 %v5487_v29  ;;  %v4227_v38 = vpop.f32.mrf.mxu3 }
0x1527   : > { %v4228_v42 = vadd.f32 %v5861_v36, %v4227_v38  ;;  %4284 = vmatpush.msra.mxu2 %v5492_v54  ;;  %v5865_v36 = vld [vmem:[%s7876_s14 + $0x1] ss:$0 sm:$0xff] }
0x1528   : > { %4254 = vmatpush.msra.mxu1 %v5486_v39  ;;  %v5510_v39 = vld [vmem:[%s7874_s13 + $0x58] sm:$0xff] }
0x1529   : > { %4285 = vmatpush.msra.mxu2 %v5491_v55  ;;  %4467 = vmatpush.msra.mxu0 %v5510_v39 }
0x152a   : > { %4255 = vmatpush.msra.mxu1 %v5485_v30  ;;  %v5509_v30 = vld [vmem:[%s7874_s13 + $0x50] sm:$0xff] }
0x152b   : > { %5490 = vmatmul.msk.f32.vlgmr.msra.gmra.mxu1 %vm2368_vm1, %v7511_v18  ;;  %4468 = vmatpush.msra.mxu0 %v5509_v30 }
0x15a0   : > { %v4158_v31 = vpop.f32.mrf.mxu1 }
0x15a1   : > { %v4161_v32 = vmul.f32 0.25, %v4158_v31  ;;  %v5508_v31 = vld [vmem:[%s7874_s13 + $0x48] sm:$0xff] }
0x15a2   : > { %4469 = vmatpush.msra.mxu0 %v5508_v31  ;;  %v5871_v31 = vld [vmem:[%s7881_s19 + $0x3] ss:$0 sm:$0xff] }
0x15a3   : > { %v4162_v33 = vadd.f32 %v4161_v32, %v7353_v22  ;;  %v5507_v32 = vld [vmem:[%s7874_s13 + $0x40] sm:$0xff] }
0x15a4   : > { %4470 = vmatpush.msra.mxu0 %v5507_v32 }
0x15a5   : > { %v4163_v34 = vsel %vm3249_vm3, %v4162_v33, -inf }
0x15a6   : > { %4164 = vmax.xlane.f32.xlu1 %v4163_v34 }
0x15a8   : > { %v4257_v37 = vpop.f32.mrf.mxu1 }
0x15a9   : > { %v4258_v40 = vadd.f32 %v5862_v35, %v4257_v37 }
0x15ab   : > { %5497 = vmatpush.xpose.msk.msrb.mxu3 %vm2758_vm11, %v4258_v40  ;;  %v5866_v40 = vld [vmem:[%s7877_s15 + $0x2] ss:$0 sm:$0xff] }
0x15ae   : > { %5498 = vmatmul.msk.f32.vlgmr.msrb.gmra.mxu3 %vm2758_vm11, %v4228_v42 }
0x15af   : > { %4395 = vmatpush.msra.mxu3 %v5478_v56 }
0x15b1   : > { %4396 = vmatpush.msra.mxu3 %v5477_v62  ;;  %v5869_v62 = vld [vmem:[%s7880_s17 + $0x1] ss:$0 sm:$0xff] }
0x1619   : > { %v4165_v43 = vpop.xlane.xlu1 %4164 }
0x161a   : > { %v4166_v45 = vsub.f32 %v4162_v33, %v4165_v43 }
0x161c   : > { %v4167_v46 = vmul.f32 1.442695, %v4166_v45 }
0x161e   : > { %5931 = vpow2.f32 %v4167_v46 }
0x1624   : > { %v5932_v47 = vpop.eup %5931 }
0x1625   : > { %v4169_v48 = vsel %vm3249_vm3, %v5932_v47, 0.0 }
0x1626   : > { %4170 = vadd.xlane.f32.xlu2 %v4169_v48 }
0x1631   : > { %v4313_v44 = vpop.f32.mrf.mxu3 }
0x1632   : > { %v4316_v49 = vmul.f32 0.25, %v4313_v44 }
0x1634   : > { %v4317_v50 = vadd.f32 %v4316_v49, %v7353_v22  ;;  %v5534_v49 = vld [vmem:[%s7874_s13 + $0x78] sm:$0xff] }
0x1636   : > { %v4318_v24 = vsel %vm3249_vm3, %v4317_v50, -inf }
0x1637   : > { %4319 = vmax.xlane.f32.xlu0 %v4318_v24  ;;  %v5532_v24 = vld [vmem:[%s7874_s13 + $0x68] sm:$0xff] }
0x1699   : > { %v4171_v57 = vpop.xlane.xlu2 %4170 }
0x169a   : > { %5933 = vrcp.f32 %v4171_v57 }
0x16a0   : > { %v5934_v58 = vpop.eup %5933 }
0x16a1   : > { %v4173_v59 = vmul.f32 %v5934_v58, %v5932_v47 }
0x16a3   : > { %5476 = vmatmul.msk.f32.vlgmr.msrb.gmra.mxu2 %vm3249_vm3, %v4173_v59 }
0x16a4   : > { %4372 = vmatpush.msrb.mxu2 %v5501_v16 }
0x16a6   : > { %4373 = vmatpush.msrb.mxu2 %v5500_v17 }
0x16aa   : > { %v4320_v22 = vpop.xlane.xlu0 %4319 }
0x16ab   : > { %v4321_v60 = vsub.f32 %v4317_v50, %v4320_v22  ;;  %5496 = vmatmul.msk.f32.vlgmr.msra.gmra.mxu2 %vm2368_vm1, %v7511_v18  ;;  %v5522_v18 = vld [vmem:[%s7872_s11 + $0x58] sm:$0xff]  ;;  %v5533_v50 = vld [vmem:[%s7874_s13 + $0x70] sm:$0xff] }
0x16ac   : > { %4527 = vmatpush.msra.mxu2 %v5522_v18 }
0x16ad   : > { %v4322_v61 = vmul.f32 1.442695, %v4321_v60 }
0x16ae   : > { %4528 = vmatpush.msra.mxu2 %v5521_v10 }
0x16af   : > { %5935 = vpow2.f32 %v4322_v61  ;;  %v5868_v61 = vld [vmem:[%s7879_s16 + $0x1] ss:$0 sm:$0xff] }
0x16b0   : > { %4529 = vmatpush.msra.mxu2 %v5520_v19 }
0x16b2   : > { %4530 = vmatpush.msra.mxu2 %v5519_v20  ;;  %v5872_v20 = vld [vmem:[%s7877_s15 + $0x3] ss:$0 sm:$0xff] }
0x16b5   : > { %v5936_v63 = vpop.eup %5935 }
0x16b6   : > { %v4324_v1 = vsel %vm3249_vm3, %v5936_v63, 0.0 }
0x16b7   : > { %4325 = vadd.xlane.f32.xlu1 %v4324_v1 }
0x1726   : > { %v4194_v4 = vpop.f32.mrf.mxu2 }
0x1727   : > { %5503 = vmatmul.msk.f32.vlgmr.msra.gmra.mxu3 %vm2758_vm11, %v4194_v4  ;;  %v5867_v4 = vld [vmem:[%s7873_s12 + $0x3] ss:$0 sm:$0xff] }
0x172a   : > { %v4326_v5 = vpop.xlane.xlu1 %4325 }
0x172b   : > { %5937 = vrcp.f32 %v4326_v5 }
0x172e   : > { %v4287_v2 = vpop.f32.mrf.mxu2 }
0x172f   : > { %v4288_v8 = vadd.f32 %v5863_v7, %v4287_v2 }
0x1731   : > { %v5938_v11 = vpop.eup %5937  ;;  %4347 = vmatpush.msrb.mxu1 %v4288_v8 }
0x1732   : > { %v4328_v12 = vmul.f32 %v5938_v11, %v5936_v63  ;;  %v5545_v11 = vld [vmem:[%s7872_s11 + $0x70] sm:$0xff] }
0x1733   : > { %4497 = vmatpush.msra.mxu1 %v5516_v9  ;;  %v5546_v9 = vld [vmem:[%s7872_s11 + $0x78] sm:$0xff] }
0x1734   : > { %5499 = vmatmul.msk.f32.vlgmr.msrb.gmra.mxu1 %vm3249_vm3, %v4328_v12  ;;  %v5544_v12 = vld [vmem:[%s7872_s11 + $0x68] sm:$0xff] }
0x1735   : > { %4498 = vmatpush.msra.mxu1 %v5515_v6  ;;  %v5543_v6 = vld [vmem:[%s7872_s11 + $0x60] sm:$0xff] }
0x1737   : > { %4499 = vmatpush.msra.mxu1 %v5514_v13  ;;  %v5870_v13 = vld [vmem:[%s7881_s19 + $0x2] ss:$0 sm:$0xff] }
0x1739   : > { %4500 = vmatpush.msra.mxu1 %v5513_v14 }
0x173b   : > { %4625 = vmatpush.msrb.mxu1 %v5534_v49 }
0x173c   : > { %5518 = vmatmul.msk.f32.vlgmr.msra.gmra.mxu1 %vm2368_vm1, %v7374_v0 }
0x173d   : > { %4626 = vmatpush.msrb.mxu1 %v5533_v50 }
0x173f   : > { %4627 = vmatpush.msrb.mxu1 %v5532_v24 }
0x1741   : > { %4628 = vmatpush.msrb.mxu1 %v5531_v52 }
0x17aa   : > { %v4398_v33 = vpop.f32.mrf.mxu3 }
0x17b1   : > { %v4349_v23 = vpop.f32.mrf.mxu1 }
0x17b2   : > { %5502 = vmatmul.msk.f32.vlgmr.msrb.gmra.mxu2 %vm2758_vm11, %v4349_v23 }
0x17b3   : > { %4655 = vmatpush.msrb.mxu2 %v5540_v21 }
0x17b5   : > { %4656 = vmatpush.msrb.mxu2 %v5539_v25 }
0x17b7   : > { %4657 = vmatpush.msrb.mxu2 %v5538_v26 }
0x17b9   : > { %v4502_v15 = vpop.f32.mrf.mxu1  ;;  %4658 = vmatpush.msrb.mxu2 %v5537_v28 }
0x17ba   : > { %v4503_v29 = vadd.f32 %v5864_v27, %v4502_v15  ;;  %5524 = vmatmul.msk.f32.vlgmr.msra.gmra.mxu2 %vm2368_vm1, %v7374_v0  ;;  %v5530_v15 = vld [vmem:[%s7884_s20 + $0x28] sm:$0xff] }
0x17bc   : > { %5525 = vmatpush.xpose.msk.msrb.mxu3 %vm2758_vm11, %v4503_v29 }
0x17c0   : > { %4685 = vmatpush.msra.mxu3 %v5546_v9 }
0x17c2   : > { %5542 = vmatmul.msk.f32.vlgmr.msrb.gmra.mxu2 %vm2368_vm1, %v7374_v0  ;;  %4686 = vmatpush.msra.mxu3 %v5545_v11  ;;  %v5578_v11 = vld [vmem:[%s7888_s24 + $0xe0] sm:$0xff] }
0x17c4   : > { %4687 = vmatpush.msra.mxu3 %v5544_v12 }
0x17c6   : > { %4688 = vmatpush.msra.mxu3 %v5543_v6 }
0x1835   : > { %v4375_v34 = vpop.f32.mrf.mxu2 }
0x1836   : > { %v4399_v35 = vadd.f32 %v4398_v33, %v4375_v34  ;;  %v5529_v34 = vld [vmem:[%s7884_s20 + $0x20] sm:$0xff] }
0x1838   : > { %v4401_v37 = vadd.f32 %v4399_v35, %v7485_v41 }
0x183a   : > { %v7583_v38 = vadd.f32 %v5865_v36, %v4401_v37 }
0x183c   : > { %v4412_v42 = vsel %vm2368_vm1, %v7583_v38, 0.0 }
0x183d   : > { %v4532_v43 = vpop.f32.mrf.mxu2  ;;  %4413 = vadd.xlane.f32.xlu2 %v4412_v42 }
0x183e   : > { %v4533_v45 = vadd.f32 %v5866_v40, %v4532_v43 }
0x1840   : > { %5527 = vmatpush.msk.msrb.mxu0 %vm3658_vm4, %v4533_v45 }
0x1845   : > { %v4660_v5 = vpop.f32.mrf.mxu2 }
0x1846   : > { %v4661_v8 = vadd.f32 %v5867_v4, %v4660_v5  ;;  %v5560_v4 = vld [vmem:[%s7887_s21 + $0x20] sm:$0xff]  ;;  %v5581_v5 = vld [vmem:[%s7888_s24 + $0xf8] sm:$0xff] }
0x18b0   : > { %v4414_v46 = vpop.xlane.xlu2 %4413 }
0x18b1   : > { %v4415_v47 = vmul.f32 %v4414_v46, %v7273_v51 }
0x18b3   : > { %v4416_v48 = vsub.f32 %v7583_v38, %v4415_v47 }
0x18b5   : > { %v4417_v41 = vmul.f32 %v4416_v48, %v4416_v48 }
0x18b7   : > { %v4418_v44 = vsel %vm2368_vm1, %v4417_v41, 0.0  ;;  %v5554_v41 = vld [vmem:[%s7884_s20 + $0x38] sm:$0xff] }
0x18b8   : > { %4419 = vadd.xlane.f32.xlu0 %v4418_v44  ;;  %4778 = vmatpush.msra.mxu2 %v5554_v41 }
0x192b   : > { %v4420_v53 = vpop.xlane.xlu0 %4419 }
0x192c   : > { %v4421_v54 = vmul.f32 %v4420_v53, %v7273_v51 }
0x192e   : > { %v4422_v55 = vadd.f32 1e-05, %v4421_v54 }
0x1930   : > { %5939 = vrsqrt.f32 %v4422_v55  ;;  %vm4429_vm3 = vweird.f32 %v4422_v55 }
0x1936   : > { %v5940_v56 = vpop.eup %5939 }
0x1937   : > { %v4424_v57 = vmul.f32 %v5940_v56, %v4422_v55  ;;  %vm4430_vm2 = vweird.f32 %v5940_v56  ;;  %v5873_v55 = vld [vmem:[%s7886_s3 + $0x1] ss:$0 sm:$0xff] }
0x1938   : > { %vm4431_vm5 = vmor %vm4429_vm3, %vm4430_vm2 }
0x1939   : > { %v4425_v58 = vmul.f32 %v5940_v56, %v4424_v57 }
0x193b   : > { %v4426_v59 = vmul.f32 0.5, %v4425_v58 }
0x193d   : > { %v4427_v22 = vsub.f32 1.5, %v4426_v59 }
0x193f   : > { %v4428_v60 = vmul.f32 %v5940_v56, %v4427_v22 }
0x1941   : > { %v4432_v63 = vsel %vm4431_vm5, %v5940_v56, %v4428_v60 }
0x1942   : > { %v4433_v1 = vmul.f32 %v4432_v63, %v4416_v48 }
0x1944   : > { %v4437_v7 = vmul.f32 %v5868_v61, %v4433_v1  ;;  %v5562_v1 = vld [vmem:[%s7887_s21 + $0x30] sm:$0xff] }
0x1946   : > { %v4441_v2 = vadd.f32 %v5869_v62, %v4437_v7  ;;  %v5561_v62 = vld [vmem:[%s7887_s21 + $0x28] sm:$0xff]  ;;  %v5580_v7 = vld [vmem:[%s7888_s24 + $0xf0] sm:$0xff] }
0x1948   : > { %5512 = vmatmul.msk.f32.vlgmr.msra.gmra.mxu0 %vm2368_vm1, %v4441_v2  ;;  %5536 = vmatmul.msk.f32.vlgmr.msrb.gmra.mxu1 %vm2368_vm1, %v4441_v2  ;;  %v5579_v2 = vld [vmem:[%s7888_s24 + $0xe8] sm:$0xff] }
0x1949   : > { %5549 = vmatpush.xpose.msk.msra.mxu0 %vm2758_vm11, %v4661_v8 }
0x19c5   : > { %v4472_v14 = vpop.f32.mrf.mxu0  ;;  %v4630_v32 = vpop.f32.mrf.mxu1 }
0x19c6   : > { %v4473_v16 = vadd.f32 %v5870_v13, %v4472_v14  ;;  %v4631_v33 = vadd.f32 %v5871_v31, %v4630_v32  ;;  %v5569_v31 = vld [vmem:[%s7888_s24 + $0x98] sm:$0xff]  ;;  %v5568_v32 = vld [vmem:[%s7888_s24 + $0x90] sm:$0xff] }
0x19c8   : > { %5526 = vmatmul.msk.f32.vlgmr.msrb.gmra.mxu3 %vm2758_vm11, %v4473_v16 }
0x19c9   : > { %4801 = vmatpush.msrb.mxu3 %v5530_v15  ;;  %v5573_v15 = vld [vmem:[%s7888_s24 + $0xb8] sm:$0xff] }
0x19cb   : > { %4802 = vmatpush.msrb.mxu3 %v5529_v34  ;;  %v5566_v34 = vld [vmem:[%s7888_s24 + $0x80] sm:$0xff] }
0x19d0   : > { %5548 = vmatmul.msk.f32.vlgmr.msra.gmra.mxu3 %vm2368_vm1, %v7374_v0 }
0x1a4b   : > { %v4558_v17 = vpop.f32.mrf.mxu3 }
0x1a4c   : > { %v4561_v18 = vmul.f32 0.25, %v4558_v17 }
0x1a4e   : > { %v4562_v10 = vadd.f32 %v4561_v18, %v7429_v3 }
0x1a50   : > { %v4563_v19 = vsel %vm3643_vm8, %v4562_v10, -inf }
0x1a51   : > { %4564 = vmax.xlane.f32.xlu1 %v4563_v19 }
0x1a53   : > { %v4690_v21 = vpop.f32.mrf.mxu3 }
0x1a54   : > { %v4691_v23 = vadd.f32 %v5872_v20, %v4690_v21  ;;  %v5875_v21 = vld [vmem:[%s7891_s26 + $0x1] ss:$0 sm:$0xff] }
0x1a56   : > { %5551 = vmatpush.msk.msra.mxu1 %vm3658_vm4, %v4691_v23 }
0x1a58   : > { %4907 = vmatpush.msrb.mxu1 %v5581_v5 }
0x1a5a   : > { %4908 = vmatpush.msrb.mxu1 %v5580_v7 }
0x1a5c   : > { %4909 = vmatpush.msrb.mxu1 %v5579_v2 }
0x1a5e   : > { %4910 = vmatpush.msrb.mxu1 %v5578_v11  ;;  %v5879_v11 = vld [vmem:[#allocation24] ss:$0 sm:$0xff] }
0x1ac4   : > { %v4565_v25 = vpop.xlane.xlu1 %4564 }
0x1ac5   : > { %v4566_v26 = vsub.f32 %v4562_v10, %v4565_v25  ;;  %v5874_v10 = vld [vmem:[%s7890_s25 + $0x1] ss:$0 sm:$0xff] }
0x1ac7   : > { %v4567_v27 = vmul.f32 1.442695, %v4566_v26  ;;  %v5577_v26 = vld [vmem:[%s7888_s24 + $0xd8] sm:$0xff] }
0x1ac8   : > { %4911 = vmatpush.msrb.mxu1 %v5577_v26 }
0x1ac9   : > { %5941 = vpow2.f32 %v4567_v27  ;;  %v5576_v27 = vld [vmem:[%s7888_s24 + $0xd0] sm:$0xff] }
0x1aca   : > { %4912 = vmatpush.msrb.mxu1 %v5576_v27 }
0x1acf   : > { %v5942_v0 = vpop.eup %5941 }
0x1ad0   : > { %v4569_v28 = vsel %vm3643_vm8, %v5942_v0, 0.0 }
0x1ad1   : > { %4570 = vadd.xlane.f32.xlu2 %v4569_v28  ;;  %v5574_v28 = vld [vmem:[%s7888_s24 + $0xc0] sm:$0xff] }
0x1b44   : > { %v4571_v29 = vpop.xlane.xlu2 %4570 }
0x1b45   : > { %5943 = vrcp.f32 %v4571_v29  ;;  %v5572_v29 = vld [vmem:[%s7888_s24 + $0xb0] sm:$0xff] }
0x1b4b   : > { %v5944_v39 = vpop.eup %5943 }
0x1b4c   : > { %v4573_v30 = vmul.f32 %v5944_v39, %v5942_v0  ;;  %v5575_v0 = vld [vmem:[%s7888_s24 + $0xc8] sm:$0xff] }
0x1b4d   : > { %4913 = vmatpush.msrb.mxu1 %v5575_v0  ;;  %v5571_v39 = vld [vmem:[%s7888_s24 + $0xa8] sm:$0xff] }
0x1b4e   : > { %5528 = vmatmul.msk.f32.vlgmr.msrb.gmra.mxu0 %vm3643_vm8, %v4573_v30  ;;  %v5570_v30 = vld [vmem:[%s7888_s24 + $0xa0] sm:$0xff] }
0x1b4f   : > { %4914 = vmatpush.msrb.mxu1 %v5574_v28 }
0x1b51   : > { %4915 = vmatpush.msrb.mxu1 %v5573_v15 }
0x1b53   : > { %4916 = vmatpush.msrb.mxu1 %v5572_v29 }
0x1b55   : > { %4917 = vmatpush.msrb.mxu1 %v5571_v39 }
0x1b56   : > { %5550 = vmatmul.msk.f32.vlgmr.msra.gmra.mxu0 %vm2758_vm11, %v4631_v33  ;;  %v5567_v33 = vld [vmem:[%s7888_s24 + $0x88] sm:$0xff] }
0x1b57   : > { %4918 = vmatpush.msrb.mxu1 %v5570_v30 }
0x1b59   : > { %4919 = vmatpush.msrb.mxu1 %v5569_v31 }
0x1b5b   : > { %4920 = vmatpush.msrb.mxu1 %v5568_v32 }
0x1b5d   : > { %4921 = vmatpush.msrb.mxu1 %v5567_v33 }
0x1b5f   : > { %4922 = vmatpush.msrb.mxu1 %v5566_v34 }
0x1bcb   : > { %v4597_v35 = vpop.f32.mrf.mxu0 }
0x1bcc   : > { %5556 = vmatmul.msk.f32.vlgmr.msrb.gmra.mxu3 %vm2758_vm11, %v4597_v35  ;;  %v5876_v35 = vld [vmem:[%s7893_s27 + $0x1] ss:$0 sm:$0xff] }
0x1bd3   : > { %v4716_v36 = vpop.f32.mrf.mxu0 }
0x1bd4   : > { %v4719_v37 = vmul.f32 0.25, %v4716_v36 }
0x1bd6   : > { %v4720_v40 = vadd.f32 %v4719_v37, %v7429_v3  ;;  %v5553_v3 = vld [vmem:[%s7884_s20 + $0x30] sm:$0xff] }
0x1bd7   : > { %4779 = vmatpush.msra.mxu2 %v5553_v3 }
0x1bd8   : > { %v4721_v42 = vsel %vm3643_vm8, %v4720_v40, -inf }
0x1bd9   : > { %4722 = vmax.xlane.f32.xlu0 %v4721_v42 }
0x1c4c   : > { %v4723_v43 = vpop.xlane.xlu0 %4722 }
0x1c4d   : > { %v4724_v45 = vsub.f32 %v4720_v40, %v4723_v43 }
0x1c4f   : > { %v4725_v46 = vmul.f32 1.442695, %v4724_v45  ;;  %v4804_v52 = vpop.f32.mrf.mxu3 }
0x1c51   : > { %5945 = vpow2.f32 %v4725_v46 }
0x1c57   : > { %v5946_v47 = vpop.eup %5945 }
0x1c58   : > { %v4727_v48 = vsel %vm3643_vm8, %v5946_v47, 0.0 }
0x1c59   : > { %4728 = vadd.xlane.f32.xlu1 %v4727_v48 }
0x1ccc   : > { %v4729_v44 = vpop.xlane.xlu1 %4728 }
0x1ccd   : > { %5947 = vrcp.f32 %v4729_v44 }
0x1cd3   : > { %v5948_v49 = vpop.eup %5947 }
0x1cd4   : > { %v4731_v50 = vmul.f32 %v5948_v49, %v5946_v47  ;;  %v5877_v49 = vld [vmem:[%s7894_s28 + $0x1] ss:$0 sm:$0xff] }
0x1cd6   : > { %5552 = vmatmul.msk.f32.vlgmr.msra.gmra.mxu1 %vm3643_vm8, %v4731_v50 }
0x1d53   : > { %v4755_v24 = vpop.f32.mrf.mxu1 }
0x1d54   : > { %5555 = vmatmul.msk.f32.vlgmr.msra.gmra.mxu2 %vm2758_vm11, %v4755_v24 }
0x1dd7   : > { %v4781_v53 = vpop.f32.mrf.mxu2 }
0x1dd8   : > { %v4805_v54 = vadd.f32 %v4804_v52, %v4781_v53 }
0x1dda   : > { %v4807_v56 = vadd.f32 %v4805_v54, %v7583_v38  ;;  %v5563_v38 = vld [vmem:[%s7887_s21 + $0x38] sm:$0xff] }
0x1ddb   : > { %4873 = vmatpush.msrb.mxu0 %v5563_v38 }
0x1ddc   : > { %v7631_v57 = vadd.f32 %v5873_v55, %v4807_v56 }
0x1ddd   : > { %4874 = vmatpush.msrb.mxu0 %v5562_v1 }
0x1dde   : > { %v4818_v58 = vsel %vm2368_vm1, %v7631_v57, 0.0 }
0x1ddf   : > { %4819 = vadd.xlane.f32.xlu2 %v4818_v58  ;;  %4875 = vmatpush.msrb.mxu0 %v5561_v62 }
0x1de1   : > { %4876 = vmatpush.msrb.mxu0 %v5560_v4 }
0x1e52   : > { %v4820_v59 = vpop.xlane.xlu2 %4819 }
0x1e53   : > { %v4821_v22 = vmul.f32 %v4820_v59, %v7273_v51  ;;  %v4969_v59 = vld [vmem:[%s7895_s22 + $0x18] sm:$0xff]  ;;  %s7897_s22 = sld [smem:[#allocation101_spill]] }
0x1e54   : > { %4989 = vmatpush.msrb.mxu2 %v4969_v59 }
0x1e55   : > { %v4822_v60 = vsub.f32 %v7631_v57, %v4821_v22  ;;  %v4968_v22 = vld [vmem:[%s7896_s0 + $0x10] sm:$0xff] }
0x1e56   : > { %4990 = vmatpush.msrb.mxu2 %v4968_v22 }
0x1e57   : > { %v4823_v61 = vmul.f32 %v4822_v60, %v4822_v60 }
0x1e59   : > { %v4824_v63 = vsel %vm2368_vm1, %v4823_v61, 0.0 }
0x1e5a   : > { %4825 = vadd.xlane.f32.xlu0 %v4824_v63 }
0x1ecd   : > { %v4826_v8 = vpop.xlane.xlu0 %4825 }
0x1ece   : > { %v4827_v9 = vmul.f32 %v4826_v8, %v7273_v51  ;;  %v5878_v8 = vld [vmem:[#allocation23] ss:$0 sm:$0xff] }
0x1ed0   : > { %v4828_v12 = vadd.f32 1e-05, %v4827_v9 }
0x1ed2   : > { %5949 = vrsqrt.f32 %v4828_v12  ;;  %vm4835_vm4 = vweird.f32 %v4828_v12 }
0x1ed8   : > { %v5950_v6 = vpop.eup %5949 }
0x1ed9   : > { %v4830_v13 = vmul.f32 %v5950_v6, %v4828_v12  ;;  %vm4836_vm11 = vweird.f32 %v5950_v6 }
0x1eda   : > { %vm4837_vm6 = vmor %vm4835_vm4, %vm4836_vm11 }
0x1edb   : > { %v4831_v14 = vmul.f32 %v5950_v6, %v4830_v13 }
0x1edd   : > { %v4832_v16 = vmul.f32 0.5, %v4831_v14 }
0x1edf   : > { %v4833_v17 = vsub.f32 1.5, %v4832_v16 }
0x1ee1   : > { %v4834_v18 = vmul.f32 %v5950_v6, %v4833_v17  ;;  %v5955_v17 = vld [vmem:[%s7253_s7] sm:$0xff] }
0x1ee3   : > { %v4838_v19 = vsel %vm4837_vm6, %v5950_v6, %v4834_v18 }
0x1ee4   : > { %v4839_v20 = vmul.f32 %v4838_v19, %v4822_v60  ;;  %v4967_v60 = vld [vmem:[%s7896_s0 + $0x8] sm:$0xff] }
0x1ee5   : > { %4991 = vmatpush.msrb.mxu2 %v4967_v60 }
0x1ee6   : > { %v4843_v23 = vmul.f32 %v5874_v10, %v4839_v20 }
0x1ee8   : > { %v4847_v25 = vadd.f32 %v5875_v21, %v4843_v23 }
0x1eea   : > { %5565 = vmatmul.msk.f32.vlgmr.msrb.gmra.mxu0 %vm2368_vm1, %v4847_v25 }
0x1f67   : > { %v4878_v36 = vpop.f32.mrf.mxu0 }
0x1f68   : > { %v4879_v37 = vadd.f32 %v5876_v35, %v4878_v36 }
0x1f6a   : > { %v4882_v40 = vmul.f32 0.044715, %v4879_v37  ;;  %v4881_v48 = vmul.f32 0.5, %v4879_v37 }
0x1f6c   : > { %v4883_v42 = vmul.f32 %v4882_v40, %v4879_v37 }
0x1f6e   : > { %v4884_v43 = vmul.f32 %v4883_v42, %v4879_v37 }
0x1f70   : > { %v4885_v45 = vadd.f32 %v4884_v43, %v4879_v37 }
0x1f72   : > { %v4886_v46 = vmul.f32 0.7978846, %v4885_v45 }
0x1f74   : > { %5951 = vtanh.f32 %v4886_v46 }
0x1f7a   : > { %v5952_v47 = vpop.eup %5951 }
0x1f7b   : > { %v4888_v41 = vadd.f32 1.0, %v5952_v47 }
0x1f7d   : > { %v4889_v44 = vmul.f32 %v4888_v41, %v4881_v48 }
0x1f7f   : > { %4923 = vmatmul.f32.vlgmr.msrb.gmra.mxu1 %v4889_v44 }
0x1ffc   : > { %v4924_v50 = vpop.f32.mrf.mxu1 }
0x1ffd   : > { %v4927_v3 = vadd.f32 %v4924_v50, %v7631_v57  ;;  %v4966_v57 = vld [vmem:[%s7896_s0] sm:$0xff]  ;;  %s2224_s0 = scalar_lea.vmem %s7897_s22, %s7102_s2 }
0x1ffe   : > { %4992 = vmatpush.msrb.mxu2 %v4966_v57 }
0x1fff   : > { %v4933_v24 = vadd.f32 %v5877_v49, %v4927_v3 }
0x2001   : > { %v4936_v52 = vsel %vm2368_vm1, %v4933_v24, 0.0 }
0x2002   : > { %4937 = vadd.xlane.f32.xlu1 %v4936_v52 }
0x2075   : > { %v4938_v53 = vpop.xlane.xlu1 %4937 }
0x2076   : > { %v4939_v54 = vmul.f32 %v4938_v53, %v7273_v51 }
0x2078   : > { %v4940_v55 = vsub.f32 %v4933_v24, %v4939_v54 }
0x207a   : > { %v4941_v56 = vmul.f32 %v4940_v55, %v4940_v55 }
0x207c   : > { %v4942_v58 = vsel %vm2368_vm1, %v4941_v56, 0.0 }
0x207d   : > { %4943 = vadd.xlane.f32.xlu2 %v4942_v58 }
0x20f0   : > { %v4944_v61 = vpop.xlane.xlu2 %4943 }
0x20f1   : > { %v4945_v63 = vmul.f32 %v4944_v61, %v7273_v51  ;;  %v5880_v51 = vld [vmem:[#allocation26] ss:$0 sm:$0xff] }
0x20f3   : > { %v4946_v38 = vadd.f32 1e-05, %v4945_v63 }
0x20f5   : > { %5953 = vrsqrt.f32 %v4946_v38  ;;  %vm4953_vm8 = vweird.f32 %v4946_v38 }
0x20fb   : > { %v5954_v1 = vpop.eup %5953 }
0x20fc   : > { %v4948_v62 = vmul.f32 %v5954_v1, %v4946_v38  ;;  %vm4954_vm7 = vweird.f32 %v5954_v1 }
0x20fd   : > { %vm4955_vm9 = vmor %vm4953_vm8, %vm4954_vm7 }
0x20fe   : > { %v4949_v4 = vmul.f32 %v5954_v1, %v4948_v62 }
0x2100   : > { %v4950_v5 = vmul.f32 0.5, %v4949_v4 }
0x2102   : > { %v4951_v7 = vsub.f32 1.5, %v4950_v5 }
0x2104   : > { %v4952_v2 = vmul.f32 %v5954_v1, %v4951_v7 }
0x2106   : > { %v4956_v9 = vsel %vm4955_vm9, %v5954_v1, %v4952_v2 }
0x2107   : > { %v4957_v12 = vmul.f32 %v4956_v9, %v4940_v55 }
0x2109   : > { %v4961_v6 = vmul.f32 %v5878_v8, %v4957_v12 }
0x210b   : > { %v4965_v13 = vadd.f32 %v5879_v11, %v4961_v6 }
0x210d   : > { %5583 = vmatmul.msk.f32.vlgmr.msrb.gmra.mxu2 %vm2368_vm1, %v4965_v13 }
0x2190   : > { %v4994_v14 = vpop.f32.mrf.mxu2 }
0x2191   : > { %v4995_v16 = vadd.f32 %v5880_v51, %v4994_v14 }
0x2193   : > { %v4997_v18 = vsub.f32 %v4995_v16, %v5955_v17 }
0x2195   : > { %v4998_v10 = vmul.f32 %v4997_v18, %v4997_v18 }
0x2197   : > { %v4999_v19 = vsel %vm3063_vm13, %v4998_v10, 0.0 }
0x2198   : > { %5000 = vadd.xlane.f32.xlu0 %v4999_v19 }
0x220b   : > { %v5001_v20 = vpop.xlane.xlu0 %5000 }
0x220c   : > { %v5002_v21 = vrot.slane %v5001_v20, 4 }
0x220e   : > { %v5003_v23 = vadd.f32 %v5002_v21, %v5001_v20 }
0x2210   : > { %v5004_v25 = vrot.slane %v5003_v23, 2 }
0x2212   : > { %v5005_v26 = vadd.f32 %v5004_v25, %v5003_v23 }
0x2214   : > { %v5006_v27 = vrot.slane %v5005_v26, 1 }
0x2216   : > { %v5007_v0 = vadd.f32 %v5006_v27, %v5005_v26 }
0x2218   : > { %5009 = vst.msk [vmem:[%s2224_s0] sm:$0x1] %vm5008_vm10, %v5007_v0 }
0x2219 PF: > { %s7898_s1 = sld [smem:[#allocation102_spill]] }
0x221f   : > { %s154_s22 = sadd.s32 1, %s7898_s1  }
0x2220   : > { %p151_p2 = scmp.ge.s32.totalorder %s154_s22, 4  }
0x2222   :  { %153 = sbr.rel (!%p151_p2) target bundleno = 147 (0x93), region = 512 }
0x2227   :  { %5027 = vsyncpa [#allocation3], 1 }
0x2228   :  { %5029 = vsyncpa [#allocation3 + $0x1], 1 }
0x2229   :  { %5030 = vsyncpa [#allocation10], 1 }
0x222a   :  { %5031 = vsyncpa [#allocation13], 1 }
0x222b   :  { %5032 = vsyncpa [#allocation16], 1 }
0x222c   :  { %5033 = vsyncpa [#allocation19], 1 }
0x222d   :  { %5034 = vsyncpa [#allocation22], 1 }
0x222e   :  { %5035 = vsyncpa [#allocation25], 1 }
0x222f   :  { %5036 = vsyncpa [#allocation4], 1 }
0x2230   :  { %5038 = vsyncpa [#allocation4 + $0x1], 1 }
0x2231   :  { %5039 = vsyncpa [#allocation6], 1 }

</bundles_post_ra>
